<compile_context>
chip_gen: v5e
topology: v5e:2x2
jax: 0.10.0
libtpu: 0.0.40
codegen_flags: <defaults>
</compile_context>

<pallas_src>
import functools
import math

import jax
import jax.numpy as jnp
import numpy as np
from jax.experimental import pallas as pl
from jax.experimental.pallas import tpu as pltpu

# ----------------------------- config ---------------------------------------
IN_DIM = 16
HIDDEN = 32
NUM_LAYERS = 2
BIDIRECTIONAL = True
NUM_DIR = 2 if BIDIRECTIONAL else 1
NUM_CLASSES = 4
BATCH = 2
SEQ = 8


# ------------------------- fused forward kernel -----------------------------
def _lstm_classifier_kernel(
    x_ref,                               # (T*B, IN_DIM)   time-major, flattened
    wih0_ref, whh0_ref, b0_ref,          # (2, IN_DIM, 4H), (2, H, 4H), (2, 1, 4H)
    wih1_ref, whh1_ref, b1_ref,          # (2, 2H, 4H),     (2, H, 4H), (2, 1, 4H)
    w1_ref, hb1_ref, w2_ref, hb2_ref, w3_ref, hb3_ref,   # MLP head
    out_ref,                             # (B, NUM_CLASSES)
    seq_scr,                             # VMEM (T*B, 2H): layer-0 output sequence
):
    T, B, H = SEQ, BATCH, HIDDEN

    # Lane mask selecting the 'g' (cell candidate) block of the (B, 4H) gates.
    # Computed once and reused by every step (hoisted broadcast).
    lane = jax.lax.broadcasted_iota(jnp.int32, (B, 4 * H), 1)
    g_mask = jnp.logical_and(lane >= 2 * H, lane < 3 * H)

    def activate(gates):
        # Full-vreg sigmoid/tanh (128 lanes each) + one lane-masked select,
        # then split into the i, f, g, o blocks (PyTorch gate order).
        act = jnp.where(g_mask, jnp.tanh(gates), jax.nn.sigmoid(gates))
        return (act[:, 0:H], act[:, H:2 * H],
                act[:, 2 * H:3 * H], act[:, 3 * H:4 * H])

    def cell_step(gates, h_prev, c_prev):
        i_g, f_g, g_g, o_g = activate(gates)
        c_new = f_g * c_prev + i_g * g_g
        h_new = o_g * jnp.tanh(c_new)
        return h_new, c_new

    # -------------------- layer 0: both directions, full sequence -----------
    x0 = x_ref[...]                                        # (T*B, IN_DIM)
    for d in range(NUM_DIR):
        # Hoisted input projection + combined bias (off the serial chain).
        gx = (jnp.dot(x0, wih0_ref[d], preferred_element_type=jnp.float32)
              + b0_ref[d])                                 # (T*B, 4H)
        whh = whh0_ref[d]                                  # (H, 4H)
        h = jnp.zeros((B, H), jnp.float32)
        c = jnp.zeros((B, H), jnp.float32)
        t_order = range(T) if d == 0 else range(T - 1, -1, -1)
        for t in t_order:                                  # unrolled, T=8
            gates = gx[t * B:(t + 1) * B, :] + jnp.dot(
                h, whh, preferred_element_type=jnp.float32)
            h, c = cell_step(gates, h, c)
            # fwd in lanes [0:H), bwd in lanes [H:2H)  (== concat along feature)
            seq_scr[t * B:(t + 1) * B, d * H:(d + 1) * H] = h

    # -------------------- layer 1: only what lstm_out[-1] needs -------------
    x1 = seq_scr[...]                                      # (T*B, 2H)

    # Forward direction: full recurrence, keep only the final hidden state.
    gx_f = (jnp.dot(x1, wih1_ref[0], preferred_element_type=jnp.float32)
            + b1_ref[0])                                   # (T*B, 4H)
    whh_f = whh1_ref[0]
    h_f = jnp.zeros((B, H), jnp.float32)
    c_f = jnp.zeros((B, H), jnp.float32)
    for t in range(T):
        gates = gx_f[t * B:(t + 1) * B, :] + jnp.dot(
            h_f, whh_f, preferred_element_type=jnp.float32)
        h_f, c_f = cell_step(gates, h_f, c_f)

    # Backward direction: its output at original position T-1 is its FIRST
    # recurrence step (zero initial state), so h_prev @ W_hh and f * c_prev
    # are exactly zero and are skipped.
    gates_b = (jnp.dot(x1[(T - 1) * B:T * B, :], wih1_ref[1],
                       preferred_element_type=jnp.float32) + b1_ref[1])
    i_b, _f_b, g_b, o_b = activate(gates_b)
    c_b = i_b * g_b
    h_b = o_b * jnp.tanh(c_b)

    # -------------------- hidden2label MLP head ------------------------------
    # concat([h_f, h_b]) @ W1 implemented as a split matmul (avoids an
    # in-kernel lane concat): W1[:H] multiplies the fwd half, W1[H:] the bwd.
    h1 = jnp.maximum(
        jnp.dot(h_f, w1_ref[0:H, :], preferred_element_type=jnp.float32)
        + jnp.dot(h_b, w1_ref[H:2 * H, :], preferred_element_type=jnp.float32)
        + hb1_ref[...], 0.0)
    h2 = jnp.maximum(
        jnp.dot(h1, w2_ref[...], preferred_element_type=jnp.float32)
        + hb2_ref[...], 0.0)
    logits = (jnp.dot(h2, w3_ref[...], preferred_element_type=jnp.float32)
              + hb3_ref[...])
    out_ref[...] = jax.nn.sigmoid(logits)


# ------------------------ parameter construction ----------------------------
def _uniform(key, shape, bound):
    return jax.random.uniform(key, shape, jnp.float32, -bound, bound)


def make_params(key):
    params = {"lstm": [], "head": []}
    bound = 1.0 / math.sqrt(HIDDEN)
    for layer in range(NUM_LAYERS):
        layer_in = IN_DIM if layer == 0 else HIDDEN * NUM_DIR
        wih_d, whh_d, b_d = [], [], []
        for _d in range(NUM_DIR):
            key, k1, k2, k3, k4 = jax.random.split(key, 5)
            w_ih = _uniform(k1, (4 * HIDDEN, layer_in), bound)   # PyTorch shape
            w_hh = _uniform(k2, (4 * HIDDEN, HIDDEN), bound)
            b_ih = _uniform(k3, (4 * HIDDEN,), bound)
            b_hh = _uniform(k4, (4 * HIDDEN,), bound)
            wih_d.append(w_ih.T)                                 # (layer_in, 4H)
            whh_d.append(w_hh.T)                                 # (H, 4H)
            b_d.append((b_ih + b_hh).reshape(1, 4 * HIDDEN))
        params["lstm"].append({
            "wih": jnp.stack(wih_d),                             # (dir, layer_in, 4H)
            "whh": jnp.stack(whh_d),                             # (dir, H, 4H)
            "b": jnp.stack(b_d),                                 # (dir, 1, 4H)
        })
    # hidden2label: Linear(H*dir,H) -> ReLU -> Drop -> Linear(H,H) -> ReLU
    #               -> Drop -> Linear(H,C) -> Sigmoid
    dims = [(HIDDEN * NUM_DIR, HIDDEN), (HIDDEN, HIDDEN), (HIDDEN, NUM_CLASSES)]
    for fan_in, fan_out in dims:
        key, kw, kb = jax.random.split(key, 3)
        bnd = 1.0 / math.sqrt(fan_in)
        w = _uniform(kw, (fan_out, fan_in), bnd)                 # PyTorch shape
        b = _uniform(kb, (fan_out,), bnd)
        params["head"].append((w.T, b.reshape(1, fan_out)))      # transposed for x @ W^T
    return params


# ------------------------------ forward --------------------------------------
def forward(x_bdt, params):
    """x_bdt: (B, in_dim, T)  ->  (B, num_classes). One fused pallas_call."""
    # x.permute(2, 0, 1) -> time-major, flattened to (T*B, in_dim) for the
    # hoisted input projections inside the kernel.
    x2d = jnp.transpose(x_bdt, (2, 0, 1)).reshape(SEQ * BATCH, IN_DIM)
    l0, l1 = params["lstm"]
    (w1, hb1), (w2, hb2), (w3, hb3) = params["head"]
    return pl.pallas_call(
        _lstm_classifier_kernel,
        out_shape=jax.ShapeDtypeStruct((BATCH, NUM_CLASSES), jnp.float32),
        scratch_shapes=[
            pltpu.VMEM((SEQ * BATCH, NUM_DIR * HIDDEN), jnp.float32),
        ],
    )(x2d,
      l0["wih"], l0["whh"], l0["b"],
      l1["wih"], l1["whh"], l1["b"],
      w1, hb1, w2, hb2, w3, hb3)


# ------------------------- pure-JAX reference --------------------------------
def _ref_forward(x_bdt, params):
    x_tbd = jnp.transpose(x_bdt, (2, 0, 1))
    inp = x_tbd
    T, B, _ = inp.shape
    for layer in range(NUM_LAYERS):
        wih = params["lstm"][layer]["wih"]
        whh = params["lstm"][layer]["whh"]
        bias = params["lstm"][layer]["b"]
        outs = []
        for d in range(NUM_DIR):
            xin = inp if d == 0 else inp[::-1]
            h = jnp.zeros((B, HIDDEN), jnp.float32)
            c = jnp.zeros((B, HIDDEN), jnp.float32)
            hs = []
            for t in range(T):
                gates = xin[t] @ wih[d] + h @ whh[d] + bias[d]
                i, f, g, o = jnp.split(gates, 4, axis=-1)
                i, f, o = jax.nn.sigmoid(i), jax.nn.sigmoid(f), jax.nn.sigmoid(o)
                g = jnp.tanh(g)
                c = f * c + i * g
                h = o * jnp.tanh(c)
                hs.append(h)
            out = jnp.stack(hs, axis=0)
            if d == 1:
                out = out[::-1]
            outs.append(out)
        inp = jnp.concatenate(outs, axis=-1) if NUM_DIR == 2 else outs[0]
    last = inp[-1]
    (w1, b1), (w2, b2), (w3, b3) = params["head"]
    h1 = jnp.maximum(last @ w1 + b1, 0.0)
    h2 = jnp.maximum(h1 @ w2 + b2, 0.0)
    return jax.nn.sigmoid(h2 @ w3 + b3)


# -------------------------------- main ---------------------------------------
if __name__ == "__main__":
    key = jax.random.PRNGKey(0)
    key, xkey, pkey = jax.random.split(key, 3)
    x = jax.random.normal(xkey, (BATCH, IN_DIM, SEQ), jnp.float32)
    params = make_params(pkey)

    y = jax.jit(functools.partial(forward, params=params))(x)
    y = jax.block_until_ready(y)

    assert y.shape == (BATCH, NUM_CLASSES), y.shape
    assert bool(jnp.all(jnp.isfinite(y)))

    y_ref = jax.block_until_ready(_ref_forward(x, params))
    np.testing.assert_allclose(np.asarray(y), np.asarray(y_ref),
                               rtol=2e-3, atol=2e-3)

    print("KERNEL_OK")
</pallas_src>

<mosaic_0001>
module attributes {stable_mosaic.version = 11 : i64} {
  func.func @_lstm_classifier_kernel(%arg0: memref<16x16xf32, #tpu.memory_space<vmem>>, %arg1: memref<2x16x128xf32, #tpu.memory_space<vmem>>, %arg2: memref<2x32x128xf32, #tpu.memory_space<vmem>>, %arg3: memref<2x1x128xf32, #tpu.memory_space<vmem>>, %arg4: memref<2x64x128xf32, #tpu.memory_space<vmem>>, %arg5: memref<2x32x128xf32, #tpu.memory_space<vmem>>, %arg6: memref<2x1x128xf32, #tpu.memory_space<vmem>>, %arg7: memref<64x32xf32, #tpu.memory_space<vmem>>, %arg8: memref<1x32xf32, #tpu.memory_space<vmem>>, %arg9: memref<32x32xf32, #tpu.memory_space<vmem>>, %arg10: memref<1x32xf32, #tpu.memory_space<vmem>>, %arg11: memref<32x4xf32, #tpu.memory_space<vmem>>, %arg12: memref<1x4xf32, #tpu.memory_space<vmem>>, %arg13: memref<2x4xf32, #tpu.memory_space<vmem>>, %arg14: memref<16x64xf32, #tpu.memory_space<vmem>>) attributes {dimension_semantics = [], scalar_prefetch = 0 : i64, scratch_operands = 1 : i64, tpu.core_type = #tpu.core_type<tc>} {
    %0 = tpu.iota {dimensions = array<i32: 1>} : vector<2x128xi32>
    %c64_i32 = arith.constant 64 : i32
    %1 = vector.broadcast %c64_i32 : i32 to vector<2x128xi32>
    %2 = arith.cmpi sge, %0, %1 : vector<2x128xi32>
    %c96_i32 = arith.constant 96 : i32
    %3 = vector.broadcast %c96_i32 : i32 to vector<2x128xi32>
    %4 = arith.cmpi slt, %0, %3 : vector<2x128xi32>
    %5 = arith.andi %2, %4 : vector<2x128xi1>
    %c0 = arith.constant 0 : index
    %c0_0 = arith.constant 0 : index
    %6 = vector.load %arg0[%c0, %c0_0] : memref<16x16xf32, #tpu.memory_space<vmem>>, vector<16x16xf32>
    %c0_1 = arith.constant 0 : index
    %c0_2 = arith.constant 0 : index
    %c0_3 = arith.constant 0 : index
    %7 = vector.load %arg1[%c0_1, %c0_2, %c0_3] : memref<2x16x128xf32, #tpu.memory_space<vmem>>, vector<1x16x128xf32>
    %8 = vector.shape_cast %7 : vector<1x16x128xf32> to vector<16x128xf32>
    %cst = arith.constant dense<0.000000e+00> : vector<16x128xf32>
    %9 = tpu.matmul %6, %8, %cst {dimension_numbers = #tpu.dot_dimension_numbers<[1], [0], [0], [1], [0, 0, 1, 1], [], []>} : vector<16x16xf32>, vector<16x128xf32>, vector<16x128xf32> -> vector<16x128xf32>
    %c0_4 = arith.constant 0 : index
    %c0_5 = arith.constant 0 : index
    %c0_6 = arith.constant 0 : index
    %10 = vector.load %arg3[%c0_4, %c0_5, %c0_6] : memref<2x1x128xf32, #tpu.memory_space<vmem>>, vector<1x1x128xf32>
    %11 = vector.shape_cast %10 : vector<1x1x128xf32> to vector<1x128xf32>
    %12 = vector.broadcast %11 : vector<1x128xf32> to vector<16x128xf32>
    %13 = arith.addf %9, %12 : vector<16x128xf32>
    %c0_7 = arith.constant 0 : index
    %c0_8 = arith.constant 0 : index
    %c0_9 = arith.constant 0 : index
    %14 = vector.load %arg2[%c0_7, %c0_8, %c0_9] : memref<2x32x128xf32, #tpu.memory_space<vmem>>, vector<1x32x128xf32>
    %15 = vector.shape_cast %14 : vector<1x32x128xf32> to vector<32x128xf32>
    %cst_10 = arith.constant 0.000000e+00 : f32
    %16 = vector.broadcast %cst_10 : f32 to vector<2x32xf32>
    %cst_11 = arith.constant 0.000000e+00 : f32
    %17 = vector.broadcast %cst_11 : f32 to vector<2x32xf32>
    %18 = vector.extract_strided_slice %13 {offsets = [0, 0], sizes = [2, 128], strides = [1, 1]} : vector<16x128xf32> to vector<2x128xf32>
    %cst_12 = arith.constant dense<0.000000e+00> : vector<2x128xf32>
    %19 = tpu.matmul %16, %15, %cst_12 {dimension_numbers = #tpu.dot_dimension_numbers<[1], [0], [0], [1], [0, 0, 1, 1], [], []>} : vector<2x32xf32>, vector<32x128xf32>, vector<2x128xf32> -> vector<2x128xf32>
    %20 = arith.addf %18, %19 : vector<2x128xf32>
    %21 = math.tanh %20 : vector<2x128xf32>
    %22 = arith.negf %20 : vector<2x128xf32>
    %23 = math.exp %22 : vector<2x128xf32>
    %cst_13 = arith.constant 1.000000e+00 : f32
    %24 = vector.broadcast %cst_13 : f32 to vector<2x128xf32>
    %25 = arith.addf %24, %23 : vector<2x128xf32>
    %26 = arith.divf %24, %25 : vector<2x128xf32>
    %27 = arith.select %5, %21, %26 : vector<2x128xi1>, vector<2x128xf32>
    %28 = vector.extract_strided_slice %27 {offsets = [0, 0], sizes = [2, 32], strides = [1, 1]} : vector<2x128xf32> to vector<2x32xf32>
    %29 = vector.extract_strided_slice %27 {offsets = [0, 32], sizes = [2, 32], strides = [1, 1]} : vector<2x128xf32> to vector<2x32xf32>
    %30 = vector.extract_strided_slice %27 {offsets = [0, 64], sizes = [2, 32], strides = [1, 1]} : vector<2x128xf32> to vector<2x32xf32>
    %31 = vector.extract_strided_slice %27 {offsets = [0, 96], sizes = [2, 32], strides = [1, 1]} : vector<2x128xf32> to vector<2x32xf32>
    %32 = arith.mulf %29, %17 : vector<2x32xf32>
    %33 = arith.mulf %28, %30 : vector<2x32xf32>
    %34 = arith.addf %32, %33 : vector<2x32xf32>
    %35 = math.tanh %34 : vector<2x32xf32>
    %36 = arith.mulf %31, %35 : vector<2x32xf32>
    %c0_14 = arith.constant 0 : index
    %c0_15 = arith.constant 0 : index
    %37 = vector.load %arg14[%c0_14, %c0_15] : memref<16x64xf32, #tpu.memory_space<vmem>>, vector<2x32xf32>
    tpu.vector_store %arg14[%c0_14, %c0_15], %36 {strides = array<i32>} : memref<16x64xf32, #tpu.memory_space<vmem>>, vector<2x32xf32>,
    %38 = vector.extract_strided_slice %13 {offsets = [2, 0], sizes = [2, 128], strides = [1, 1]} : vector<16x128xf32> to vector<2x128xf32>
    %cst_16 = arith.constant dense<0.000000e+00> : vector<2x128xf32>
    %39 = tpu.matmul %36, %15, %cst_16 {dimension_numbers = #tpu.dot_dimension_numbers<[1], [0], [0], [1], [0, 0, 1, 1], [], []>} : vector<2x32xf32>, vector<32x128xf32>, vector<2x128xf32> -> vector<2x128xf32>
    %40 = arith.addf %38, %39 : vector<2x128xf32>
    %41 = math.tanh %40 : vector<2x128xf32>
    %42 = arith.negf %40 : vector<2x128xf32>
    %43 = math.exp %42 : vector<2x128xf32>
    %cst_17 = arith.constant 1.000000e+00 : f32
    %44 = vector.broadcast %cst_17 : f32 to vector<2x128xf32>
    %45 = arith.addf %44, %43 : vector<2x128xf32>
    %46 = arith.divf %44, %45 : vector<2x128xf32>
    %47 = arith.select %5, %41, %46 : vector<2x128xi1>, vector<2x128xf32>
    %48 = vector.extract_strided_slice %47 {offsets = [0, 0], sizes = [2, 32], strides = [1, 1]} : vector<2x128xf32> to vector<2x32xf32>
    %49 = vector.extract_strided_slice %47 {offsets = [0, 32], sizes = [2, 32], strides = [1, 1]} : vector<2x128xf32> to vector<2x32xf32>
    %50 = vector.extract_strided_slice %47 {offsets = [0, 64], sizes = [2, 32], strides = [1, 1]} : vector<2x128xf32> to vector<2x32xf32>
    %51 = vector.extract_strided_slice %47 {offsets = [0, 96], sizes = [2, 32], strides = [1, 1]} : vector<2x128xf32> to vector<2x32xf32>
    %52 = arith.mulf %49, %34 : vector<2x32xf32>
    %53 = arith.mulf %48, %50 : vector<2x32xf32>
    %54 = arith.addf %52, %53 : vector<2x32xf32>
    %55 = math.tanh %54 : vector<2x32xf32>
    %56 = arith.mulf %51, %55 : vector<2x32xf32>
    %c2 = arith.constant 2 : index
    %c0_18 = arith.constant 0 : index
    %57 = vector.load %arg14[%c2, %c0_18] : memref<16x64xf32, #tpu.memory_space<vmem>>, vector<2x32xf32>
    tpu.vector_store %arg14[%c2, %c0_18], %56 {strides = array<i32>} : memref<16x64xf32, #tpu.memory_space<vmem>>, vector<2x32xf32>,
    %58 = vector.extract_strided_slice %13 {offsets = [4, 0], sizes = [2, 128], strides = [1, 1]} : vector<16x128xf32> to vector<2x128xf32>
    %cst_19 = arith.constant dense<0.000000e+00> : vector<2x128xf32>
    %59 = tpu.matmul %56, %15, %cst_19 {dimension_numbers = #tpu.dot_dimension_numbers<[1], [0], [0], [1], [0, 0, 1, 1], [], []>} : vector<2x32xf32>, vector<32x128xf32>, vector<2x128xf32> -> vector<2x128xf32>
    %60 = arith.addf %58, %59 : vector<2x128xf32>
    %61 = math.tanh %60 : vector<2x128xf32>
    %62 = arith.negf %60 : vector<2x128xf32>
    %63 = math.exp %62 : vector<2x128xf32>
    %cst_20 = arith.constant 1.000000e+00 : f32
    %64 = vector.broadcast %cst_20 : f32 to vector<2x128xf32>
    %65 = arith.addf %64, %63 : vector<2x128xf32>
    %66 = arith.divf %64, %65 : vector<2x128xf32>
    %67 = arith.select %5, %61, %66 : vector<2x128xi1>, vector<2x128xf32>
    %68 = vector.extract_strided_slice %67 {offsets = [0, 0], sizes = [2, 32], strides = [1, 1]} : vector<2x128xf32> to vector<2x32xf32>
    %69 = vector.extract_strided_slice %67 {offsets = [0, 32], sizes = [2, 32], strides = [1, 1]} : vector<2x128xf32> to vector<2x32xf32>
    %70 = vector.extract_strided_slice %67 {offsets = [0, 64], sizes = [2, 32], strides = [1, 1]} : vector<2x128xf32> to vector<2x32xf32>
    %71 = vector.extract_strided_slice %67 {offsets = [0, 96], sizes = [2, 32], strides = [1, 1]} : vector<2x128xf32> to vector<2x32xf32>
    %72 = arith.mulf %69, %54 : vector<2x32xf32>
    %73 = arith.mulf %68, %70 : vector<2x32xf32>
    %74 = arith.addf %72, %73 : vector<2x32xf32>
    %75 = math.tanh %74 : vector<2x32xf32>
    %76 = arith.mulf %71, %75 : vector<2x32xf32>
    %c4 = arith.constant 4 : index
    %c0_21 = arith.constant 0 : index
    %77 = vector.load %arg14[%c4, %c0_21] : memref<16x64xf32, #tpu.memory_space<vmem>>, vector<2x32xf32>
    tpu.vector_store %arg14[%c4, %c0_21], %76 {strides = array<i32>} : memref<16x64xf32, #tpu.memory_space<vmem>>, vector<2x32xf32>,
    %78 = vector.extract_strided_slice %13 {offsets = [6, 0], sizes = [2, 128], strides = [1, 1]} : vector<16x128xf32> to vector<2x128xf32>
    %cst_22 = arith.constant dense<0.000000e+00> : vector<2x128xf32>
    %79 = tpu.matmul %76, %15, %cst_22 {dimension_numbers = #tpu.dot_dimension_numbers<[1], [0], [0], [1], [0, 0, 1, 1], [], []>} : vector<2x32xf32>, vector<32x128xf32>, vector<2x128xf32> -> vector<2x128xf32>
    %80 = arith.addf %78, %79 : vector<2x128xf32>
    %81 = math.tanh %80 : vector<2x128xf32>
    %82 = arith.negf %80 : vector<2x128xf32>
    %83 = math.exp %82 : vector<2x128xf32>
    %cst_23 = arith.constant 1.000000e+00 : f32
    %84 = vector.broadcast %cst_23 : f32 to vector<2x128xf32>
    %85 = arith.addf %84, %83 : vector<2x128xf32>
    %86 = arith.divf %84, %85 : vector<2x128xf32>
    %87 = arith.select %5, %81, %86 : vector<2x128xi1>, vector<2x128xf32>
    %88 = vector.extract_strided_slice %87 {offsets = [0, 0], sizes = [2, 32], strides = [1, 1]} : vector<2x128xf32> to vector<2x32xf32>
    %89 = vector.extract_strided_slice %87 {offsets = [0, 32], sizes = [2, 32], strides = [1, 1]} : vector<2x128xf32> to vector<2x32xf32>
    %90 = vector.extract_strided_slice %87 {offsets = [0, 64], sizes = [2, 32], strides = [1, 1]} : vector<2x128xf32> to vector<2x32xf32>
    %91 = vector.extract_strided_slice %87 {offsets = [0, 96], sizes = [2, 32], strides = [1, 1]} : vector<2x128xf32> to vector<2x32xf32>
    %92 = arith.mulf %89, %74 : vector<2x32xf32>
    %93 = arith.mulf %88, %90 : vector<2x32xf32>
    %94 = arith.addf %92, %93 : vector<2x32xf32>
    %95 = math.tanh %94 : vector<2x32xf32>
    %96 = arith.mulf %91, %95 : vector<2x32xf32>
    %c6 = arith.constant 6 : index
    %c0_24 = arith.constant 0 : index
    %97 = vector.load %arg14[%c6, %c0_24] : memref<16x64xf32, #tpu.memory_space<vmem>>, vector<2x32xf32>
    tpu.vector_store %arg14[%c6, %c0_24], %96 {strides = array<i32>} : memref<16x64xf32, #tpu.memory_space<vmem>>, vector<2x32xf32>,
    %98 = vector.extract_strided_slice %13 {offsets = [8, 0], sizes = [2, 128], strides = [1, 1]} : vector<16x128xf32> to vector<2x128xf32>
    %cst_25 = arith.constant dense<0.000000e+00> : vector<2x128xf32>
    %99 = tpu.matmul %96, %15, %cst_25 {dimension_numbers = #tpu.dot_dimension_numbers<[1], [0], [0], [1], [0, 0, 1, 1], [], []>} : vector<2x32xf32>, vector<32x128xf32>, vector<2x128xf32> -> vector<2x128xf32>
    %100 = arith.addf %98, %99 : vector<2x128xf32>
    %101 = math.tanh %100 : vector<2x128xf32>
    %102 = arith.negf %100 : vector<2x128xf32>
    %103 = math.exp %102 : vector<2x128xf32>
    %cst_26 = arith.constant 1.000000e+00 : f32
    %104 = vector.broadcast %cst_26 : f32 to vector<2x128xf32>
    %105 = arith.addf %104, %103 : vector<2x128xf32>
    %106 = arith.divf %104, %105 : vector<2x128xf32>
    %107 = arith.select %5, %101, %106 : vector<2x128xi1>, vector<2x128xf32>
    %108 = vector.extract_strided_slice %107 {offsets = [0, 0], sizes = [2, 32], strides = [1, 1]} : vector<2x128xf32> to vector<2x32xf32>
    %109 = vector.extract_strided_slice %107 {offsets = [0, 32], sizes = [2, 32], strides = [1, 1]} : vector<2x128xf32> to vector<2x32xf32>
    %110 = vector.extract_strided_slice %107 {offsets = [0, 64], sizes = [2, 32], strides = [1, 1]} : vector<2x128xf32> to vector<2x32xf32>
    %111 = vector.extract_strided_slice %107 {offsets = [0, 96], sizes = [2, 32], strides = [1, 1]} : vector<2x128xf32> to vector<2x32xf32>
    %112 = arith.mulf %109, %94 : vector<2x32xf32>
    %113 = arith.mulf %108, %110 : vector<2x32xf32>
    %114 = arith.addf %112, %113 : vector<2x32xf32>
    %115 = math.tanh %114 : vector<2x32xf32>
    %116 = arith.mulf %111, %115 : vector<2x32xf32>
    %c8 = arith.constant 8 : index
    %c0_27 = arith.constant 0 : index
    %117 = vector.load %arg14[%c8, %c0_27] : memref<16x64xf32, #tpu.memory_space<vmem>>, vector<2x32xf32>
    tpu.vector_store %arg14[%c8, %c0_27], %116 {strides = array<i32>} : memref<16x64xf32, #tpu.memory_space<vmem>>, vector<2x32xf32>,
    %118 = vector.extract_strided_slice %13 {offsets = [10, 0], sizes = [2, 128], strides = [1, 1]} : vector<16x128xf32> to vector<2x128xf32>
    %cst_28 = arith.constant dense<0.000000e+00> : vector<2x128xf32>
    %119 = tpu.matmul %116, %15, %cst_28 {dimension_numbers = #tpu.dot_dimension_numbers<[1], [0], [0], [1], [0, 0, 1, 1], [], []>} : vector<2x32xf32>, vector<32x128xf32>, vector<2x128xf32> -> vector<2x128xf32>
    %120 = arith.addf %118, %119 : vector<2x128xf32>
    %121 = math.tanh %120 : vector<2x128xf32>
    %122 = arith.negf %120 : vector<2x128xf32>
    %123 = math.exp %122 : vector<2x128xf32>
    %cst_29 = arith.constant 1.000000e+00 : f32
    %124 = vector.broadcast %cst_29 : f32 to vector<2x128xf32>
    %125 = arith.addf %124, %123 : vector<2x128xf32>
    %126 = arith.divf %124, %125 : vector<2x128xf32>
    %127 = arith.select %5, %121, %126 : vector<2x128xi1>, vector<2x128xf32>
    %128 = vector.extract_strided_slice %127 {offsets = [0, 0], sizes = [2, 32], strides = [1, 1]} : vector<2x128xf32> to vector<2x32xf32>
    %129 = vector.extract_strided_slice %127 {offsets = [0, 32], sizes = [2, 32], strides = [1, 1]} : vector<2x128xf32> to vector<2x32xf32>
    %130 = vector.extract_strided_slice %127 {offsets = [0, 64], sizes = [2, 32], strides = [1, 1]} : vector<2x128xf32> to vector<2x32xf32>
    %131 = vector.extract_strided_slice %127 {offsets = [0, 96], sizes = [2, 32], strides = [1, 1]} : vector<2x128xf32> to vector<2x32xf32>
    %132 = arith.mulf %129, %114 : vector<2x32xf32>
    %133 = arith.mulf %128, %130 : vector<2x32xf32>
    %134 = arith.addf %132, %133 : vector<2x32xf32>
    %135 = math.tanh %134 : vector<2x32xf32>
    %136 = arith.mulf %131, %135 : vector<2x32xf32>
    %c10 = arith.constant 10 : index
    %c0_30 = arith.constant 0 : index
    %137 = vector.load %arg14[%c10, %c0_30] : memref<16x64xf32, #tpu.memory_space<vmem>>, vector<2x32xf32>
    tpu.vector_store %arg14[%c10, %c0_30], %136 {strides = array<i32>} : memref<16x64xf32, #tpu.memory_space<vmem>>, vector<2x32xf32>,
    %138 = vector.extract_strided_slice %13 {offsets = [12, 0], sizes = [2, 128], strides = [1, 1]} : vector<16x128xf32> to vector<2x128xf32>
    %cst_31 = arith.constant dense<0.000000e+00> : vector<2x128xf32>
    %139 = tpu.matmul %136, %15, %cst_31 {dimension_numbers = #tpu.dot_dimension_numbers<[1], [0], [0], [1], [0, 0, 1, 1], [], []>} : vector<2x32xf32>, vector<32x128xf32>, vector<2x128xf32> -> vector<2x128xf32>
    %140 = arith.addf %138, %139 : vector<2x128xf32>
    %141 = math.tanh %140 : vector<2x128xf32>
    %142 = arith.negf %140 : vector<2x128xf32>
    %143 = math.exp %142 : vector<2x128xf32>
    %cst_32 = arith.constant 1.000000e+00 : f32
    %144 = vector.broadcast %cst_32 : f32 to vector<2x128xf32>
    %145 = arith.addf %144, %143 : vector<2x128xf32>
    %146 = arith.divf %144, %145 : vector<2x128xf32>
    %147 = arith.select %5, %141, %146 : vector<2x128xi1>, vector<2x128xf32>
    %148 = vector.extract_strided_slice %147 {offsets = [0, 0], sizes = [2, 32], strides = [1, 1]} : vector<2x128xf32> to vector<2x32xf32>
    %149 = vector.extract_strided_slice %147 {offsets = [0, 32], sizes = [2, 32], strides = [1, 1]} : vector<2x128xf32> to vector<2x32xf32>
    %150 = vector.extract_strided_slice %147 {offsets = [0, 64], sizes = [2, 32], strides = [1, 1]} : vector<2x128xf32> to vector<2x32xf32>
    %151 = vector.extract_strided_slice %147 {offsets = [0, 96], sizes = [2, 32], strides = [1, 1]} : vector<2x128xf32> to vector<2x32xf32>
    %152 = arith.mulf %149, %134 : vector<2x32xf32>
    %153 = arith.mulf %148, %150 : vector<2x32xf32>
    %154 = arith.addf %152, %153 : vector<2x32xf32>
    %155 = math.tanh %154 : vector<2x32xf32>
    %156 = arith.mulf %151, %155 : vector<2x32xf32>
    %c12 = arith.constant 12 : index
    %c0_33 = arith.constant 0 : index
    %157 = vector.load %arg14[%c12, %c0_33] : memref<16x64xf32, #tpu.memory_space<vmem>>, vector<2x32xf32>
    tpu.vector_store %arg14[%c12, %c0_33], %156 {strides = array<i32>} : memref<16x64xf32, #tpu.memory_space<vmem>>, vector<2x32xf32>,
    %158 = vector.extract_strided_slice %13 {offsets = [14, 0], sizes = [2, 128], strides = [1, 1]} : vector<16x128xf32> to vector<2x128xf32>
    %cst_34 = arith.constant dense<0.000000e+00> : vector<2x128xf32>
    %159 = tpu.matmul %156, %15, %cst_34 {dimension_numbers = #tpu.dot_dimension_numbers<[1], [0], [0], [1], [0, 0, 1, 1], [], []>} : vector<2x32xf32>, vector<32x128xf32>, vector<2x128xf32> -> vector<2x128xf32>
    %160 = arith.addf %158, %159 : vector<2x128xf32>
    %161 = math.tanh %160 : vector<2x128xf32>
    %162 = arith.negf %160 : vector<2x128xf32>
    %163 = math.exp %162 : vector<2x128xf32>
    %cst_35 = arith.constant 1.000000e+00 : f32
    %164 = vector.broadcast %cst_35 : f32 to vector<2x128xf32>
    %165 = arith.addf %164, %163 : vector<2x128xf32>
    %166 = arith.divf %164, %165 : vector<2x128xf32>
    %167 = arith.select %5, %161, %166 : vector<2x128xi1>, vector<2x128xf32>
    %168 = vector.extract_strided_slice %167 {offsets = [0, 0], sizes = [2, 32], strides = [1, 1]} : vector<2x128xf32> to vector<2x32xf32>
    %169 = vector.extract_strided_slice %167 {offsets = [0, 32], sizes = [2, 32], strides = [1, 1]} : vector<2x128xf32> to vector<2x32xf32>
    %170 = vector.extract_strided_slice %167 {offsets = [0, 64], sizes = [2, 32], strides = [1, 1]} : vector<2x128xf32> to vector<2x32xf32>
    %171 = vector.extract_strided_slice %167 {offsets = [0, 96], sizes = [2, 32], strides = [1, 1]} : vector<2x128xf32> to vector<2x32xf32>
    %172 = arith.mulf %169, %154 : vector<2x32xf32>
    %173 = arith.mulf %168, %170 : vector<2x32xf32>
    %174 = arith.addf %172, %173 : vector<2x32xf32>
    %175 = math.tanh %174 : vector<2x32xf32>
    %176 = arith.mulf %171, %175 : vector<2x32xf32>
    %c14 = arith.constant 14 : index
    %c0_36 = arith.constant 0 : index
    %177 = vector.load %arg14[%c14, %c0_36] : memref<16x64xf32, #tpu.memory_space<vmem>>, vector<2x32xf32>
    tpu.vector_store %arg14[%c14, %c0_36], %176 {strides = array<i32>} : memref<16x64xf32, #tpu.memory_space<vmem>>, vector<2x32xf32>,
    %c1 = arith.constant 1 : index
    %c0_37 = arith.constant 0 : index
    %c0_38 = arith.constant 0 : index
    %178 = vector.load %arg1[%c1, %c0_37, %c0_38] : memref<2x16x128xf32, #tpu.memory_space<vmem>>, vector<1x16x128xf32>
    %179 = vector.shape_cast %178 : vector<1x16x128xf32> to vector<16x128xf32>
    %cst_39 = arith.constant dense<0.000000e+00> : vector<16x128xf32>
    %180 = tpu.matmul %6, %179, %cst_39 {dimension_numbers = #tpu.dot_dimension_numbers<[1], [0], [0], [1], [0, 0, 1, 1], [], []>} : vector<16x16xf32>, vector<16x128xf32>, vector<16x128xf32> -> vector<16x128xf32>
    %c1_40 = arith.constant 1 : index
    %c0_41 = arith.constant 0 : index
    %c0_42 = arith.constant 0 : index
    %181 = vector.load %arg3[%c1_40, %c0_41, %c0_42] : memref<2x1x128xf32, #tpu.memory_space<vmem>>, vector<1x1x128xf32>
    %182 = vector.shape_cast %181 : vector<1x1x128xf32> to vector<1x128xf32>
    %183 = vector.broadcast %182 : vector<1x128xf32> to vector<16x128xf32>
    %184 = arith.addf %180, %183 : vector<16x128xf32>
    %c1_43 = arith.constant 1 : index
    %c0_44 = arith.constant 0 : index
    %c0_45 = arith.constant 0 : index
    %185 = vector.load %arg2[%c1_43, %c0_44, %c0_45] : memref<2x32x128xf32, #tpu.memory_space<vmem>>, vector<1x32x128xf32>
    %186 = vector.shape_cast %185 : vector<1x32x128xf32> to vector<32x128xf32>
    %cst_46 = arith.constant 0.000000e+00 : f32
    %187 = vector.broadcast %cst_46 : f32 to vector<2x32xf32>
    %cst_47 = arith.constant 0.000000e+00 : f32
    %188 = vector.broadcast %cst_47 : f32 to vector<2x32xf32>
    %189 = vector.extract_strided_slice %184 {offsets = [14, 0], sizes = [2, 128], strides = [1, 1]} : vector<16x128xf32> to vector<2x128xf32>
    %cst_48 = arith.constant dense<0.000000e+00> : vector<2x128xf32>
    %190 = tpu.matmul %187, %186, %cst_48 {dimension_numbers = #tpu.dot_dimension_numbers<[1], [0], [0], [1], [0, 0, 1, 1], [], []>} : vector<2x32xf32>, vector<32x128xf32>, vector<2x128xf32> -> vector<2x128xf32>
    %191 = arith.addf %189, %190 : vector<2x128xf32>
    %192 = math.tanh %191 : vector<2x128xf32>
    %193 = arith.negf %191 : vector<2x128xf32>
    %194 = math.exp %193 : vector<2x128xf32>
    %cst_49 = arith.constant 1.000000e+00 : f32
    %195 = vector.broadcast %cst_49 : f32 to vector<2x128xf32>
    %196 = arith.addf %195, %194 : vector<2x128xf32>
    %197 = arith.divf %195, %196 : vector<2x128xf32>
    %198 = arith.select %5, %192, %197 : vector<2x128xi1>, vector<2x128xf32>
    %199 = vector.extract_strided_slice %198 {offsets = [0, 0], sizes = [2, 32], strides = [1, 1]} : vector<2x128xf32> to vector<2x32xf32>
    %200 = vector.extract_strided_slice %198 {offsets = [0, 32], sizes = [2, 32], strides = [1, 1]} : vector<2x128xf32> to vector<2x32xf32>
    %201 = vector.extract_strided_slice %198 {offsets = [0, 64], sizes = [2, 32], strides = [1, 1]} : vector<2x128xf32> to vector<2x32xf32>
    %202 = vector.extract_strided_slice %198 {offsets = [0, 96], sizes = [2, 32], strides = [1, 1]} : vector<2x128xf32> to vector<2x32xf32>
    %203 = arith.mulf %200, %188 : vector<2x32xf32>
    %204 = arith.mulf %199, %201 : vector<2x32xf32>
    %205 = arith.addf %203, %204 : vector<2x32xf32>
    %206 = math.tanh %205 : vector<2x32xf32>
    %207 = arith.mulf %202, %206 : vector<2x32xf32>
    %c14_50 = arith.constant 14 : index
    %c32 = arith.constant 32 : index
    %208 = vector.load %arg14[%c14_50, %c32] : memref<16x64xf32, #tpu.memory_space<vmem>>, vector<2x32xf32>
    tpu.vector_store %arg14[%c14_50, %c32], %207 {strides = array<i32>} : memref<16x64xf32, #tpu.memory_space<vmem>>, vector<2x32xf32>,
    %209 = vector.extract_strided_slice %184 {offsets = [12, 0], sizes = [2, 128], strides = [1, 1]} : vector<16x128xf32> to vector<2x128xf32>
    %cst_51 = arith.constant dense<0.000000e+00> : vector<2x128xf32>
    %210 = tpu.matmul %207, %186, %cst_51 {dimension_numbers = #tpu.dot_dimension_numbers<[1], [0], [0], [1], [0, 0, 1, 1], [], []>} : vector<2x32xf32>, vector<32x128xf32>, vector<2x128xf32> -> vector<2x128xf32>
    %211 = arith.addf %209, %210 : vector<2x128xf32>
    %212 = math.tanh %211 : vector<2x128xf32>
    %213 = arith.negf %211 : vector<2x128xf32>
    %214 = math.exp %213 : vector<2x128xf32>
    %cst_52 = arith.constant 1.000000e+00 : f32
    %215 = vector.broadcast %cst_52 : f32 to vector<2x128xf32>
    %216 = arith.addf %215, %214 : vector<2x128xf32>
    %217 = arith.divf %215, %216 : vector<2x128xf32>
    %218 = arith.select %5, %212, %217 : vector<2x128xi1>, vector<2x128xf32>
    %219 = vector.extract_strided_slice %218 {offsets = [0, 0], sizes = [2, 32], strides = [1, 1]} : vector<2x128xf32> to vector<2x32xf32>
    %220 = vector.extract_strided_slice %218 {offsets = [0, 32], sizes = [2, 32], strides = [1, 1]} : vector<2x128xf32> to vector<2x32xf32>
    %221 = vector.extract_strided_slice %218 {offsets = [0, 64], sizes = [2, 32], strides = [1, 1]} : vector<2x128xf32> to vector<2x32xf32>
    %222 = vector.extract_strided_slice %218 {offsets = [0, 96], sizes = [2, 32], strides = [1, 1]} : vector<2x128xf32> to vector<2x32xf32>
    %223 = arith.mulf %220, %205 : vector<2x32xf32>
    %224 = arith.mulf %219, %221 : vector<2x32xf32>
    %225 = arith.addf %223, %224 : vector<2x32xf32>
    %226 = math.tanh %225 : vector<2x32xf32>
    %227 = arith.mulf %222, %226 : vector<2x32xf32>
    %c12_53 = arith.constant 12 : index
    %c32_54 = arith.constant 32 : index
    %228 = vector.load %arg14[%c12_53, %c32_54] : memref<16x64xf32, #tpu.memory_space<vmem>>, vector<2x32xf32>
    tpu.vector_store %arg14[%c12_53, %c32_54], %227 {strides = array<i32>} : memref<16x64xf32, #tpu.memory_space<vmem>>, vector<2x32xf32>,
    %229 = vector.extract_strided_slice %184 {offsets = [10, 0], sizes = [2, 128], strides = [1, 1]} : vector<16x128xf32> to vector<2x128xf32>
    %cst_55 = arith.constant dense<0.000000e+00> : vector<2x128xf32>
    %230 = tpu.matmul %227, %186, %cst_55 {dimension_numbers = #tpu.dot_dimension_numbers<[1], [0], [0], [1], [0, 0, 1, 1], [], []>} : vector<2x32xf32>, vector<32x128xf32>, vector<2x128xf32> -> vector<2x128xf32>
    %231 = arith.addf %229, %230 : vector<2x128xf32>
    %232 = math.tanh %231 : vector<2x128xf32>
    %233 = arith.negf %231 : vector<2x128xf32>
    %234 = math.exp %233 : vector<2x128xf32>
    %cst_56 = arith.constant 1.000000e+00 : f32
    %235 = vector.broadcast %cst_56 : f32 to vector<2x128xf32>
    %236 = arith.addf %235, %234 : vector<2x128xf32>
    %237 = arith.divf %235, %236 : vector<2x128xf32>
    %238 = arith.select %5, %232, %237 : vector<2x128xi1>, vector<2x128xf32>
    %239 = vector.extract_strided_slice %238 {offsets = [0, 0], sizes = [2, 32], strides = [1, 1]} : vector<2x128xf32> to vector<2x32xf32>
    %240 = vector.extract_strided_slice %238 {offsets = [0, 32], sizes = [2, 32], strides = [1, 1]} : vector<2x128xf32> to vector<2x32xf32>
    %241 = vector.extract_strided_slice %238 {offsets = [0, 64], sizes = [2, 32], strides = [1, 1]} : vector<2x128xf32> to vector<2x32xf32>
    %242 = vector.extract_strided_slice %238 {offsets = [0, 96], sizes = [2, 32], strides = [1, 1]} : vector<2x128xf32> to vector<2x32xf32>
    %243 = arith.mulf %240, %225 : vector<2x32xf32>
    %244 = arith.mulf %239, %241 : vector<2x32xf32>
    %245 = arith.addf %243, %244 : vector<2x32xf32>
    %246 = math.tanh %245 : vector<2x32xf32>
    %247 = arith.mulf %242, %246 : vector<2x32xf32>
    %c10_57 = arith.constant 10 : index
    %c32_58 = arith.constant 32 : index
    %248 = vector.load %arg14[%c10_57, %c32_58] : memref<16x64xf32, #tpu.memory_space<vmem>>, vector<2x32xf32>
    tpu.vector_store %arg14[%c10_57, %c32_58], %247 {strides = array<i32>} : memref<16x64xf32, #tpu.memory_space<vmem>>, vector<2x32xf32>,
    %249 = vector.extract_strided_slice %184 {offsets = [8, 0], sizes = [2, 128], strides = [1, 1]} : vector<16x128xf32> to vector<2x128xf32>
    %cst_59 = arith.constant dense<0.000000e+00> : vector<2x128xf32>
    %250 = tpu.matmul %247, %186, %cst_59 {dimension_numbers = #tpu.dot_dimension_numbers<[1], [0], [0], [1], [0, 0, 1, 1], [], []>} : vector<2x32xf32>, vector<32x128xf32>, vector<2x128xf32> -> vector<2x128xf32>
    %251 = arith.addf %249, %250 : vector<2x128xf32>
    %252 = math.tanh %251 : vector<2x128xf32>
    %253 = arith.negf %251 : vector<2x128xf32>
    %254 = math.exp %253 : vector<2x128xf32>
    %cst_60 = arith.constant 1.000000e+00 : f32
    %255 = vector.broadcast %cst_60 : f32 to vector<2x128xf32>
    %256 = arith.addf %255, %254 : vector<2x128xf32>
    %257 = arith.divf %255, %256 : vector<2x128xf32>
    %258 = arith.select %5, %252, %257 : vector<2x128xi1>, vector<2x128xf32>
    %259 = vector.extract_strided_slice %258 {offsets = [0, 0], sizes = [2, 32], strides = [1, 1]} : vector<2x128xf32> to vector<2x32xf32>
    %260 = vector.extract_strided_slice %258 {offsets = [0, 32], sizes = [2, 32], strides = [1, 1]} : vector<2x128xf32> to vector<2x32xf32>
    %261 = vector.extract_strided_slice %258 {offsets = [0, 64], sizes = [2, 32], strides = [1, 1]} : vector<2x128xf32> to vector<2x32xf32>
    %262 = vector.extract_strided_slice %258 {offsets = [0, 96], sizes = [2, 32], strides = [1, 1]} : vector<2x128xf32> to vector<2x32xf32>
    %263 = arith.mulf %260, %245 : vector<2x32xf32>
    %264 = arith.mulf %259, %261 : vector<2x32xf32>
    %265 = arith.addf %263, %264 : vector<2x32xf32>
    %266 = math.tanh %265 : vector<2x32xf32>
    %267 = arith.mulf %262, %266 : vector<2x32xf32>
    %c8_61 = arith.constant 8 : index
    %c32_62 = arith.constant 32 : index
    %268 = vector.load %arg14[%c8_61, %c32_62] : memref<16x64xf32, #tpu.memory_space<vmem>>, vector<2x32xf32>
    tpu.vector_store %arg14[%c8_61, %c32_62], %267 {strides = array<i32>} : memref<16x64xf32, #tpu.memory_space<vmem>>, vector<2x32xf32>,
    %269 = vector.extract_strided_slice %184 {offsets = [6, 0], sizes = [2, 128], strides = [1, 1]} : vector<16x128xf32> to vector<2x128xf32>
    %cst_63 = arith.constant dense<0.000000e+00> : vector<2x128xf32>
    %270 = tpu.matmul %267, %186, %cst_63 {dimension_numbers = #tpu.dot_dimension_numbers<[1], [0], [0], [1], [0, 0, 1, 1], [], []>} : vector<2x32xf32>, vector<32x128xf32>, vector<2x128xf32> -> vector<2x128xf32>
    %271 = arith.addf %269, %270 : vector<2x128xf32>
    %272 = math.tanh %271 : vector<2x128xf32>
    %273 = arith.negf %271 : vector<2x128xf32>
    %274 = math.exp %273 : vector<2x128xf32>
    %cst_64 = arith.constant 1.000000e+00 : f32
    %275 = vector.broadcast %cst_64 : f32 to vector<2x128xf32>
    %276 = arith.addf %275, %274 : vector<2x128xf32>
    %277 = arith.divf %275, %276 : vector<2x128xf32>
    %278 = arith.select %5, %272, %277 : vector<2x128xi1>, vector<2x128xf32>
    %279 = vector.extract_strided_slice %278 {offsets = [0, 0], sizes = [2, 32], strides = [1, 1]} : vector<2x128xf32> to vector<2x32xf32>
    %280 = vector.extract_strided_slice %278 {offsets = [0, 32], sizes = [2, 32], strides = [1, 1]} : vector<2x128xf32> to vector<2x32xf32>
    %281 = vector.extract_strided_slice %278 {offsets = [0, 64], sizes = [2, 32], strides = [1, 1]} : vector<2x128xf32> to vector<2x32xf32>
    %282 = vector.extract_strided_slice %278 {offsets = [0, 96], sizes = [2, 32], strides = [1, 1]} : vector<2x128xf32> to vector<2x32xf32>
    %283 = arith.mulf %280, %265 : vector<2x32xf32>
    %284 = arith.mulf %279, %281 : vector<2x32xf32>
    %285 = arith.addf %283, %284 : vector<2x32xf32>
    %286 = math.tanh %285 : vector<2x32xf32>
    %287 = arith.mulf %282, %286 : vector<2x32xf32>
    %c6_65 = arith.constant 6 : index
    %c32_66 = arith.constant 32 : index
    %288 = vector.load %arg14[%c6_65, %c32_66] : memref<16x64xf32, #tpu.memory_space<vmem>>, vector<2x32xf32>
    tpu.vector_store %arg14[%c6_65, %c32_66], %287 {strides = array<i32>} : memref<16x64xf32, #tpu.memory_space<vmem>>, vector<2x32xf32>,
    %289 = vector.extract_strided_slice %184 {offsets = [4, 0], sizes = [2, 128], strides = [1, 1]} : vector<16x128xf32> to vector<2x128xf32>
    %cst_67 = arith.constant dense<0.000000e+00> : vector<2x128xf32>
    %290 = tpu.matmul %287, %186, %cst_67 {dimension_numbers = #tpu.dot_dimension_numbers<[1], [0], [0], [1], [0, 0, 1, 1], [], []>} : vector<2x32xf32>, vector<32x128xf32>, vector<2x128xf32> -> vector<2x128xf32>
    %291 = arith.addf %289, %290 : vector<2x128xf32>
    %292 = math.tanh %291 : vector<2x128xf32>
    %293 = arith.negf %291 : vector<2x128xf32>
    %294 = math.exp %293 : vector<2x128xf32>
    %cst_68 = arith.constant 1.000000e+00 : f32
    %295 = vector.broadcast %cst_68 : f32 to vector<2x128xf32>
    %296 = arith.addf %295, %294 : vector<2x128xf32>
    %297 = arith.divf %295, %296 : vector<2x128xf32>
    %298 = arith.select %5, %292, %297 : vector<2x128xi1>, vector<2x128xf32>
    %299 = vector.extract_strided_slice %298 {offsets = [0, 0], sizes = [2, 32], strides = [1, 1]} : vector<2x128xf32> to vector<2x32xf32>
    %300 = vector.extract_strided_slice %298 {offsets = [0, 32], sizes = [2, 32], strides = [1, 1]} : vector<2x128xf32> to vector<2x32xf32>
    %301 = vector.extract_strided_slice %298 {offsets = [0, 64], sizes = [2, 32], strides = [1, 1]} : vector<2x128xf32> to vector<2x32xf32>
    %302 = vector.extract_strided_slice %298 {offsets = [0, 96], sizes = [2, 32], strides = [1, 1]} : vector<2x128xf32> to vector<2x32xf32>
    %303 = arith.mulf %300, %285 : vector<2x32xf32>
    %304 = arith.mulf %299, %301 : vector<2x32xf32>
    %305 = arith.addf %303, %304 : vector<2x32xf32>
    %306 = math.tanh %305 : vector<2x32xf32>
    %307 = arith.mulf %302, %306 : vector<2x32xf32>
    %c4_69 = arith.constant 4 : index
    %c32_70 = arith.constant 32 : index
    %308 = vector.load %arg14[%c4_69, %c32_70] : memref<16x64xf32, #tpu.memory_space<vmem>>, vector<2x32xf32>
    tpu.vector_store %arg14[%c4_69, %c32_70], %307 {strides = array<i32>} : memref<16x64xf32, #tpu.memory_space<vmem>>, vector<2x32xf32>,
    %309 = vector.extract_strided_slice %184 {offsets = [2, 0], sizes = [2, 128], strides = [1, 1]} : vector<16x128xf32> to vector<2x128xf32>
    %cst_71 = arith.constant dense<0.000000e+00> : vector<2x128xf32>
    %310 = tpu.matmul %307, %186, %cst_71 {dimension_numbers = #tpu.dot_dimension_numbers<[1], [0], [0], [1], [0, 0, 1, 1], [], []>} : vector<2x32xf32>, vector<32x128xf32>, vector<2x128xf32> -> vector<2x128xf32>
    %311 = arith.addf %309, %310 : vector<2x128xf32>
    %312 = math.tanh %311 : vector<2x128xf32>
    %313 = arith.negf %311 : vector<2x128xf32>
    %314 = math.exp %313 : vector<2x128xf32>
    %cst_72 = arith.constant 1.000000e+00 : f32
    %315 = vector.broadcast %cst_72 : f32 to vector<2x128xf32>
    %316 = arith.addf %315, %314 : vector<2x128xf32>
    %317 = arith.divf %315, %316 : vector<2x128xf32>
    %318 = arith.select %5, %312, %317 : vector<2x128xi1>, vector<2x128xf32>
    %319 = vector.extract_strided_slice %318 {offsets = [0, 0], sizes = [2, 32], strides = [1, 1]} : vector<2x128xf32> to vector<2x32xf32>
    %320 = vector.extract_strided_slice %318 {offsets = [0, 32], sizes = [2, 32], strides = [1, 1]} : vector<2x128xf32> to vector<2x32xf32>
    %321 = vector.extract_strided_slice %318 {offsets = [0, 64], sizes = [2, 32], strides = [1, 1]} : vector<2x128xf32> to vector<2x32xf32>
    %322 = vector.extract_strided_slice %318 {offsets = [0, 96], sizes = [2, 32], strides = [1, 1]} : vector<2x128xf32> to vector<2x32xf32>
    %323 = arith.mulf %320, %305 : vector<2x32xf32>
    %324 = arith.mulf %319, %321 : vector<2x32xf32>
    %325 = arith.addf %323, %324 : vector<2x32xf32>
    %326 = math.tanh %325 : vector<2x32xf32>
    %327 = arith.mulf %322, %326 : vector<2x32xf32>
    %c2_73 = arith.constant 2 : index
    %c32_74 = arith.constant 32 : index
    %328 = vector.load %arg14[%c2_73, %c32_74] : memref<16x64xf32, #tpu.memory_space<vmem>>, vector<2x32xf32>
    tpu.vector_store %arg14[%c2_73, %c32_74], %327 {strides = array<i32>} : memref<16x64xf32, #tpu.memory_space<vmem>>, vector<2x32xf32>,
    %329 = vector.extract_strided_slice %184 {offsets = [0, 0], sizes = [2, 128], strides = [1, 1]} : vector<16x128xf32> to vector<2x128xf32>
    %cst_75 = arith.constant dense<0.000000e+00> : vector<2x128xf32>
    %330 = tpu.matmul %327, %186, %cst_75 {dimension_numbers = #tpu.dot_dimension_numbers<[1], [0], [0], [1], [0, 0, 1, 1], [], []>} : vector<2x32xf32>, vector<32x128xf32>, vector<2x128xf32> -> vector<2x128xf32>
    %331 = arith.addf %329, %330 : vector<2x128xf32>
    %332 = math.tanh %331 : vector<2x128xf32>
    %333 = arith.negf %331 : vector<2x128xf32>
    %334 = math.exp %333 : vector<2x128xf32>
    %cst_76 = arith.constant 1.000000e+00 : f32
    %335 = vector.broadcast %cst_76 : f32 to vector<2x128xf32>
    %336 = arith.addf %335, %334 : vector<2x128xf32>
    %337 = arith.divf %335, %336 : vector<2x128xf32>
    %338 = arith.select %5, %332, %337 : vector<2x128xi1>, vector<2x128xf32>
    %339 = vector.extract_strided_slice %338 {offsets = [0, 0], sizes = [2, 32], strides = [1, 1]} : vector<2x128xf32> to vector<2x32xf32>
    %340 = vector.extract_strided_slice %338 {offsets = [0, 32], sizes = [2, 32], strides = [1, 1]} : vector<2x128xf32> to vector<2x32xf32>
    %341 = vector.extract_strided_slice %338 {offsets = [0, 64], sizes = [2, 32], strides = [1, 1]} : vector<2x128xf32> to vector<2x32xf32>
    %342 = vector.extract_strided_slice %338 {offsets = [0, 96], sizes = [2, 32], strides = [1, 1]} : vector<2x128xf32> to vector<2x32xf32>
    %343 = arith.mulf %340, %325 : vector<2x32xf32>
    %344 = arith.mulf %339, %341 : vector<2x32xf32>
    %345 = arith.addf %343, %344 : vector<2x32xf32>
    %346 = math.tanh %345 : vector<2x32xf32>
    %347 = arith.mulf %342, %346 : vector<2x32xf32>
    %c0_77 = arith.constant 0 : index
    %c32_78 = arith.constant 32 : index
    %348 = vector.load %arg14[%c0_77, %c32_78] : memref<16x64xf32, #tpu.memory_space<vmem>>, vector<2x32xf32>
    tpu.vector_store %arg14[%c0_77, %c32_78], %347 {strides = array<i32>} : memref<16x64xf32, #tpu.memory_space<vmem>>, vector<2x32xf32>,
    %c0_79 = arith.constant 0 : index
    %c0_80 = arith.constant 0 : index
    %349 = vector.load %arg14[%c0_79, %c0_80] : memref<16x64xf32, #tpu.memory_space<vmem>>, vector<16x64xf32>
    %c0_81 = arith.constant 0 : index
    %c0_82 = arith.constant 0 : index
    %c0_83 = arith.constant 0 : index
    %350 = vector.load %arg4[%c0_81, %c0_82, %c0_83] : memref<2x64x128xf32, #tpu.memory_space<vmem>>, vector<1x64x128xf32>
    %351 = vector.shape_cast %350 : vector<1x64x128xf32> to vector<64x128xf32>
    %cst_84 = arith.constant dense<0.000000e+00> : vector<16x128xf32>
    %352 = tpu.matmul %349, %351, %cst_84 {dimension_numbers = #tpu.dot_dimension_numbers<[1], [0], [0], [1], [0, 0, 1, 1], [], []>} : vector<16x64xf32>, vector<64x128xf32>, vector<16x128xf32> -> vector<16x128xf32>
    %c0_85 = arith.constant 0 : index
    %c0_86 = arith.constant 0 : index
    %c0_87 = arith.constant 0 : index
    %353 = vector.load %arg6[%c0_85, %c0_86, %c0_87] : memref<2x1x128xf32, #tpu.memory_space<vmem>>, vector<1x1x128xf32>
    %354 = vector.shape_cast %353 : vector<1x1x128xf32> to vector<1x128xf32>
    %355 = vector.broadcast %354 : vector<1x128xf32> to vector<16x128xf32>
    %356 = arith.addf %352, %355 : vector<16x128xf32>
    %c0_88 = arith.constant 0 : index
    %c0_89 = arith.constant 0 : index
    %c0_90 = arith.constant 0 : index
    %357 = vector.load %arg5[%c0_88, %c0_89, %c0_90] : memref<2x32x128xf32, #tpu.memory_space<vmem>>, vector<1x32x128xf32>
    %358 = vector.shape_cast %357 : vector<1x32x128xf32> to vector<32x128xf32>
    %cst_91 = arith.constant 0.000000e+00 : f32
    %359 = vector.broadcast %cst_91 : f32 to vector<2x32xf32>
    %cst_92 = arith.constant 0.000000e+00 : f32
    %360 = vector.broadcast %cst_92 : f32 to vector<2x32xf32>
    %361 = vector.extract_strided_slice %356 {offsets = [0, 0], sizes = [2, 128], strides = [1, 1]} : vector<16x128xf32> to vector<2x128xf32>
    %cst_93 = arith.constant dense<0.000000e+00> : vector<2x128xf32>
    %362 = tpu.matmul %359, %358, %cst_93 {dimension_numbers = #tpu.dot_dimension_numbers<[1], [0], [0], [1], [0, 0, 1, 1], [], []>} : vector<2x32xf32>, vector<32x128xf32>, vector<2x128xf32> -> vector<2x128xf32>
    %363 = arith.addf %361, %362 : vector<2x128xf32>
    %364 = math.tanh %363 : vector<2x128xf32>
    %365 = arith.negf %363 : vector<2x128xf32>
    %366 = math.exp %365 : vector<2x128xf32>
    %cst_94 = arith.constant 1.000000e+00 : f32
    %367 = vector.broadcast %cst_94 : f32 to vector<2x128xf32>
    %368 = arith.addf %367, %366 : vector<2x128xf32>
    %369 = arith.divf %367, %368 : vector<2x128xf32>
    %370 = arith.select %5, %364, %369 : vector<2x128xi1>, vector<2x128xf32>
    %371 = vector.extract_strided_slice %370 {offsets = [0, 0], sizes = [2, 32], strides = [1, 1]} : vector<2x128xf32> to vector<2x32xf32>
    %372 = vector.extract_strided_slice %370 {offsets = [0, 32], sizes = [2, 32], strides = [1, 1]} : vector<2x128xf32> to vector<2x32xf32>
    %373 = vector.extract_strided_slice %370 {offsets = [0, 64], sizes = [2, 32], strides = [1, 1]} : vector<2x128xf32> to vector<2x32xf32>
    %374 = vector.extract_strided_slice %370 {offsets = [0, 96], sizes = [2, 32], strides = [1, 1]} : vector<2x128xf32> to vector<2x32xf32>
    %375 = arith.mulf %372, %360 : vector<2x32xf32>
    %376 = arith.mulf %371, %373 : vector<2x32xf32>
    %377 = arith.addf %375, %376 : vector<2x32xf32>
    %378 = math.tanh %377 : vector<2x32xf32>
    %379 = arith.mulf %374, %378 : vector<2x32xf32>
    %380 = vector.extract_strided_slice %356 {offsets = [2, 0], sizes = [2, 128], strides = [1, 1]} : vector<16x128xf32> to vector<2x128xf32>
    %cst_95 = arith.constant dense<0.000000e+00> : vector<2x128xf32>
    %381 = tpu.matmul %379, %358, %cst_95 {dimension_numbers = #tpu.dot_dimension_numbers<[1], [0], [0], [1], [0, 0, 1, 1], [], []>} : vector<2x32xf32>, vector<32x128xf32>, vector<2x128xf32> -> vector<2x128xf32>
    %382 = arith.addf %380, %381 : vector<2x128xf32>
    %383 = math.tanh %382 : vector<2x128xf32>
    %384 = arith.negf %382 : vector<2x128xf32>
    %385 = math.exp %384 : vector<2x128xf32>
    %cst_96 = arith.constant 1.000000e+00 : f32
    %386 = vector.broadcast %cst_96 : f32 to vector<2x128xf32>
    %387 = arith.addf %386, %385 : vector<2x128xf32>
    %388 = arith.divf %386, %387 : vector<2x128xf32>
    %389 = arith.select %5, %383, %388 : vector<2x128xi1>, vector<2x128xf32>
    %390 = vector.extract_strided_slice %389 {offsets = [0, 0], sizes = [2, 32], strides = [1, 1]} : vector<2x128xf32> to vector<2x32xf32>
    %391 = vector.extract_strided_slice %389 {offsets = [0, 32], sizes = [2, 32], strides = [1, 1]} : vector<2x128xf32> to vector<2x32xf32>
    %392 = vector.extract_strided_slice %389 {offsets = [0, 64], sizes = [2, 32], strides = [1, 1]} : vector<2x128xf32> to vector<2x32xf32>
    %393 = vector.extract_strided_slice %389 {offsets = [0, 96], sizes = [2, 32], strides = [1, 1]} : vector<2x128xf32> to vector<2x32xf32>
    %394 = arith.mulf %391, %377 : vector<2x32xf32>
    %395 = arith.mulf %390, %392 : vector<2x32xf32>
    %396 = arith.addf %394, %395 : vector<2x32xf32>
    %397 = math.tanh %396 : vector<2x32xf32>
    %398 = arith.mulf %393, %397 : vector<2x32xf32>
    %399 = vector.extract_strided_slice %356 {offsets = [4, 0], sizes = [2, 128], strides = [1, 1]} : vector<16x128xf32> to vector<2x128xf32>
    %cst_97 = arith.constant dense<0.000000e+00> : vector<2x128xf32>
    %400 = tpu.matmul %398, %358, %cst_97 {dimension_numbers = #tpu.dot_dimension_numbers<[1], [0], [0], [1], [0, 0, 1, 1], [], []>} : vector<2x32xf32>, vector<32x128xf32>, vector<2x128xf32> -> vector<2x128xf32>
    %401 = arith.addf %399, %400 : vector<2x128xf32>
    %402 = math.tanh %401 : vector<2x128xf32>
    %403 = arith.negf %401 : vector<2x128xf32>
    %404 = math.exp %403 : vector<2x128xf32>
    %cst_98 = arith.constant 1.000000e+00 : f32
    %405 = vector.broadcast %cst_98 : f32 to vector<2x128xf32>
    %406 = arith.addf %405, %404 : vector<2x128xf32>
    %407 = arith.divf %405, %406 : vector<2x128xf32>
    %408 = arith.select %5, %402, %407 : vector<2x128xi1>, vector<2x128xf32>
    %409 = vector.extract_strided_slice %408 {offsets = [0, 0], sizes = [2, 32], strides = [1, 1]} : vector<2x128xf32> to vector<2x32xf32>
    %410 = vector.extract_strided_slice %408 {offsets = [0, 32], sizes = [2, 32], strides = [1, 1]} : vector<2x128xf32> to vector<2x32xf32>
    %411 = vector.extract_strided_slice %408 {offsets = [0, 64], sizes = [2, 32], strides = [1, 1]} : vector<2x128xf32> to vector<2x32xf32>
    %412 = vector.extract_strided_slice %408 {offsets = [0, 96], sizes = [2, 32], strides = [1, 1]} : vector<2x128xf32> to vector<2x32xf32>
    %413 = arith.mulf %410, %396 : vector<2x32xf32>
    %414 = arith.mulf %409, %411 : vector<2x32xf32>
    %415 = arith.addf %413, %414 : vector<2x32xf32>
    %416 = math.tanh %415 : vector<2x32xf32>
    %417 = arith.mulf %412, %416 : vector<2x32xf32>
    %418 = vector.extract_strided_slice %356 {offsets = [6, 0], sizes = [2, 128], strides = [1, 1]} : vector<16x128xf32> to vector<2x128xf32>
    %cst_99 = arith.constant dense<0.000000e+00> : vector<2x128xf32>
    %419 = tpu.matmul %417, %358, %cst_99 {dimension_numbers = #tpu.dot_dimension_numbers<[1], [0], [0], [1], [0, 0, 1, 1], [], []>} : vector<2x32xf32>, vector<32x128xf32>, vector<2x128xf32> -> vector<2x128xf32>
    %420 = arith.addf %418, %419 : vector<2x128xf32>
    %421 = math.tanh %420 : vector<2x128xf32>
    %422 = arith.negf %420 : vector<2x128xf32>
    %423 = math.exp %422 : vector<2x128xf32>
    %cst_100 = arith.constant 1.000000e+00 : f32
    %424 = vector.broadcast %cst_100 : f32 to vector<2x128xf32>
    %425 = arith.addf %424, %423 : vector<2x128xf32>
    %426 = arith.divf %424, %425 : vector<2x128xf32>
    %427 = arith.select %5, %421, %426 : vector<2x128xi1>, vector<2x128xf32>
    %428 = vector.extract_strided_slice %427 {offsets = [0, 0], sizes = [2, 32], strides = [1, 1]} : vector<2x128xf32> to vector<2x32xf32>
    %429 = vector.extract_strided_slice %427 {offsets = [0, 32], sizes = [2, 32], strides = [1, 1]} : vector<2x128xf32> to vector<2x32xf32>
    %430 = vector.extract_strided_slice %427 {offsets = [0, 64], sizes = [2, 32], strides = [1, 1]} : vector<2x128xf32> to vector<2x32xf32>
    %431 = vector.extract_strided_slice %427 {offsets = [0, 96], sizes = [2, 32], strides = [1, 1]} : vector<2x128xf32> to vector<2x32xf32>
    %432 = arith.mulf %429, %415 : vector<2x32xf32>
    %433 = arith.mulf %428, %430 : vector<2x32xf32>
    %434 = arith.addf %432, %433 : vector<2x32xf32>
    %435 = math.tanh %434 : vector<2x32xf32>
    %436 = arith.mulf %431, %435 : vector<2x32xf32>
    %437 = vector.extract_strided_slice %356 {offsets = [8, 0], sizes = [2, 128], strides = [1, 1]} : vector<16x128xf32> to vector<2x128xf32>
    %cst_101 = arith.constant dense<0.000000e+00> : vector<2x128xf32>
    %438 = tpu.matmul %436, %358, %cst_101 {dimension_numbers = #tpu.dot_dimension_numbers<[1], [0], [0], [1], [0, 0, 1, 1], [], []>} : vector<2x32xf32>, vector<32x128xf32>, vector<2x128xf32> -> vector<2x128xf32>
    %439 = arith.addf %437, %438 : vector<2x128xf32>
    %440 = math.tanh %439 : vector<2x128xf32>
    %441 = arith.negf %439 : vector<2x128xf32>
    %442 = math.exp %441 : vector<2x128xf32>
    %cst_102 = arith.constant 1.000000e+00 : f32
    %443 = vector.broadcast %cst_102 : f32 to vector<2x128xf32>
    %444 = arith.addf %443, %442 : vector<2x128xf32>
    %445 = arith.divf %443, %444 : vector<2x128xf32>
    %446 = arith.select %5, %440, %445 : vector<2x128xi1>, vector<2x128xf32>
    %447 = vector.extract_strided_slice %446 {offsets = [0, 0], sizes = [2, 32], strides = [1, 1]} : vector<2x128xf32> to vector<2x32xf32>
    %448 = vector.extract_strided_slice %446 {offsets = [0, 32], sizes = [2, 32], strides = [1, 1]} : vector<2x128xf32> to vector<2x32xf32>
    %449 = vector.extract_strided_slice %446 {offsets = [0, 64], sizes = [2, 32], strides = [1, 1]} : vector<2x128xf32> to vector<2x32xf32>
    %450 = vector.extract_strided_slice %446 {offsets = [0, 96], sizes = [2, 32], strides = [1, 1]} : vector<2x128xf32> to vector<2x32xf32>
    %451 = arith.mulf %448, %434 : vector<2x32xf32>
    %452 = arith.mulf %447, %449 : vector<2x32xf32>
    %453 = arith.addf %451, %452 : vector<2x32xf32>
    %454 = math.tanh %453 : vector<2x32xf32>
    %455 = arith.mulf %450, %454 : vector<2x32xf32>
    %456 = vector.extract_strided_slice %356 {offsets = [10, 0], sizes = [2, 128], strides = [1, 1]} : vector<16x128xf32> to vector<2x128xf32>
    %cst_103 = arith.constant dense<0.000000e+00> : vector<2x128xf32>
    %457 = tpu.matmul %455, %358, %cst_103 {dimension_numbers = #tpu.dot_dimension_numbers<[1], [0], [0], [1], [0, 0, 1, 1], [], []>} : vector<2x32xf32>, vector<32x128xf32>, vector<2x128xf32> -> vector<2x128xf32>
    %458 = arith.addf %456, %457 : vector<2x128xf32>
    %459 = math.tanh %458 : vector<2x128xf32>
    %460 = arith.negf %458 : vector<2x128xf32>
    %461 = math.exp %460 : vector<2x128xf32>
    %cst_104 = arith.constant 1.000000e+00 : f32
    %462 = vector.broadcast %cst_104 : f32 to vector<2x128xf32>
    %463 = arith.addf %462, %461 : vector<2x128xf32>
    %464 = arith.divf %462, %463 : vector<2x128xf32>
    %465 = arith.select %5, %459, %464 : vector<2x128xi1>, vector<2x128xf32>
    %466 = vector.extract_strided_slice %465 {offsets = [0, 0], sizes = [2, 32], strides = [1, 1]} : vector<2x128xf32> to vector<2x32xf32>
    %467 = vector.extract_strided_slice %465 {offsets = [0, 32], sizes = [2, 32], strides = [1, 1]} : vector<2x128xf32> to vector<2x32xf32>
    %468 = vector.extract_strided_slice %465 {offsets = [0, 64], sizes = [2, 32], strides = [1, 1]} : vector<2x128xf32> to vector<2x32xf32>
    %469 = vector.extract_strided_slice %465 {offsets = [0, 96], sizes = [2, 32], strides = [1, 1]} : vector<2x128xf32> to vector<2x32xf32>
    %470 = arith.mulf %467, %453 : vector<2x32xf32>
    %471 = arith.mulf %466, %468 : vector<2x32xf32>
    %472 = arith.addf %470, %471 : vector<2x32xf32>
    %473 = math.tanh %472 : vector<2x32xf32>
    %474 = arith.mulf %469, %473 : vector<2x32xf32>
    %475 = vector.extract_strided_slice %356 {offsets = [12, 0], sizes = [2, 128], strides = [1, 1]} : vector<16x128xf32> to vector<2x128xf32>
    %cst_105 = arith.constant dense<0.000000e+00> : vector<2x128xf32>
    %476 = tpu.matmul %474, %358, %cst_105 {dimension_numbers = #tpu.dot_dimension_numbers<[1], [0], [0], [1], [0, 0, 1, 1], [], []>} : vector<2x32xf32>, vector<32x128xf32>, vector<2x128xf32> -> vector<2x128xf32>
    %477 = arith.addf %475, %476 : vector<2x128xf32>
    %478 = math.tanh %477 : vector<2x128xf32>
    %479 = arith.negf %477 : vector<2x128xf32>
    %480 = math.exp %479 : vector<2x128xf32>
    %cst_106 = arith.constant 1.000000e+00 : f32
    %481 = vector.broadcast %cst_106 : f32 to vector<2x128xf32>
    %482 = arith.addf %481, %480 : vector<2x128xf32>
    %483 = arith.divf %481, %482 : vector<2x128xf32>
    %484 = arith.select %5, %478, %483 : vector<2x128xi1>, vector<2x128xf32>
    %485 = vector.extract_strided_slice %484 {offsets = [0, 0], sizes = [2, 32], strides = [1, 1]} : vector<2x128xf32> to vector<2x32xf32>
    %486 = vector.extract_strided_slice %484 {offsets = [0, 32], sizes = [2, 32], strides = [1, 1]} : vector<2x128xf32> to vector<2x32xf32>
    %487 = vector.extract_strided_slice %484 {offsets = [0, 64], sizes = [2, 32], strides = [1, 1]} : vector<2x128xf32> to vector<2x32xf32>
    %488 = vector.extract_strided_slice %484 {offsets = [0, 96], sizes = [2, 32], strides = [1, 1]} : vector<2x128xf32> to vector<2x32xf32>
    %489 = arith.mulf %486, %472 : vector<2x32xf32>
    %490 = arith.mulf %485, %487 : vector<2x32xf32>
    %491 = arith.addf %489, %490 : vector<2x32xf32>
    %492 = math.tanh %491 : vector<2x32xf32>
    %493 = arith.mulf %488, %492 : vector<2x32xf32>
    %494 = vector.extract_strided_slice %356 {offsets = [14, 0], sizes = [2, 128], strides = [1, 1]} : vector<16x128xf32> to vector<2x128xf32>
    %cst_107 = arith.constant dense<0.000000e+00> : vector<2x128xf32>
    %495 = tpu.matmul %493, %358, %cst_107 {dimension_numbers = #tpu.dot_dimension_numbers<[1], [0], [0], [1], [0, 0, 1, 1], [], []>} : vector<2x32xf32>, vector<32x128xf32>, vector<2x128xf32> -> vector<2x128xf32>
    %496 = arith.addf %494, %495 : vector<2x128xf32>
    %497 = math.tanh %496 : vector<2x128xf32>
    %498 = arith.negf %496 : vector<2x128xf32>
    %499 = math.exp %498 : vector<2x128xf32>
    %cst_108 = arith.constant 1.000000e+00 : f32
    %500 = vector.broadcast %cst_108 : f32 to vector<2x128xf32>
    %501 = arith.addf %500, %499 : vector<2x128xf32>
    %502 = arith.divf %500, %501 : vector<2x128xf32>
    %503 = arith.select %5, %497, %502 : vector<2x128xi1>, vector<2x128xf32>
    %504 = vector.extract_strided_slice %503 {offsets = [0, 0], sizes = [2, 32], strides = [1, 1]} : vector<2x128xf32> to vector<2x32xf32>
    %505 = vector.extract_strided_slice %503 {offsets = [0, 32], sizes = [2, 32], strides = [1, 1]} : vector<2x128xf32> to vector<2x32xf32>
    %506 = vector.extract_strided_slice %503 {offsets = [0, 64], sizes = [2, 32], strides = [1, 1]} : vector<2x128xf32> to vector<2x32xf32>
    %507 = vector.extract_strided_slice %503 {offsets = [0, 96], sizes = [2, 32], strides = [1, 1]} : vector<2x128xf32> to vector<2x32xf32>
    %508 = arith.mulf %505, %491 : vector<2x32xf32>
    %509 = arith.mulf %504, %506 : vector<2x32xf32>
    %510 = arith.addf %508, %509 : vector<2x32xf32>
    %511 = math.tanh %510 : vector<2x32xf32>
    %512 = arith.mulf %507, %511 : vector<2x32xf32>
    %513 = vector.extract_strided_slice %349 {offsets = [14, 0], sizes = [2, 64], strides = [1, 1]} : vector<16x64xf32> to vector<2x64xf32>
    %c1_109 = arith.constant 1 : index
    %c0_110 = arith.constant 0 : index
    %c0_111 = arith.constant 0 : index
    %514 = vector.load %arg4[%c1_109, %c0_110, %c0_111] : memref<2x64x128xf32, #tpu.memory_space<vmem>>, vector<1x64x128xf32>
    %515 = vector.shape_cast %514 : vector<1x64x128xf32> to vector<64x128xf32>
    %cst_112 = arith.constant dense<0.000000e+00> : vector<2x128xf32>
    %516 = tpu.matmul %513, %515, %cst_112 {dimension_numbers = #tpu.dot_dimension_numbers<[1], [0], [0], [1], [0, 0, 1, 1], [], []>} : vector<2x64xf32>, vector<64x128xf32>, vector<2x128xf32> -> vector<2x128xf32>
    %c1_113 = arith.constant 1 : index
    %c0_114 = arith.constant 0 : index
    %c0_115 = arith.constant 0 : index
    %517 = vector.load %arg6[%c1_113, %c0_114, %c0_115] : memref<2x1x128xf32, #tpu.memory_space<vmem>>, vector<1x1x128xf32>
    %518 = vector.shape_cast %517 : vector<1x1x128xf32> to vector<1x128xf32>
    %519 = vector.broadcast %518 : vector<1x128xf32> to vector<2x128xf32>
    %520 = arith.addf %516, %519 : vector<2x128xf32>
    %521 = math.tanh %520 : vector<2x128xf32>
    %522 = arith.negf %520 : vector<2x128xf32>
    %523 = math.exp %522 : vector<2x128xf32>
    %cst_116 = arith.constant 1.000000e+00 : f32
    %524 = vector.broadcast %cst_116 : f32 to vector<2x128xf32>
    %525 = arith.addf %524, %523 : vector<2x128xf32>
    %526 = arith.divf %524, %525 : vector<2x128xf32>
    %527 = arith.select %5, %521, %526 : vector<2x128xi1>, vector<2x128xf32>
    %528 = vector.extract_strided_slice %527 {offsets = [0, 0], sizes = [2, 32], strides = [1, 1]} : vector<2x128xf32> to vector<2x32xf32>
    %529 = vector.extract_strided_slice %527 {offsets = [0, 64], sizes = [2, 32], strides = [1, 1]} : vector<2x128xf32> to vector<2x32xf32>
    %530 = vector.extract_strided_slice %527 {offsets = [0, 96], sizes = [2, 32], strides = [1, 1]} : vector<2x128xf32> to vector<2x32xf32>
    %531 = arith.mulf %528, %529 : vector<2x32xf32>
    %532 = math.tanh %531 : vector<2x32xf32>
    %533 = arith.mulf %530, %532 : vector<2x32xf32>
    %c0_117 = arith.constant 0 : index
    %c0_118 = arith.constant 0 : index
    %534 = vector.load %arg7[%c0_117, %c0_118] : memref<64x32xf32, #tpu.memory_space<vmem>>, vector<32x32xf32>
    %cst_119 = arith.constant dense<0.000000e+00> : vector<2x32xf32>
    %535 = tpu.matmul %512, %534, %cst_119 {dimension_numbers = #tpu.dot_dimension_numbers<[1], [0], [0], [1], [0, 0, 1, 1], [], []>} : vector<2x32xf32>, vector<32x32xf32>, vector<2x32xf32> -> vector<2x32xf32>
    %c32_120 = arith.constant 32 : index
    %c0_121 = arith.constant 0 : index
    %536 = vector.load %arg7[%c32_120, %c0_121] : memref<64x32xf32, #tpu.memory_space<vmem>>, vector<32x32xf32>
    %cst_122 = arith.constant dense<0.000000e+00> : vector<2x32xf32>
    %537 = tpu.matmul %533, %536, %cst_122 {dimension_numbers = #tpu.dot_dimension_numbers<[1], [0], [0], [1], [0, 0, 1, 1], [], []>} : vector<2x32xf32>, vector<32x32xf32>, vector<2x32xf32> -> vector<2x32xf32>
    %538 = arith.addf %535, %537 : vector<2x32xf32>
    %c0_123 = arith.constant 0 : index
    %c0_124 = arith.constant 0 : index
    %539 = vector.load %arg8[%c0_123, %c0_124] : memref<1x32xf32, #tpu.memory_space<vmem>>, vector<1x32xf32>
    %540 = vector.broadcast %539 : vector<1x32xf32> to vector<2x32xf32>
    %541 = arith.addf %538, %540 : vector<2x32xf32>
    %cst_125 = arith.constant 0.000000e+00 : f32
    %542 = vector.broadcast %cst_125 : f32 to vector<2x32xf32>
    %543 = arith.maximumf %541, %542 : vector<2x32xf32>
    %c0_126 = arith.constant 0 : index
    %c0_127 = arith.constant 0 : index
    %544 = vector.load %arg9[%c0_126, %c0_127] : memref<32x32xf32, #tpu.memory_space<vmem>>, vector<32x32xf32>
    %cst_128 = arith.constant dense<0.000000e+00> : vector<2x32xf32>
    %545 = tpu.matmul %543, %544, %cst_128 {dimension_numbers = #tpu.dot_dimension_numbers<[1], [0], [0], [1], [0, 0, 1, 1], [], []>} : vector<2x32xf32>, vector<32x32xf32>, vector<2x32xf32> -> vector<2x32xf32>
    %c0_129 = arith.constant 0 : index
    %c0_130 = arith.constant 0 : index
    %546 = vector.load %arg10[%c0_129, %c0_130] : memref<1x32xf32, #tpu.memory_space<vmem>>, vector<1x32xf32>
    %547 = vector.broadcast %546 : vector<1x32xf32> to vector<2x32xf32>
    %548 = arith.addf %545, %547 : vector<2x32xf32>
    %cst_131 = arith.constant 0.000000e+00 : f32
    %549 = vector.broadcast %cst_131 : f32 to vector<2x32xf32>
    %550 = arith.maximumf %548, %549 : vector<2x32xf32>
    %c0_132 = arith.constant 0 : index
    %c0_133 = arith.constant 0 : index
    %551 = vector.load %arg11[%c0_132, %c0_133] : memref<32x4xf32, #tpu.memory_space<vmem>>, vector<32x4xf32>
    %cst_134 = arith.constant dense<0.000000e+00> : vector<2x4xf32>
    %552 = tpu.matmul %550, %551, %cst_134 {dimension_numbers = #tpu.dot_dimension_numbers<[1], [0], [0], [1], [0, 0, 1, 1], [], []>} : vector<2x32xf32>, vector<32x4xf32>, vector<2x4xf32> -> vector<2x4xf32>
    %c0_135 = arith.constant 0 : index
    %c0_136 = arith.constant 0 : index
    %553 = vector.load %arg12[%c0_135, %c0_136] : memref<1x4xf32, #tpu.memory_space<vmem>>, vector<1x4xf32>
    %554 = vector.broadcast %553 : vector<1x4xf32> to vector<2x4xf32>
    %555 = arith.addf %552, %554 : vector<2x4xf32>
    %556 = arith.negf %555 : vector<2x4xf32>
    %557 = math.exp %556 : vector<2x4xf32>
    %cst_137 = arith.constant 1.000000e+00 : f32
    %558 = vector.broadcast %cst_137 : f32 to vector<2x4xf32>
    %559 = arith.addf %558, %557 : vector<2x4xf32>
    %560 = arith.divf %558, %559 : vector<2x4xf32>
    %c0_138 = arith.constant 0 : index
    %c0_139 = arith.constant 0 : index
    %561 = vector.load %arg13[%c0_138, %c0_139] : memref<2x4xf32, #tpu.memory_space<vmem>>, vector<2x4xf32>
    tpu.vector_store %arg13[%c0_138, %c0_139], %560 {strides = array<i32>} : memref<2x4xf32, #tpu.memory_space<vmem>>, vector<2x4xf32>,
    return
  }
}

</mosaic_0001>

<bundles_post_ra>
// kernel: forward.1
= control target key start
LH: loop header
LB: loop body
LE: loop exit
PB: predicated region body
PF: predicated region fallthrough
CT: control target
= control target key end

     0   :  { %18 = vsyncpa [#allocation4], 0  ;;  %s3283_s0 = inlined_call_operand.vmem [shape: f32[16,16], index: 0, kind: input, shape index: {}]   ;;  %s3284_s1 = inlined_call_operand.hbm [shape: f32[2,16,128], index: 1, kind: input, shape index: {}]   ;;  %s3285_s2 = inlined_call_operand.hbm [shape: f32[2,32,128], index: 2, kind: input, shape index: {}]   ;;  %s3286_s3 = inlined_call_operand.vmem [shape: f32[2,1,128], index: 3, kind: input, shape index: {}]   ;;  %s3287_s4 = inlined_call_operand.hbm [shape: f32[2,64,128], index: 4, kind: input, shape index: {}]   ;;  %s3288_s5 = inlined_call_operand.hbm [shape: f32[2,32,128], index: 5, kind: input, shape index: {}]   ;;  %s3289_s6 = inlined_call_operand.vmem [shape: f32[2,1,128], index: 6, kind: input, shape index: {}]   ;;  %s3290_s7 = inlined_call_operand.hbm [shape: f32[64,32], index: 7, kind: input, shape index: {}]   ;;  %s3291_s8 = inlined_call_operand.vmem [shape: f32[1,32], index: 8, kind: input, shape index: {}]   ;;  %s3292_s9 = inlined_call_operand.hbm [shape: f32[32,32], index: 9, kind: input, shape index: {}]   ;;  %s3293_s10 = inlined_call_operand.vmem [shape: f32[1,32], index: 10, kind: input, shape index: {}]   ;;  %s3294_s11 = inlined_call_operand.vmem [shape: f32[32,4], index: 11, kind: input, shape index: {}]   ;;  %s3295_s12 = inlined_call_operand.vmem [shape: f32[1,4], index: 12, kind: input, shape index: {}]   ;;  %s3296_s13 = inlined_call_operand.hbm [shape: f32[2,4], index: 13, kind: output, shape index: {}]  }
   0x1   :  { %19 = vsyncpa [#allocation7], 0 }
   0x2   :  { %20 = vsyncpa [#allocation10], 0 }
   0x3   :  { %21 = vsyncpa [#allocation13], 0 }
   0x4   :  { %22 = vsyncpa [#allocation5], 0  ;;  %s42_s27 = sshll.u32 %s3285_s2, 4  ;;  %s2698_s28 = smov [#allocation6]   ;;  %s43_s27 = int_to_ptr.hbm [resolvable:$true] %s42_s27 }
   0x5   :  { %s44_s29 = sshll.u32 %s2698_s28, 4  ;;  %s70_s15 = sshll.u32 %s3288_s5, 4  ;;  %s45_s29 = int_to_ptr.vmem [resolvable:$true] %s44_s29  ;;  %s71_s15 = int_to_ptr.hbm [resolvable:$true] %s70_s15 }
   0x6   :  { %s2699_s16 = smov 128   ;;  %s2700_s17 = smov 8  }
   0x7   :  { %50 = dma.hbm_to_vmem [thread:$0]  %s43_s27, 1024, %s45_s29, [#allocation7], %s2699_s16, %s2699_s16, %s2700_s17  }
   0x8   :  { %s2701_s18 = smov [#allocation9]   ;;  %s29_s2 = sshll.u32 %s3284_s1, 4  ;;  %s30_s2 = int_to_ptr.hbm [resolvable:$true] %s29_s2 }
   0x9   :  { %s72_s19 = sshll.u32 %s2701_s18, 4  ;;  %s57_s23 = sshll.u32 %s3287_s4, 4  ;;  %s73_s19 = int_to_ptr.vmem [resolvable:$true] %s72_s19  ;;  %s58_s23 = int_to_ptr.hbm [resolvable:$true] %s57_s23 }
   0xa   :  { %78 = dma.hbm_to_vmem [thread:$0]  %s71_s15, 1024, %s73_s19, [#allocation10], %s2699_s16, %s2699_s16, %s2700_s17  }
   0xb   :  { %s2702_s24 = smov [#allocation3]   ;;  %s2703_s26 = smov [#allocation8]  }
   0xc   :  { %s31_s25 = sshll.u32 %s2702_s24, 4  ;;  %s59_s1 = sshll.u32 %s2703_s26, 4  ;;  %s32_s25 = int_to_ptr.vmem [resolvable:$true] %s31_s25  ;;  %s60_s1 = int_to_ptr.vmem [resolvable:$true] %s59_s1 }
   0xd   :  { %37 = dma.hbm_to_vmem [thread:$0]  %s30_s2, 512, %s32_s25, [#allocation4], %s2699_s16, %s2699_s16, %s2700_s17  }
   0xe   :  { %s85_s29 = sshll.u32 %s3290_s7, 4  ;;  %s100_s14 = sshll.u32 %s3292_s9, 4  ;;  %s86_s29 = int_to_ptr.hbm [resolvable:$true] %s85_s29  ;;  %s101_s14 = int_to_ptr.hbm [resolvable:$true] %s100_s14 }
   0xf   :  { %65 = dma.hbm_to_vmem [thread:$0]  %s58_s23, 2048, %s60_s1, [#allocation7], %s2699_s16, %s2699_s16, %s2700_s17  }
  0x10   :  { %s2704_s15 = smov [#allocation11]   ;;  %s2705_s19 = smov [#allocation12]  }
  0x11   :  { %s87_s18 = sshll.u32 %s2704_s15, 4  ;;  %s102_s7 = sshll.u32 %s2705_s19, 4  ;;  %s88_s18 = int_to_ptr.vmem [resolvable:$true] %s87_s18  ;;  %s103_s7 = int_to_ptr.vmem [resolvable:$true] %s102_s7 }
  0x12   :  { %93 = dma.hbm_to_vmem [thread:$0]  %s86_s29, 1024, %s88_s18, [#allocation10], %s2699_s16, %s2699_s16, %s2700_s17  }
  0x13   :  { %108 = dma.hbm_to_vmem [thread:$0]  %s101_s14, 512, %s103_s7, [#allocation13], %s2699_s16, %s2699_s16, %s2700_s17  }
  0x14   :  { %2688 = dma.done.wait [#allocation4], 512  }
  0x15   :  { %2689 = vsyncadd [#allocation4], 4294966784 }
  0x16   :  { %2690 = dma.done.wait [#allocation7], 3072  }
  0x17   :  { %2691 = vsyncadd [#allocation7], 4294964224 }
  0x18   :  { %2692 = dma.done.wait [#allocation10], 2048  }
  0x19   :  { %2693 = vsyncadd [#allocation10], 4294965248 }
  0x1a   :  { %2694 = dma.done.wait [#allocation13], 512  }
  0x1b   :  { %2695 = vsyncadd [#allocation13], 4294966784  ;;  %v185_v0 = vld [vmem:[#allocation6 + $0x18] sm:$0xff]  ;;  %v147_v1 = vld [vmem:[#allocation3 + $0x8] sm:$0xff]  ;;  %vm152_vm0 = vcmask 130048   ;;  %v2706_v7 = vmov 0.0   ;;  %v139_v16 = vlaneseq }
  0x1c   :  { %v184_v2 = vld [vmem:[#allocation6 + $0x10] sm:$0xff]  ;;  %202 = vmatpush.msra.mxu1 %v185_v0  ;;  %173 = vmatpush.msra.mxu0 %v147_v1  ;;  %v146_v3 = vld [vmem:[#allocation3] sm:$0xff]  ;;  %v183_v5 = vld [vmem:[#allocation6 + $0x8] sm:$0xff]  ;;  %s2707_s21 = smov 64   ;;  %s2708_s2 = smov 32   ;;  %vm253_vm8 = vcmask 254976  }
  0x1d   :  { %v2820_v4 = vld [vmem:[%s3283_s0] sm:$0xff]  ;;  %v182_v6 = vld [vmem:[#allocation6] sm:$0xff]  ;;  %269 = vmatpush.msra.mxu2 %v185_v0  ;;  %345 = vmatpush.msra.mxu3 %v185_v0  ;;  %v140_v18 = vand.u32 127, %v139_v16  ;;  %vm186_vm9 = vcmask 261120  }
  0x1e   :  { %203 = vmatpush.msra.mxu1 %v184_v2  ;;  %174 = vmatpush.msra.mxu0 %v146_v3  ;;  %v2828_v8 = vld [vmem:[%s3286_s3] ss:$0 sm:$0xff]  ;;  %v2071_v24 = vld [vmem:[#allocation11 + $0x20] sm:$0xff] }
  0x1f   :  { %2236 = vmatmul.msk.f32.vlgmr.msra.gmra.mxu0 %vm152_vm0, %v2820_v4  ;;  %270 = vmatpush.msra.mxu2 %v184_v2  ;;  %vm141_vm1 = vcmp.ge.s32.totalorder %v140_v18, 64  ;;  %vm142_vm2 = vcmp.lt.s32.totalorder %v140_v18, 96 }
  0x20   :  { %204 = vmatpush.msra.mxu1 %v183_v5  ;;  %346 = vmatpush.msra.mxu3 %v184_v2  ;;  %vm2834_vm4 = vmand %vm141_vm1, %vm142_vm2 }
  0x21   :  { %271 = vmatpush.msra.mxu2 %v183_v5  ;;  %641 = vmatpush.msrb.mxu0 %v185_v0 }
  0x22   :  { %205 = vmatpush.msra.mxu1 %v182_v6  ;;  %347 = vmatpush.msra.mxu3 %v183_v5 }
  0x23   :  { %206 = vmatmul.f32.vlgmr.msra.gmra.mxu1 %v2706_v7  ;;  %272 = vmatpush.msra.mxu2 %v182_v6 }
  0x24   :  { %348 = vmatpush.msra.mxu3 %v182_v6  ;;  %421 = vmatpush.msrb.mxu1 %v185_v0 }
  0x25   :  { %497 = vmatpush.msrb.mxu2 %v185_v0  ;;  %642 = vmatpush.msrb.mxu0 %v184_v2 }
  0x26   :  { %566 = vmatpush.msrb.mxu3 %v185_v0  ;;  %422 = vmatpush.msrb.mxu1 %v184_v2 }
  0x27   :  { %498 = vmatpush.msrb.mxu2 %v184_v2  ;;  %643 = vmatpush.msrb.mxu0 %v183_v5 }
  0x28   :  { %567 = vmatpush.msrb.mxu3 %v184_v2  ;;  %423 = vmatpush.msrb.mxu1 %v183_v5 }
  0x29   :  { %499 = vmatpush.msrb.mxu2 %v183_v5  ;;  %644 = vmatpush.msrb.mxu0 %v182_v6 }
  0x2a   :  { %568 = vmatpush.msrb.mxu3 %v183_v5  ;;  %424 = vmatpush.msrb.mxu1 %v182_v6 }
  0x2b   :  { %500 = vmatpush.msrb.mxu2 %v182_v6 }
  0x2c   :  { %569 = vmatpush.msrb.mxu3 %v182_v6  ;;  %716 = vmatpush.msra.mxu1 %v185_v0 }
  0x2e   :  { %717 = vmatpush.msra.mxu1 %v184_v2 }
  0x30   :  { %718 = vmatpush.msra.mxu1 %v183_v5 }
  0x32   :  { %719 = vmatpush.msra.mxu1 %v182_v6 }
  0x9c   :  { %v176_v9 = vpop.f32.mrf.mxu0 }
  0x9d   :  { %v2831_v10 = vadd.f32 %v2828_v8, %v176_v9 }
  0xa0   :  { %v207_v11 = vpop.f32.mrf.mxu1 }
  0xa1   :  { %v210_v12 = vadd.f32 %v207_v11, %v2831_v10 }
  0xa3   :  { %v2238_v13 = vmul.f32 -1.442695, %v210_v12 }
  0xa5   :  { %2316 = vpow2.f32 %v2238_v13 }
  0xab   :  { %v2317_v14 = vpop.eup %2316 }
  0xac   :  { %v215_v15 = vadd.f32 1.0, %v2317_v14 }
  0xae   :  { %2318 = vrcp.f32 %v215_v15  ;;  %v227_v21 = vand.u32 2147483648, %v215_v15  ;;  %v225_v23 = vand.u32 2147483647, %v215_v15  ;;  %vm221_vm5 = vweird.f32 %v215_v15 }
  0xaf   :  { %2320 = vtanh.f32 %v210_v12 }
  0xb0   :  { %v228_v26 = vor.u32 1.1754944e-38, %v227_v21  ;;  %vm226_vm7 = vcmp.eq.f32.partialorder %v225_v23, 8.507059e+37 }
  0xb4   :  { %v2319_v17 = vpop.eup %2318 }
  0xb5   :  { %v217_v19 = vmul.f32 %v2319_v17, %v215_v15  ;;  %vm222_vm3 = vweird.f32 %v2319_v17  ;;  %v2321_v28 = vpop.eup %2320 }
  0xb6   :  { %vm223_vm6 = vmor %vm221_vm5, %vm222_vm3 }
  0xb7   :  { %v218_v20 = vsub.f32 1.0, %v217_v19 }
  0xb9   :  { %v219_v22 = vmul.f32 %v2319_v17, %v218_v20 }
  0xbb   :  { %v220_v25 = vadd.f32 %v2319_v17, %v219_v22 }
  0xbd   :  { %v224_v27 = vsel %vm223_vm6, %v2319_v17, %v220_v25 }
  0xbe   :  { %v229_v29 = vsel %vm226_vm7, %v228_v26, %v224_v27 }
  0xbf   :  { %v231_v30 = vsel %vm2834_vm4, %v2321_v28, %v229_v29 }
  0xc0   :  { %234 = vrot.lane.b32.xlu0 %v231_v30, %s2707_s21  ;;  %v232_v33 = vmul.f32 0.0, %v231_v30 }
 0x132   :  { %v235_v31 = vpop.permute.xlu0 %234 }
 0x133   :  { %v237_v32 = vmul.f32 %v235_v31, %v231_v30 }
 0x135   :  { %239 = vrot.lane.b32.xlu0 %v237_v32, %s2708_s2 }
 0x1a7   :  { %v240_v34 = vpop.permute.xlu0 %239 }
 0x1a8   :  { %v242_v35 = vadd.f32 %v240_v34, %v232_v33 }
 0x1aa   :  { %2322 = vtanh.f32 %v242_v35  ;;  %v303_v60 = vrot.slane %v242_v35, 6 }
 0x1b0   :  { %v2323_v36 = vpop.eup %2322 }
 0x1b1   :  { %245 = vrot.lane.b32.xlu1 %v2323_v36, %s2707_s21 }
 0x223   :  { %v246_v37 = vpop.permute.xlu1 %245 }
 0x224   :  { %v248_v38 = vmul.f32 %v246_v37, %v231_v30 }
 0x226   :  { %250 = vrot.lane.b32.xlu1 %v248_v38, %s2708_s2 }
 0x298   :  { %v251_v39 = vpop.permute.xlu1 %250 }
 0x299   :  { %254 = vst.msk [vmem:[#allocation2] sm:$0x3] %vm253_vm8, %v251_v39  ;;  %2239 = vmatmul.msk.f32.vlgmr.msra.gmra.mxu2 %vm186_vm9, %v251_v39 }
 0x31c   :  { %v274_v40 = vpop.f32.mrf.mxu2 }
 0x31d   :  { %v278_v41 = vrot.slane %v274_v40, 6 }
 0x31f   :  { %v280_v42 = vadd.f32 %v278_v41, %v2831_v10 }
 0x321   :  { %v2240_v43 = vmul.f32 -1.442695, %v280_v42 }
 0x323   :  { %2324 = vpow2.f32 %v2240_v43 }
 0x329   :  { %v2325_v44 = vpop.eup %2324 }
 0x32a   :  { %v285_v45 = vadd.f32 1.0, %v2325_v44 }
 0x32c   :  { %2326 = vrcp.f32 %v285_v45  ;;  %v297_v49 = vand.u32 2147483648, %v285_v45  ;;  %v295_v51 = vand.u32 2147483647, %v285_v45  ;;  %vm291_vm11 = vweird.f32 %v285_v45 }
 0x32d   :  { %2328 = vtanh.f32 %v280_v42 }
 0x32e   :  { %v298_v53 = vor.u32 1.1754944e-38, %v297_v49  ;;  %vm296_vm13 = vcmp.eq.f32.partialorder %v295_v51, 8.507059e+37 }
 0x332   :  { %v2327_v46 = vpop.eup %2326 }
 0x333   :  { %v287_v47 = vmul.f32 %v2327_v46, %v285_v45  ;;  %vm292_vm10 = vweird.f32 %v2327_v46  ;;  %v2329_v55 = vpop.eup %2328 }
 0x334   :  { %vm293_vm12 = vmor %vm291_vm11, %vm292_vm10 }
 0x335   :  { %v288_v48 = vsub.f32 1.0, %v287_v47 }
 0x337   :  { %v289_v50 = vmul.f32 %v2327_v46, %v288_v48 }
 0x339   :  { %v290_v52 = vadd.f32 %v2327_v46, %v289_v50 }
 0x33b   :  { %v294_v54 = vsel %vm293_vm12, %v2327_v46, %v290_v52 }
 0x33c   :  { %v299_v56 = vsel %vm296_vm13, %v298_v53, %v294_v54 }
 0x33d   :  { %v301_v57 = vsel %vm2834_vm4, %v2329_v55, %v299_v56 }
 0x33e   :  { %307 = vrot.lane.b32.xlu2 %v301_v57, %s2707_s21  ;;  %v305_v61 = vmul.f32 %v303_v60, %v301_v57 }
 0x398   :  { %v308_v58 = vpop.permute.xlu2 %307 }
 0x399   :  { %v310_v59 = vmul.f32 %v308_v58, %v301_v57 }
 0x39b   :  { %312 = vrot.lane.b32.xlu2 %v310_v59, %s2708_s2 }
 0x3f5   :  { %v313_v62 = vpop.permute.xlu2 %312 }
 0x3f6   :  { %v315_v63 = vadd.f32 %v313_v62, %v305_v61 }
 0x3f8   :  { %2330 = vtanh.f32 %v315_v63  ;;  %v379_v30 = vrot.slane %v315_v63, 6 }
 0x3fe   :  { %v2331_v0 = vpop.eup %2330 }
 0x3ff   :  { %318 = vrot.lane.b32.xlu0 %v2331_v0, %s2707_s21 }
 0x471   :  { %v319_v1 = vpop.permute.xlu0 %318 }
 0x472   :  { %v2852_v2 = vmul.f32 %v319_v1, %v301_v57 }
 0x474   :  { %v328_v3 = vrot.slane %v2852_v2, 2 }
 0x476   :  { %329 = vrot.lane.b32.xlu1 %v328_v3, %s2708_s2  ;;  %v145_v3 = vld [vmem:[%s3283_s0 + $0x8] sm:$0xff] }
 0x477   :  { %2237 = vmatmul.msk.f32.gmra.mxu0 %vm152_vm0, %v145_v3 }
 0x4e8   :  { %v330_v5 = vpop.permute.xlu1 %329 }
 0x4e9   :  { %2241 = vmatmul.msk.f32.vlgmr.msra.gmra.mxu3 %vm186_vm9, %v330_v5 }
 0x56c   :  { %v350_v6 = vpop.f32.mrf.mxu3 }
 0x56d   :  { %v354_v9 = vrot.slane %v350_v6, 4  ;;  %v179_v6 = vpop.f32.mrf.mxu0 }
 0x56f   :  { %v356_v11 = vadd.f32 %v354_v9, %v2831_v10  ;;  %v2884_v9 = vadd.f32 %v2828_v8, %v179_v6 }
 0x571   :  { %v2242_v12 = vmul.f32 -1.442695, %v356_v11 }
 0x573   :  { %2332 = vpow2.f32 %v2242_v12 }
 0x579   :  { %v2333_v13 = vpop.eup %2332 }
 0x57a   :  { %v361_v14 = vadd.f32 1.0, %v2333_v13 }
 0x57c   :  { %2334 = vrcp.f32 %v361_v14  ;;  %v373_v18 = vand.u32 2147483648, %v361_v14  ;;  %v371_v20 = vand.u32 2147483647, %v361_v14  ;;  %vm367_vm15 = vweird.f32 %v361_v14 }
 0x57d   :  { %2336 = vtanh.f32 %v356_v11 }
 0x57e   :  { %v374_v22 = vor.u32 1.1754944e-38, %v373_v18  ;;  %vm372_vm2 = vcmp.eq.f32.partialorder %v371_v20, 8.507059e+37 }
 0x582   :  { %v2335_v15 = vpop.eup %2334 }
 0x583   :  { %v363_v16 = vmul.f32 %v2335_v15, %v361_v14  ;;  %vm368_vm14 = vweird.f32 %v2335_v15  ;;  %v2337_v25 = vpop.eup %2336 }
 0x584   :  { %vm369_vm1 = vmor %vm367_vm15, %vm368_vm14 }
 0x585   :  { %v364_v17 = vsub.f32 1.0, %v363_v16 }
 0x587   :  { %v365_v19 = vmul.f32 %v2335_v15, %v364_v17 }
 0x589   :  { %v366_v21 = vadd.f32 %v2335_v15, %v365_v19 }
 0x58b   :  { %v370_v23 = vsel %vm369_vm1, %v2335_v15, %v366_v21 }
 0x58c   :  { %v375_v26 = vsel %vm372_vm2, %v374_v22, %v370_v23 }
 0x58d   :  { %v377_v27 = vsel %vm2834_vm4, %v2337_v25, %v375_v26 }
 0x58e   :  { %383 = vrot.lane.b32.xlu2 %v377_v27, %s2707_s21  ;;  %v381_v31 = vmul.f32 %v379_v30, %v377_v27 }
 0x5e8   :  { %v384_v28 = vpop.permute.xlu2 %383 }
 0x5e9   :  { %v386_v29 = vmul.f32 %v384_v28, %v377_v27 }
 0x5eb   :  { %388 = vrot.lane.b32.xlu0 %v386_v29, %s2708_s2 }
 0x65d   :  { %v389_v32 = vpop.permute.xlu0 %388 }
 0x65e   :  { %v391_v33 = vadd.f32 %v389_v32, %v381_v31 }
 0x660   :  { %2338 = vtanh.f32 %v391_v33  ;;  %v455_v58 = vrot.slane %v391_v33, 6 }
 0x666   :  { %v2339_v34 = vpop.eup %2338 }
 0x667   :  { %394 = vrot.lane.b32.xlu1 %v2339_v34, %s2707_s21 }
 0x6d9   :  { %v395_v35 = vpop.permute.xlu1 %394 }
 0x6da   :  { %v2863_v36 = vmul.f32 %v395_v35, %v377_v27  ;;  %v776_v35 = vld [vmem:[#allocation3 + $0x18] sm:$0xff] }
 0x6db   :  { %796 = vmatpush.msra.mxu2 %v776_v35 }
 0x6dc   :  { %v404_v37 = vrot.slane %v2863_v36, 4 }
 0x6de   :  { %405 = vrot.lane.b32.xlu2 %v404_v37, %s2708_s2  ;;  %v775_v37 = vld [vmem:[#allocation3 + $0x10] sm:$0xff] }
 0x6df   :  { %797 = vmatpush.msra.mxu2 %v775_v37 }
 0x738   :  { %v406_v38 = vpop.permute.xlu2 %405 }
 0x739   :  { %2243 = vmatmul.msk.f32.vlgmr.msrb.gmra.mxu1 %vm186_vm9, %v406_v38 }
 0x7b6   :  { %v426_v39 = vpop.f32.mrf.mxu1 }
 0x7b7   :  { %v430_v40 = vrot.slane %v426_v39, 2 }
 0x7b9   :  { %v432_v41 = vadd.f32 %v430_v40, %v2831_v10  ;;  %v2899_v40 = vld [vmem:[#allocation6 + $0x38] sm:$0xff] }
 0x7ba   :  { %822 = vmatpush.msra.mxu3 %v2899_v40  ;;  %895 = vmatpush.msra.mxu0 %v2899_v40 }
 0x7bb   :  { %v2244_v42 = vmul.f32 -1.442695, %v432_v41  ;;  %971 = vmatpush.msrb.mxu1 %v2899_v40 }
 0x7bd   :  { %2340 = vpow2.f32 %v2244_v42  ;;  %v2905_v42 = vld [vmem:[#allocation6 + $0x28] sm:$0xff] }
 0x7c3   :  { %v2341_v43 = vpop.eup %2340 }
 0x7c4   :  { %v437_v44 = vadd.f32 1.0, %v2341_v43 }
 0x7c6   :  { %2342 = vrcp.f32 %v437_v44  ;;  %v449_v48 = vand.u32 2147483648, %v437_v44  ;;  %v447_v50 = vand.u32 2147483647, %v437_v44  ;;  %vm443_vm5 = vweird.f32 %v437_v44 }
 0x7c7   :  { %2344 = vtanh.f32 %v432_v41  ;;  %v2901_v41 = vld [vmem:[#allocation6 + $0x30] sm:$0xff] }
 0x7c8   :  { %v450_v52 = vor.u32 1.1754944e-38, %v449_v48  ;;  %vm448_vm7 = vcmp.eq.f32.partialorder %v447_v50, 8.507059e+37  ;;  %823 = vmatpush.msra.mxu3 %v2901_v41  ;;  %896 = vmatpush.msra.mxu0 %v2901_v41 }
 0x7c9   :  { %972 = vmatpush.msrb.mxu1 %v2901_v41 }
 0x7ca   :  { %824 = vmatpush.msra.mxu3 %v2905_v42  ;;  %897 = vmatpush.msra.mxu0 %v2905_v42 }
 0x7cb   :  { %973 = vmatpush.msrb.mxu1 %v2905_v42 }
 0x7cc   :  { %v2343_v45 = vpop.eup %2342 }
 0x7cd   :  { %v439_v46 = vmul.f32 %v2343_v45, %v437_v44  ;;  %vm444_vm3 = vweird.f32 %v2343_v45  ;;  %v2345_v10 = vpop.eup %2344  ;;  %v2310_v44 = vld [vmem:[%s3286_s3 + $0x1] ss:$0 sm:$0xff] }
 0x7ce   :  { %vm445_vm6 = vmor %vm443_vm5, %vm444_vm3 }
 0x7cf   :  { %v440_v47 = vsub.f32 1.0, %v439_v46 }
 0x7d1   :  { %v441_v49 = vmul.f32 %v2343_v45, %v440_v47 }
 0x7d3   :  { %v442_v51 = vadd.f32 %v2343_v45, %v441_v49 }
 0x7d5   :  { %v446_v53 = vsel %vm445_vm6, %v2343_v45, %v442_v51 }
 0x7d6   :  { %v451_v54 = vsel %vm448_vm7, %v450_v52, %v446_v53 }
 0x7d7   :  { %v453_v55 = vsel %vm2834_vm4, %v2345_v10, %v451_v54 }
 0x7d8   :  { %459 = vrot.lane.b32.xlu0 %v453_v55, %s2707_s21  ;;  %v457_v59 = vmul.f32 %v455_v58, %v453_v55 }
 0x84a   :  { %v460_v56 = vpop.permute.xlu0 %459 }
 0x84b   :  { %v462_v57 = vmul.f32 %v460_v56, %v453_v55 }
 0x84d   :  { %464 = vrot.lane.b32.xlu1 %v462_v57, %s2708_s2 }
 0x8bf   :  { %v465_v60 = vpop.permute.xlu1 %464 }
 0x8c0   :  { %v467_v61 = vadd.f32 %v465_v60, %v457_v59 }
 0x8c2   :  { %2346 = vtanh.f32 %v467_v61  ;;  %v528_v30 = vrot.slane %v467_v61, 6 }
 0x8c8   :  { %v2347_v62 = vpop.eup %2346 }
 0x8c9   :  { %470 = vrot.lane.b32.xlu2 %v2347_v62, %s2707_s21 }
 0x923   :  { %v471_v63 = vpop.permute.xlu2 %470 }
 0x924   :  { %v2874_v0 = vmul.f32 %v471_v63, %v453_v55 }
 0x926   :  { %v480_v1 = vrot.slane %v2874_v0, 6 }
 0x928   :  { %481 = vrot.lane.b32.xlu0 %v480_v1, %s2708_s2 }
 0x99a   :  { %v482_v5 = vpop.permute.xlu0 %481 }
 0x99b   :  { %2245 = vmatmul.msk.f32.vlgmr.msrb.gmra.mxu2 %vm186_vm9, %v482_v5 }
 0x99c   :  { %1269 = vmatpush.msrb.mxu2 %v2899_v40 }
 0x99e   :  { %1270 = vmatpush.msrb.mxu2 %v2901_v41 }
 0x9a0   :  { %1271 = vmatpush.msrb.mxu2 %v2905_v42 }
 0x9a3   :  { %2254 = vmatmul.msk.f32.vlgmr.msra.gmra.mxu2 %vm152_vm0, %v2820_v4  ;;  %v2911_v4 = vld [vmem:[#allocation6 + $0x20] sm:$0xff] }
 0x9a4   :  { %825 = vmatpush.msra.mxu3 %v2911_v4  ;;  %898 = vmatpush.msra.mxu0 %v2911_v4 }
 0x9a5   :  { %974 = vmatpush.msrb.mxu1 %v2911_v4  ;;  %1272 = vmatpush.msrb.mxu2 %v2911_v4 }
 0x9ab   :  { %2255 = vmatmul.msk.f32.gmra.mxu2 %vm152_vm0, %v145_v3 }
 0xa1e   :  { %v502_v11 = vpop.f32.mrf.mxu2 }
 0xa1f   :  { %v505_v12 = vadd.f32 %v502_v11, %v2884_v9 }
 0xa21   :  { %v2246_v13 = vmul.f32 -1.442695, %v505_v12 }
 0xa23   :  { %2348 = vpow2.f32 %v2246_v13 }
 0xa26   :  { %v799_v45 = vpop.f32.mrf.mxu2 }
 0xa27   :  { %v2937_v46 = vadd.f32 %v2310_v44, %v799_v45 }
 0xa29   :  { %v2349_v14 = vpop.eup %2348 }
 0xa2a   :  { %v510_v15 = vadd.f32 1.0, %v2349_v14 }
 0xa2c   :  { %2350 = vrcp.f32 %v510_v15  ;;  %v522_v19 = vand.u32 2147483648, %v510_v15  ;;  %v520_v21 = vand.u32 2147483647, %v510_v15  ;;  %vm516_vm11 = vweird.f32 %v510_v15 }
 0xa2d   :  { %2352 = vtanh.f32 %v505_v12 }
 0xa2e   :  { %v523_v8 = vor.u32 1.1754944e-38, %v522_v19  ;;  %vm521_vm13 = vcmp.eq.f32.partialorder %v520_v21, 8.507059e+37  ;;  %v802_v50 = vpop.f32.mrf.mxu2 }
 0xa2f   :  { %v2940_v52 = vadd.f32 %v2310_v44, %v802_v50 }
 0xa32   :  { %v2351_v16 = vpop.eup %2350 }
 0xa33   :  { %v512_v17 = vmul.f32 %v2351_v16, %v510_v15  ;;  %vm517_vm10 = vweird.f32 %v2351_v16  ;;  %v2353_v25 = vpop.eup %2352 }
 0xa34   :  { %vm518_vm12 = vmor %vm516_vm11, %vm517_vm10 }
 0xa35   :  { %v513_v18 = vsub.f32 1.0, %v512_v17 }
 0xa37   :  { %v514_v20 = vmul.f32 %v2351_v16, %v513_v18 }
 0xa39   :  { %v515_v22 = vadd.f32 %v2351_v16, %v514_v20 }
 0xa3b   :  { %v519_v23 = vsel %vm518_vm12, %v2351_v16, %v515_v22 }
 0xa3c   :  { %v524_v26 = vsel %vm521_vm13, %v523_v8, %v519_v23 }
 0xa3d   :  { %v526_v27 = vsel %vm2834_vm4, %v2353_v25, %v524_v26 }
 0xa3e   :  { %532 = vrot.lane.b32.xlu1 %v526_v27, %s2707_s21  ;;  %v530_v31 = vmul.f32 %v528_v30, %v526_v27 }
 0xab0   :  { %v533_v28 = vpop.permute.xlu1 %532 }
 0xab1   :  { %v535_v29 = vmul.f32 %v533_v28, %v526_v27 }
 0xab3   :  { %537 = vrot.lane.b32.xlu2 %v535_v29, %s2708_s2 }
 0xb0d   :  { %v538_v32 = vpop.permute.xlu2 %537 }
 0xb0e   :  { %v2891_v33 = vadd.f32 %v538_v32, %v530_v31 }
 0xb10   :  { %2354 = vtanh.f32 %v2891_v33  ;;  %v600_v31 = vrot.slane %v2891_v33, 6 }
 0xb16   :  { %v2355_v34 = vpop.eup %2354 }
 0xb17   :  { %543 = vrot.lane.b32.xlu0 %v2355_v34, %s2707_s21 }
 0xb89   :  { %v544_v38 = vpop.permute.xlu0 %543 }
 0xb8a   :  { %v546_v39 = vmul.f32 %v544_v38, %v526_v27 }
 0xb8c   :  { %548 = vrot.lane.b32.xlu1 %v546_v39, %s2708_s2 }
 0xbfe   :  { %v549_v43 = vpop.permute.xlu1 %548 }
 0xbff   :  { %551 = vst.msk [vmem:[#allocation2 + $0x8] sm:$0x3] %vm253_vm8, %v549_v43  ;;  %2247 = vmatmul.msk.f32.vlgmr.msrb.gmra.mxu3 %vm186_vm9, %v549_v43 }
 0xc00   :  { %1047 = vmatpush.msrb.mxu3 %v2899_v40 }
 0xc02   :  { %1048 = vmatpush.msrb.mxu3 %v2901_v41 }
 0xc04   :  { %1049 = vmatpush.msrb.mxu3 %v2905_v42 }
 0xc06   :  { %1050 = vmatpush.msrb.mxu3 %v2911_v4 }
 0xc07   :  { %826 = vmatmul.f32.vlgmr.msra.gmra.mxu3 %v2706_v7 }
 0xc08   :  { %1344 = vmatpush.msra.mxu3 %v2899_v40 }
 0xc0a   :  { %1345 = vmatpush.msra.mxu3 %v2901_v41 }
 0xc0c   :  { %1346 = vmatpush.msra.mxu3 %v2905_v42 }
 0xc0e   :  { %1347 = vmatpush.msra.mxu3 %v2911_v4 }
 0xc82   :  { %v571_v47 = vpop.f32.mrf.mxu3 }
 0xc83   :  { %v575_v48 = vrot.slane %v571_v47, 6 }
 0xc85   :  { %v577_v49 = vadd.f32 %v575_v48, %v2884_v9 }
 0xc87   :  { %v2248_v51 = vmul.f32 -1.442695, %v577_v49 }
 0xc89   :  { %2356 = vpow2.f32 %v2248_v51 }
 0xc8a   :  { %v827_v53 = vpop.f32.mrf.mxu3 }
 0xc8b   :  { %v831_v10 = vrot.slane %v827_v53, 2 }
 0xc8d   :  { %v833_v54 = vadd.f32 %v831_v10, %v2940_v52 }
 0xc8f   :  { %v2357_v55 = vpop.eup %2356  ;;  %v2256_v56 = vmul.f32 -1.442695, %v833_v54 }
 0xc90   :  { %v582_v57 = vadd.f32 1.0, %v2357_v55 }
 0xc91   :  { %2358 = vpow2.f32 %v2256_v56 }
 0xc92   :  { %2360 = vrcp.f32 %v582_v57  ;;  %v594_v63 = vand.u32 2147483648, %v582_v57  ;;  %v592_v3 = vand.u32 2147483647, %v582_v57  ;;  %vm588_vm8 = vweird.f32 %v582_v57 }
 0xc94   :  { %v595_v11 = vor.u32 1.1754944e-38, %v594_v63  ;;  %vm593_vm15 = vcmp.eq.f32.partialorder %v592_v3, 8.507059e+37 }
 0xc97   :  { %v2359_v58 = vpop.eup %2358 }
 0xc98   :  { %v2361_v59 = vpop.eup %2360  ;;  %v838_v60 = vadd.f32 1.0, %v2359_v58 }
 0xc99   :  { %v584_v61 = vmul.f32 %v2361_v59, %v582_v57  ;;  %vm589_vm0 = vweird.f32 %v2361_v59 }
 0xc9a   :  { %2362 = vrcp.f32 %v838_v60  ;;  %vm590_vm14 = vmor %vm588_vm8, %vm589_vm0  ;;  %v850_v18 = vand.u32 2147483648, %v838_v60  ;;  %v848_v20 = vand.u32 2147483647, %v838_v60  ;;  %vm844_vm2 = vweird.f32 %v838_v60 }
 0xc9b   :  { %v585_v62 = vsub.f32 1.0, %v584_v61  ;;  %2364 = vtanh.f32 %v577_v49 }
 0xc9c   :  { %2366 = vtanh.f32 %v833_v54  ;;  %v851_v22 = vor.u32 1.1754944e-38, %v850_v18  ;;  %vm849_vm5 = vcmp.eq.f32.partialorder %v848_v20, 8.507059e+37 }
 0xc9d   :  { %v586_v1 = vmul.f32 %v2361_v59, %v585_v62 }
 0xc9f   :  { %v587_v5 = vadd.f32 %v2361_v59, %v586_v1 }
 0xca0   :  { %v2363_v6 = vpop.eup %2362 }
 0xca1   :  { %v591_v12 = vsel %vm590_vm14, %v2361_v59, %v587_v5  ;;  %v840_v13 = vmul.f32 %v2363_v6, %v838_v60  ;;  %v2365_v14 = vpop.eup %2364  ;;  %vm845_vm1 = vweird.f32 %v2363_v6 }
 0xca2   :  { %v596_v15 = vsel %vm593_vm15, %v595_v11, %v591_v12  ;;  %vm846_vm3 = vmor %vm844_vm2, %vm845_vm1  ;;  %v2367_v23 = vpop.eup %2366 }
 0xca3   :  { %v598_v16 = vsel %vm2834_vm4, %v2365_v14, %v596_v15  ;;  %v841_v17 = vsub.f32 1.0, %v840_v13 }
 0xca4   :  { %604 = vrot.lane.b32.xlu2 %v598_v16, %s2707_s21  ;;  %v602_v32 = vmul.f32 %v600_v31, %v598_v16 }
 0xca5   :  { %v842_v19 = vmul.f32 %v2363_v6, %v841_v17 }
 0xca7   :  { %v843_v21 = vadd.f32 %v2363_v6, %v842_v19 }
 0xca9   :  { %v847_v8 = vsel %vm846_vm3, %v2363_v6, %v843_v21 }
 0xcaa   :  { %v852_v25 = vsel %vm849_vm5, %v851_v22, %v847_v8 }
 0xcab   :  { %v854_v26 = vsel %vm2834_vm4, %v2367_v23, %v852_v25 }
 0xcac   :  { %857 = vrot.lane.b32.xlu0 %v854_v26, %s2707_s21  ;;  %v855_v37 = vmul.f32 0.0, %v854_v26 }
 0xcfe   :  { %v605_v27 = vpop.permute.xlu2 %604 }
 0xcff   :  { %v607_v28 = vmul.f32 %v605_v27, %v598_v16 }
 0xd01   :  { %609 = vrot.lane.b32.xlu1 %v607_v28, %s2708_s2 }
 0xd1e   :  { %v858_v29 = vpop.permute.xlu0 %857 }
 0xd1f   :  { %v860_v30 = vmul.f32 %v858_v29, %v854_v26 }
 0xd21   :  { %862 = vrot.lane.b32.xlu2 %v860_v30, %s2708_s2 }
 0xd73   :  { %v610_v34 = vpop.permute.xlu1 %609 }
 0xd74   :  { %v2952_v35 = vadd.f32 %v610_v34, %v602_v32 }
 0xd76   :  { %2368 = vtanh.f32 %v2952_v35 }
 0xd7b   :  { %v863_v38 = vpop.permute.xlu2 %862 }
 0xd7c   :  { %v2369_v39 = vpop.eup %2368  ;;  %v2955_v43 = vadd.f32 %v863_v38, %v855_v37 }
 0xd7d   :  { %615 = vrot.lane.b32.xlu0 %v2369_v39, %s2707_s21  ;;  %v675_v39 = vrot.slane %v2952_v35, 6 }
 0xd7e   :  { %2370 = vtanh.f32 %v2955_v43 }
 0xd84   :  { %v2371_v44 = vpop.eup %2370 }
 0xd85   :  { %868 = vrot.lane.b32.xlu1 %v2371_v44, %s2707_s21 }
 0xdef   :  { %v616_v45 = vpop.permute.xlu0 %615 }
 0xdf0   :  { %v2960_v33 = vmul.f32 %v616_v45, %v598_v16 }
 0xdf2   :  { %v624_v47 = vrot.slane %v2960_v33, 2 }
 0xdf4   :  { %625 = vrot.lane.b32.xlu2 %v624_v47, %s2708_s2 }
 0xdf7   :  { %v869_v48 = vpop.permute.xlu1 %868 }
 0xdf8   :  { %v2964_v49 = vmul.f32 %v869_v48, %v854_v26  ;;  %v929_v48 = vrot.slane %v2955_v43, 2 }
 0xdfa   :  { %v878_v50 = vrot.slane %v2964_v49, 6 }
 0xdfc   :  { %879 = vrot.lane.b32.xlu0 %v878_v50, %s2708_s2 }
 0xe4e   :  { %v626_v51 = vpop.permute.xlu2 %625 }
 0xe4f   :  { %2249 = vmatmul.msk.f32.vlgmr.msrb.gmra.mxu0 %vm186_vm9, %v626_v51 }
 0xe50   :  { %1119 = vmatpush.msrb.mxu0 %v2899_v40 }
 0xe52   :  { %1120 = vmatpush.msrb.mxu0 %v2901_v41 }
 0xe54   :  { %1121 = vmatpush.msrb.mxu0 %v2905_v42 }
 0xe56   :  { %1122 = vmatpush.msrb.mxu0 %v2911_v4 }
 0xe6e   :  { %v880_v53 = vpop.permute.xlu0 %879 }
 0xe6f   :  { %2257 = vmatmul.msk.f32.vlgmr.msra.gmra.mxu0 %vm186_vm9, %v880_v53 }
 0xecc   :  { %v646_v10 = vpop.f32.mrf.mxu0 }
 0xecd   :  { %v650_v54 = vrot.slane %v646_v10, 4 }
 0xecf   :  { %v652_v55 = vadd.f32 %v650_v54, %v2884_v9 }
 0xed1   :  { %v2250_v56 = vmul.f32 -1.442695, %v652_v55 }
 0xed3   :  { %2372 = vpow2.f32 %v2250_v56 }
 0xed9   :  { %v2373_v57 = vpop.eup %2372 }
 0xeda   :  { %v657_v58 = vadd.f32 1.0, %v2373_v57 }
 0xedc   :  { %2374 = vrcp.f32 %v657_v58  ;;  %v669_v62 = vand.u32 2147483648, %v657_v58  ;;  %v667_v1 = vand.u32 2147483647, %v657_v58  ;;  %vm663_vm7 = vweird.f32 %v657_v58 }
 0xedd   :  { %2376 = vtanh.f32 %v652_v55 }
 0xede   :  { %v670_v5 = vor.u32 1.1754944e-38, %v669_v62  ;;  %vm668_vm11 = vcmp.eq.f32.partialorder %v667_v1, 8.507059e+37 }
 0xee2   :  { %v2375_v59 = vpop.eup %2374 }
 0xee3   :  { %v659_v60 = vmul.f32 %v2375_v59, %v657_v58  ;;  %vm664_vm6 = vweird.f32 %v2375_v59  ;;  %v2377_v11 = vpop.eup %2376 }
 0xee4   :  { %vm665_vm10 = vmor %vm663_vm7, %vm664_vm6 }
 0xee5   :  { %v660_v61 = vsub.f32 1.0, %v659_v60 }
 0xee7   :  { %v661_v63 = vmul.f32 %v2375_v59, %v660_v61 }
 0xee9   :  { %v662_v3 = vadd.f32 %v2375_v59, %v661_v63 }
 0xeeb   :  { %v666_v6 = vsel %vm665_vm10, %v2375_v59, %v662_v3 }
 0xeec   :  { %v900_v12 = vpop.f32.mrf.mxu0  ;;  %v671_v13 = vsel %vm668_vm11, %v670_v5, %v666_v6 }
 0xeed   :  { %v904_v14 = vrot.slane %v900_v12, 4  ;;  %v673_v15 = vsel %vm2834_vm4, %v2377_v11, %v671_v13 }
 0xeee   :  { %679 = vrot.lane.b32.xlu1 %v673_v15, %s2707_s21  ;;  %v677_v44 = vmul.f32 %v675_v39, %v673_v15 }
 0xeef   :  { %v906_v16 = vadd.f32 %v904_v14, %v2940_v52 }
 0xef1   :  { %v2258_v17 = vmul.f32 -1.442695, %v906_v16 }
 0xef3   :  { %2378 = vpow2.f32 %v2258_v17 }
 0xef9   :  { %v2379_v18 = vpop.eup %2378 }
 0xefa   :  { %v911_v19 = vadd.f32 1.0, %v2379_v18 }
 0xefc   :  { %2380 = vrcp.f32 %v911_v19  ;;  %v923_v8 = vand.u32 2147483648, %v911_v19  ;;  %v921_v25 = vand.u32 2147483647, %v911_v19  ;;  %vm917_vm13 = vweird.f32 %v911_v19 }
 0xefd   :  { %2382 = vtanh.f32 %v906_v16 }
 0xefe   :  { %v924_v27 = vor.u32 1.1754944e-38, %v923_v8  ;;  %vm922_vm8 = vcmp.eq.f32.partialorder %v921_v25, 8.507059e+37 }
 0xf02   :  { %v2381_v20 = vpop.eup %2380 }
 0xf03   :  { %v913_v21 = vmul.f32 %v2381_v20, %v911_v19  ;;  %vm918_vm12 = vweird.f32 %v2381_v20  ;;  %v2383_v29 = vpop.eup %2382 }
 0xf04   :  { %vm919_vm0 = vmor %vm917_vm13, %vm918_vm12 }
 0xf05   :  { %v914_v22 = vsub.f32 1.0, %v913_v21 }
 0xf07   :  { %v915_v23 = vmul.f32 %v2381_v20, %v914_v22 }
 0xf09   :  { %v916_v26 = vadd.f32 %v2381_v20, %v915_v23 }
 0xf0b   :  { %v920_v28 = vsel %vm919_vm0, %v2381_v20, %v916_v26 }
 0xf0c   :  { %v925_v30 = vsel %vm922_vm8, %v924_v27, %v920_v28 }
 0xf0d   :  { %v927_v31 = vsel %vm2834_vm4, %v2383_v29, %v925_v30 }
 0xf0e   :  { %933 = vrot.lane.b32.xlu2 %v927_v31, %s2707_s21  ;;  %v931_v50 = vmul.f32 %v929_v48, %v927_v31 }
 0xf60   :  { %v680_v32 = vpop.permute.xlu1 %679 }
 0xf61   :  { %v682_v34 = vmul.f32 %v680_v32, %v673_v15 }
 0xf63   :  { %684 = vrot.lane.b32.xlu0 %v682_v34, %s2708_s2 }
 0xf68   :  { %v934_v37 = vpop.permute.xlu2 %933 }
 0xf69   :  { %v936_v38 = vmul.f32 %v934_v37, %v927_v31 }
 0xf6b   :  { %938 = vrot.lane.b32.xlu1 %v936_v38, %s2708_s2 }
 0xfd5   :  { %v685_v45 = vpop.permute.xlu0 %684 }
 0xfd6   :  { %v2985_v47 = vadd.f32 %v685_v45, %v677_v44 }
 0xfd8   :  { %2384 = vtanh.f32 %v2985_v47 }
 0xfdd   :  { %v939_v51 = vpop.permute.xlu1 %938 }
 0xfde   :  { %v2385_v53 = vpop.eup %2384  ;;  %v941_v10 = vadd.f32 %v939_v51, %v931_v50 }
 0xfdf   :  { %690 = vrot.lane.b32.xlu2 %v2385_v53, %s2707_s21 }
 0xfe0   :  { %2386 = vtanh.f32 %v941_v10  ;;  %v1005_v21 = vrot.slane %v941_v10, 2 }
 0xfe6   :  { %v2387_v54 = vpop.eup %2386 }
 0xfe7   :  { %944 = vrot.lane.b32.xlu0 %v2387_v54, %s2707_s21 }
0x1039   :  { %v691_v55 = vpop.permute.xlu2 %690 }
0x103a   :  { %v2991_v35 = vmul.f32 %v691_v55, %v673_v15 }
0x103c   :  { %v699_v56 = vrot.slane %v2991_v35, 4 }
0x103e   :  { %700 = vrot.lane.b32.xlu1 %v699_v56, %s2708_s2 }
0x1059   :  { %v945_v57 = vpop.permute.xlu0 %944 }
0x105a   :  { %v2995_v58 = vmul.f32 %v945_v57, %v927_v31 }
0x105c   :  { %v954_v43 = vrot.slane %v2995_v58, 4 }
0x105e   :  { %955 = vrot.lane.b32.xlu2 %v954_v43, %s2708_s2 }
0x10b0   :  { %v701_v59 = vpop.permute.xlu1 %700 }
0x10b1   :  { %2251 = vmatmul.msk.f32.vlgmr.msra.gmra.mxu1 %vm186_vm9, %v701_v59 }
0x10b2   :  { %1194 = vmatpush.msra.mxu1 %v2899_v40 }
0x10b4   :  { %1195 = vmatpush.msra.mxu1 %v2901_v41 }
0x10b6   :  { %1196 = vmatpush.msra.mxu1 %v2905_v42 }
0x10b8   :  { %v956_v60 = vpop.permute.xlu2 %955  ;;  %1197 = vmatpush.msra.mxu1 %v2911_v4 }
0x10b9   :  { %2259 = vmatmul.msk.f32.vlgmr.msrb.gmra.mxu1 %vm186_vm9, %v956_v60 }
0x112e   :  { %v3005_v61 = vpop.f32.mrf.mxu1 }
0x1136   :  { %v976_v62 = vpop.f32.mrf.mxu1 }
0x1137   :  { %v980_v63 = vrot.slane %v976_v62, 6 }
0x1139   :  { %v982_v1 = vadd.f32 %v980_v63, %v2940_v52 }
0x113b   :  { %v2260_v3 = vmul.f32 -1.442695, %v982_v1 }
0x113d   :  { %2388 = vpow2.f32 %v2260_v3 }
0x1143   :  { %v2389_v5 = vpop.eup %2388 }
0x1144   :  { %v987_v6 = vadd.f32 1.0, %v2389_v5 }
0x1146   :  { %2390 = vrcp.f32 %v987_v6  ;;  %v999_v42 = vand.u32 2147483648, %v987_v6  ;;  %v997_v4 = vand.u32 2147483647, %v987_v6  ;;  %vm993_vm15 = vweird.f32 %v987_v6 }
0x1147   :  { %2392 = vtanh.f32 %v982_v1 }
0x1148   :  { %v1000_v14 = vor.u32 1.1754944e-38, %v999_v42  ;;  %vm998_vm2 = vcmp.eq.f32.partialorder %v997_v4, 8.507059e+37 }
0x114c   :  { %v2391_v40 = vpop.eup %2390 }
0x114d   :  { %v989_v41 = vmul.f32 %v2391_v40, %v987_v6  ;;  %vm994_vm14 = vweird.f32 %v2391_v40  ;;  %v2393_v16 = vpop.eup %2392 }
0x114e   :  { %vm995_vm1 = vmor %vm993_vm15, %vm994_vm14 }
0x114f   :  { %v990_v11 = vsub.f32 1.0, %v989_v41 }
0x1151   :  { %v991_v12 = vmul.f32 %v2391_v40, %v990_v11 }
0x1153   :  { %v992_v13 = vadd.f32 %v2391_v40, %v991_v12 }
0x1155   :  { %v996_v15 = vsel %vm995_vm1, %v2391_v40, %v992_v13 }
0x1156   :  { %v1001_v17 = vsel %vm998_vm2, %v1000_v14, %v996_v15 }
0x1157   :  { %v1003_v18 = vsel %vm2834_vm4, %v2393_v16, %v1001_v17 }
0x1158   :  { %1009 = vrot.lane.b32.xlu0 %v1003_v18, %s2707_s21  ;;  %v1007_v22 = vmul.f32 %v1005_v21, %v1003_v18 }
0x11ca   :  { %v1010_v19 = vpop.permute.xlu0 %1009 }
0x11cb   :  { %v1012_v20 = vmul.f32 %v1010_v19, %v1003_v18 }
0x11cd   :  { %1014 = vrot.lane.b32.xlu1 %v1012_v20, %s2708_s2 }
0x123f   :  { %v1015_v8 = vpop.permute.xlu1 %1014 }
0x1240   :  { %v1017_v23 = vadd.f32 %v1015_v8, %v1007_v22 }
0x1242   :  { %2394 = vtanh.f32 %v1017_v23  ;;  %v1078_v43 = vrot.slane %v1017_v23, 2 }
0x1248   :  { %v2395_v25 = vpop.eup %2394 }
0x1249   :  { %1020 = vrot.lane.b32.xlu2 %v2395_v25, %s2707_s21 }
0x12a3   :  { %v1021_v26 = vpop.permute.xlu2 %1020 }
0x12a4   :  { %v3013_v27 = vmul.f32 %v1021_v26, %v1003_v18 }
0x12a6   :  { %v1030_v28 = vrot.slane %v3013_v27, 2 }
0x12a8   :  { %1031 = vrot.lane.b32.xlu0 %v1030_v28, %s2708_s2 }
0x131a   :  { %v1032_v29 = vpop.permute.xlu0 %1031 }
0x131b   :  { %2261 = vmatmul.msk.f32.vlgmr.msrb.gmra.mxu3 %vm186_vm9, %v1032_v29 }
0x139e   :  { %v1052_v30 = vpop.f32.mrf.mxu3 }
0x139f   :  { %v1055_v31 = vadd.f32 %v1052_v30, %v2940_v52 }
0x13a1   :  { %v2262_v32 = vmul.f32 -1.442695, %v1055_v31 }
0x13a3   :  { %2396 = vpow2.f32 %v2262_v32 }
0x13a9   :  { %v2397_v34 = vpop.eup %2396 }
0x13aa   :  { %v1060_v37 = vadd.f32 1.0, %v2397_v34 }
0x13ac   :  { %2398 = vrcp.f32 %v1060_v37  ;;  %v1072_v45 = vand.u32 2147483648, %v1060_v37  ;;  %v1070_v50 = vand.u32 2147483647, %v1060_v37  ;;  %vm1066_vm5 = vweird.f32 %v1060_v37 }
0x13ad   :  { %2400 = vtanh.f32 %v1055_v31 }
0x13ae   :  { %v1073_v53 = vor.u32 1.1754944e-38, %v1072_v45  ;;  %vm1071_vm7 = vcmp.eq.f32.partialorder %v1070_v50, 8.507059e+37 }
0x13b2   :  { %v2399_v38 = vpop.eup %2398 }
0x13b3   :  { %v1062_v39 = vmul.f32 %v2399_v38, %v1060_v37  ;;  %vm1067_vm3 = vweird.f32 %v2399_v38  ;;  %v2401_v52 = vpop.eup %2400 }
0x13b4   :  { %vm1068_vm6 = vmor %vm1066_vm5, %vm1067_vm3 }
0x13b5   :  { %v1063_v44 = vsub.f32 1.0, %v1062_v39 }
0x13b7   :  { %v1064_v48 = vmul.f32 %v2399_v38, %v1063_v44 }
0x13b9   :  { %v1065_v51 = vadd.f32 %v2399_v38, %v1064_v48 }
0x13bb   :  { %v1069_v10 = vsel %vm1068_vm6, %v2399_v38, %v1065_v51 }
0x13bc   :  { %v1074_v54 = vsel %vm1071_vm7, %v1073_v53, %v1069_v10 }
0x13bd   :  { %v1076_v55 = vsel %vm2834_vm4, %v2401_v52, %v1074_v54 }
0x13be   :  { %1082 = vrot.lane.b32.xlu1 %v1076_v55, %s2707_s21  ;;  %v1080_v59 = vmul.f32 %v1078_v43, %v1076_v55 }
0x1430   :  { %v1083_v56 = vpop.permute.xlu1 %1082 }
0x1431   :  { %v1085_v57 = vmul.f32 %v1083_v56, %v1076_v55 }
0x1433   :  { %1087 = vrot.lane.b32.xlu2 %v1085_v57, %s2708_s2 }
0x148d   :  { %v1088_v60 = vpop.permute.xlu2 %1087 }
0x148e   :  { %v1090_v62 = vadd.f32 %v1088_v60, %v1080_v59 }
0x1490   :  { %2402 = vtanh.f32 %v1090_v62  ;;  %v1153_v26 = vrot.slane %v1090_v62, 2 }
0x1496   :  { %v2403_v63 = vpop.eup %2402 }
0x1497   :  { %1093 = vrot.lane.b32.xlu0 %v2403_v63, %s2707_s21 }
0x1509   :  { %v1094_v1 = vpop.permute.xlu0 %1093 }
0x150a   :  { %v3024_v3 = vmul.f32 %v1094_v1, %v1076_v55 }
0x150c   :  { %1103 = vrot.lane.b32.xlu1 %v3024_v3, %s2708_s2 }
0x157e   :  { %v1104_v5 = vpop.permute.xlu1 %1103 }
0x157f   :  { %2263 = vmatmul.msk.f32.vlgmr.msrb.gmra.mxu0 %vm186_vm9, %v1104_v5 }
0x15fc   :  { %v1124_v6 = vpop.f32.mrf.mxu0 }
0x15fd   :  { %v1128_v40 = vrot.slane %v1124_v6, 2 }
0x15ff   :  { %v1130_v41 = vadd.f32 %v1128_v40, %v2937_v46 }
0x1601   :  { %v2264_v11 = vmul.f32 -1.442695, %v1130_v41 }
0x1603   :  { %2404 = vpow2.f32 %v2264_v11 }
0x1609   :  { %v2405_v42 = vpop.eup %2404 }
0x160a   :  { %v1135_v12 = vadd.f32 1.0, %v2405_v42 }
0x160c   :  { %2406 = vrcp.f32 %v1135_v12  ;;  %v1147_v15 = vand.u32 2147483648, %v1135_v12  ;;  %v1145_v17 = vand.u32 2147483647, %v1135_v12  ;;  %vm1141_vm11 = vweird.f32 %v1135_v12 }
0x160d   :  { %2408 = vtanh.f32 %v1130_v41 }
0x160e   :  { %v1148_v19 = vor.u32 1.1754944e-38, %v1147_v15  ;;  %vm1146_vm13 = vcmp.eq.f32.partialorder %v1145_v17, 8.507059e+37 }
0x1612   :  { %v2407_v4 = vpop.eup %2406 }
0x1613   :  { %v1137_v13 = vmul.f32 %v2407_v4, %v1135_v12  ;;  %vm1142_vm10 = vweird.f32 %v2407_v4  ;;  %v2409_v21 = vpop.eup %2408 }
0x1614   :  { %vm1143_vm12 = vmor %vm1141_vm11, %vm1142_vm10 }
0x1615   :  { %v1138_v14 = vsub.f32 1.0, %v1137_v13 }
0x1617   :  { %v1139_v16 = vmul.f32 %v2407_v4, %v1138_v14 }
0x1619   :  { %v1140_v18 = vadd.f32 %v2407_v4, %v1139_v16 }
0x161b   :  { %v1144_v20 = vsel %vm1143_vm12, %v2407_v4, %v1140_v18  ;;  %vm326_vm12 = vcmask 257026  }
0x161c   :  { %v1149_v22 = vsel %vm1146_vm13, %v1148_v19, %v1144_v20  ;;  %vm402_vm13 = vcmask 259076  }
0x161d   :  { %v1151_v8 = vsel %vm2834_vm4, %v2409_v21, %v1149_v22 }
0x161e   :  { %1157 = vrot.lane.b32.xlu2 %v1151_v8, %s2707_s21  ;;  %v1155_v28 = vmul.f32 %v1153_v26, %v1151_v8 }
0x1678   :  { %v1158_v23 = vpop.permute.xlu2 %1157 }
0x1679   :  { %v1160_v25 = vmul.f32 %v1158_v23, %v1151_v8 }
0x167b   :  { %1162 = vrot.lane.b32.xlu0 %v1160_v25, %s2708_s2 }
0x16ed   :  { %v1163_v29 = vpop.permute.xlu0 %1162 }
0x16ee   :  { %v1165_v30 = vadd.f32 %v1163_v29, %v1155_v28 }
0x16f0   :  { %2410 = vtanh.f32 %v1165_v30  ;;  %v1228_v6 = vrot.slane %v1165_v30, 2 }
0x16f6   :  { %v2411_v31 = vpop.eup %2410 }
0x16f7   :  { %1168 = vrot.lane.b32.xlu1 %v2411_v31, %s2707_s21 }
0x1769   :  { %v1169_v32 = vpop.permute.xlu1 %1168 }
0x176a   :  { %v3035_v34 = vmul.f32 %v1169_v32, %v1151_v8 }
0x176c   :  { %v1177_v37 = vrot.slane %v3035_v34, 6 }
0x176e   :  { %1178 = vrot.lane.b32.xlu2 %v1177_v37, %s2708_s2 }
0x17c8   :  { %v1179_v38 = vpop.permute.xlu2 %1178 }
0x17c9   :  { %2265 = vmatmul.msk.f32.vlgmr.msra.gmra.mxu1 %vm186_vm9, %v1179_v38 }
0x1846   :  { %v1199_v39 = vpop.f32.mrf.mxu1 }
0x1847   :  { %v1203_v44 = vrot.slane %v1199_v39, 4 }
0x1849   :  { %v1205_v45 = vadd.f32 %v1203_v44, %v2937_v46 }
0x184b   :  { %v2266_v48 = vmul.f32 -1.442695, %v1205_v45 }
0x184d   :  { %2412 = vpow2.f32 %v2266_v48 }
0x1853   :  { %v2413_v50 = vpop.eup %2412 }
0x1854   :  { %v1210_v51 = vadd.f32 1.0, %v2413_v50 }
0x1856   :  { %2414 = vrcp.f32 %v1210_v51  ;;  %v1222_v54 = vand.u32 2147483648, %v1210_v51  ;;  %v1220_v56 = vand.u32 2147483647, %v1210_v51  ;;  %vm1216_vm8 = vweird.f32 %v1210_v51 }
0x1857   :  { %2416 = vtanh.f32 %v1205_v45 }
0x1858   :  { %v1223_v43 = vor.u32 1.1754944e-38, %v1222_v54  ;;  %vm1221_vm15 = vcmp.eq.f32.partialorder %v1220_v56, 8.507059e+37 }
0x185c   :  { %v2415_v53 = vpop.eup %2414 }
0x185d   :  { %v1212_v10 = vmul.f32 %v2415_v53, %v1210_v51  ;;  %vm1217_vm0 = vweird.f32 %v2415_v53  ;;  %v2417_v60 = vpop.eup %2416 }
0x185e   :  { %vm1218_vm14 = vmor %vm1216_vm8, %vm1217_vm0  ;;  %vm952_vm0 = vcmask 521476   ;;  %vm478_vm8 = vcmask 261126  }
0x185f   :  { %v1213_v52 = vsub.f32 1.0, %v1212_v10 }
0x1861   :  { %v1214_v55 = vmul.f32 %v2415_v53, %v1213_v52 }
0x1863   :  { %v1215_v57 = vadd.f32 %v2415_v53, %v1214_v55 }
0x1865   :  { %v1219_v59 = vsel %vm1218_vm14, %v2415_v53, %v1215_v57  ;;  %vm876_vm14 = vcmask 523526  }
0x1866   :  { %v1224_v62 = vsel %vm1221_vm15, %v1223_v43, %v1219_v59  ;;  %vm1028_vm15 = vcmask 519426  }
0x1867   :  { %v1226_v63 = vsel %vm2834_vm4, %v2417_v60, %v1224_v62 }
0x1868   :  { %1232 = vrot.lane.b32.xlu0 %v1226_v63, %s2707_s21  ;;  %v1230_v40 = vmul.f32 %v1228_v6, %v1226_v63 }
0x18da   :  { %v1233_v1 = vpop.permute.xlu0 %1232 }
0x18db   :  { %v1235_v5 = vmul.f32 %v1233_v1, %v1226_v63 }
0x18dd   :  { %1237 = vrot.lane.b32.xlu1 %v1235_v5, %s2708_s2 }
0x194f   :  { %v1238_v41 = vpop.permute.xlu1 %1237 }
0x1950   :  { %v1240_v11 = vadd.f32 %v1238_v41, %v1230_v40 }
0x1952   :  { %2418 = vtanh.f32 %v1240_v11  ;;  %v1303_v44 = vrot.slane %v1240_v11, 2 }
0x1958   :  { %v2419_v42 = vpop.eup %2418 }
0x1959   :  { %1243 = vrot.lane.b32.xlu2 %v2419_v42, %s2707_s21 }
0x19b3   :  { %v1244_v12 = vpop.permute.xlu2 %1243 }
0x19b4   :  { %v3046_v4 = vmul.f32 %v1244_v12, %v1226_v63 }
0x19b6   :  { %v1252_v13 = vrot.slane %v3046_v4, 4 }
0x19b8   :  { %1253 = vrot.lane.b32.xlu0 %v1252_v13, %s2708_s2 }
0x1a2a   :  { %v1254_v14 = vpop.permute.xlu0 %1253 }
0x1a2b   :  { %2267 = vmatmul.msk.f32.vlgmr.msrb.gmra.mxu2 %vm186_vm9, %v1254_v14 }
0x1aae   :  { %v1274_v15 = vpop.f32.mrf.mxu2 }
0x1aaf   :  { %v1278_v16 = vrot.slane %v1274_v15, 6 }
0x1ab1   :  { %v1280_v17 = vadd.f32 %v1278_v16, %v2937_v46 }
0x1ab3   :  { %v2268_v18 = vmul.f32 -1.442695, %v1280_v17 }
0x1ab5   :  { %2420 = vpow2.f32 %v2268_v18 }
0x1abb   :  { %v2421_v19 = vpop.eup %2420 }
0x1abc   :  { %v1285_v20 = vadd.f32 1.0, %v2421_v19 }
0x1abe   :  { %2422 = vrcp.f32 %v1285_v20  ;;  %v1297_v23 = vand.u32 2147483648, %v1285_v20  ;;  %v1295_v26 = vand.u32 2147483647, %v1285_v20  ;;  %vm1291_vm2 = vweird.f32 %v1285_v20 }
0x1abf   :  { %2424 = vtanh.f32 %v1280_v17 }
0x1ac0   :  { %v1298_v29 = vor.u32 1.1754944e-38, %v1297_v23  ;;  %vm1296_vm5 = vcmp.eq.f32.partialorder %v1295_v26, 8.507059e+37 }
0x1ac4   :  { %v2423_v21 = vpop.eup %2422 }
0x1ac5   :  { %v1287_v22 = vmul.f32 %v2423_v21, %v1285_v20  ;;  %vm1292_vm1 = vweird.f32 %v2423_v21  ;;  %v2425_v31 = vpop.eup %2424 }
0x1ac6   :  { %vm1293_vm3 = vmor %vm1291_vm2, %vm1292_vm1  ;;  %vm1101_vm1 = vcmask 517376   ;;  %vm1413_vm2 = vcmask 523264  }
0x1ac7   :  { %v1288_v8 = vsub.f32 1.0, %v1287_v22  ;;  %v1405_v22 = vld [vmem:[#allocation8 + $0x20] sm:$0xff] }
0x1ac9   :  { %v1289_v25 = vmul.f32 %v2423_v21, %v1288_v8 }
0x1acb   :  { %v1290_v28 = vadd.f32 %v2423_v21, %v1289_v25 }
0x1acd   :  { %v1294_v30 = vsel %vm1293_vm3, %v2423_v21, %v1290_v28  ;;  %v1406_v21 = vld [vmem:[#allocation8 + $0x28] sm:$0xff]  ;;  %v1404_v28 = vld [vmem:[#allocation8 + $0x18] sm:$0xff] }
0x1ace   :  { %v1299_v32 = vsel %vm1296_vm5, %v1298_v29, %v1294_v30  ;;  %v3083_v29 = vld [vmem:[#allocation9 + $0x18] sm:$0xff]  ;;  %v1403_v30 = vld [vmem:[#allocation8 + $0x10] sm:$0xff] }
0x1acf   :  { %v1301_v37 = vsel %vm2834_vm4, %v2425_v31, %v1299_v32  ;;  %1459 = vmatpush.msrb.mxu1 %v3083_v29  ;;  %v3086_v31 = vld [vmem:[#allocation9 + $0x10] sm:$0xff]  ;;  %v1402_v32 = vld [vmem:[#allocation8 + $0x8] sm:$0xff]  ;;  %1523 = vmatpush.msra.mxu2 %v3083_v29 }
0x1ad0   :  { %1307 = vrot.lane.b32.xlu1 %v1301_v37, %s2707_s21  ;;  %v1305_v45 = vmul.f32 %v1303_v44, %v1301_v37  ;;  %1594 = vmatpush.msrb.mxu3 %v3083_v29 }
0x1ad1   :  { %1460 = vmatpush.msrb.mxu1 %v3086_v31  ;;  %1524 = vmatpush.msra.mxu2 %v3086_v31 }
0x1ad2   :  { %1595 = vmatpush.msrb.mxu3 %v3086_v31 }
0x1b42   :  { %v1308_v38 = vpop.permute.xlu1 %1307 }
0x1b43   :  { %v1310_v39 = vmul.f32 %v1308_v38, %v1301_v37  ;;  %v1401_v38 = vld [vmem:[#allocation8] sm:$0xff] }
0x1b45   :  { %1312 = vrot.lane.b32.xlu2 %v1310_v39, %s2708_s2  ;;  %v3098_v39 = vld [vmem:[#allocation9] sm:$0xff] }
0x1b9f   :  { %v1313_v48 = vpop.permute.xlu2 %1312 }
0x1ba0   :  { %v1315_v50 = vadd.f32 %v1313_v48, %v1305_v45  ;;  %v3125_v45 = vld [vmem:[%s3289_s6] ss:$0 sm:$0xff] }
0x1ba2   :  { %2426 = vtanh.f32 %v1315_v50  ;;  %v1375_v16 = vrot.slane %v1315_v50, 2 }
0x1ba8   :  { %v2427_v51 = vpop.eup %2426 }
0x1ba9   :  { %1318 = vrot.lane.b32.xlu0 %v2427_v51, %s2707_s21 }
0x1c1b   :  { %v1319_v53 = vpop.permute.xlu0 %1318 }
0x1c1c   :  { %v1321_v10 = vmul.f32 %v1319_v53, %v1301_v37  ;;  %v3088_v37 = vld [vmem:[#allocation9 + $0x8] sm:$0xff] }
0x1c1d   :  { %1461 = vmatpush.msrb.mxu1 %v3088_v37  ;;  %1525 = vmatpush.msra.mxu2 %v3088_v37 }
0x1c1e   :  { %v1327_v52 = vrot.slane %v1321_v10, 2  ;;  %1596 = vmatpush.msrb.mxu3 %v3088_v37 }
0x1c1f   :  { %1462 = vmatpush.msrb.mxu1 %v3098_v39  ;;  %1526 = vmatpush.msra.mxu2 %v3098_v39 }
0x1c20   :  { %1328 = vrot.lane.b32.xlu1 %v1327_v52, %s2708_s2  ;;  %1463 = vmatmul.f32.vlgmr.msrb.gmra.mxu1 %v2706_v7 }
0x1c21   :  { %1597 = vmatpush.msrb.mxu3 %v3098_v39  ;;  %1665 = vmatpush.msra.mxu1 %v3083_v29 }
0x1c22   :  { %1736 = vmatpush.msrb.mxu2 %v3083_v29 }
0x1c23   :  { %1666 = vmatpush.msra.mxu1 %v3086_v31 }
0x1c24   :  { %1737 = vmatpush.msrb.mxu2 %v3086_v31 }
0x1c25   :  { %1667 = vmatpush.msra.mxu1 %v3088_v37 }
0x1c26   :  { %1738 = vmatpush.msrb.mxu2 %v3088_v37 }
0x1c27   :  { %1668 = vmatpush.msra.mxu1 %v3098_v39 }
0x1c28   :  { %1739 = vmatpush.msrb.mxu2 %v3098_v39 }
0x1c29   :  { %1874 = vmatpush.msrb.mxu1 %v3083_v29 }
0x1c2b   :  { %1875 = vmatpush.msrb.mxu1 %v3086_v31 }
0x1c2d   :  { %1876 = vmatpush.msrb.mxu1 %v3088_v37 }
0x1c2f   :  { %1877 = vmatpush.msrb.mxu1 %v3098_v39 }
0x1c92   :  { %v1329_v54 = vpop.permute.xlu1 %1328 }
0x1c93   :  { %2269 = vmatmul.msk.f32.vlgmr.msra.gmra.mxu3 %vm186_vm9, %v1329_v54 }
0x1c94   :  { %1803 = vmatpush.msra.mxu3 %v3083_v29 }
0x1c96   :  { %1804 = vmatpush.msra.mxu3 %v3086_v31 }
0x1c98   :  { %1805 = vmatpush.msra.mxu3 %v3088_v37 }
0x1c9a   :  { %1806 = vmatpush.msra.mxu3 %v3098_v39 }
0x1c9d   :  { %v1464_v50 = vpop.f32.mrf.mxu1 }
0x1d16   :  { %v1349_v55 = vpop.f32.mrf.mxu3 }
0x1d17   :  { %v1352_v56 = vadd.f32 %v1349_v55, %v2937_v46 }
0x1d19   :  { %v2270_v57 = vmul.f32 -1.442695, %v1352_v56 }
0x1d1b   :  { %2428 = vpow2.f32 %v2270_v57 }
0x1d21   :  { %v2429_v43 = vpop.eup %2428 }
0x1d22   :  { %v1357_v59 = vadd.f32 1.0, %v2429_v43 }
0x1d24   :  { %2430 = vrcp.f32 %v1357_v59  ;;  %v1369_v1 = vand.u32 2147483648, %v1357_v59  ;;  %v1367_v6 = vand.u32 2147483647, %v1357_v59  ;;  %vm1363_vm7 = vweird.f32 %v1357_v59 }
0x1d25   :  { %2432 = vtanh.f32 %v1352_v56 }
0x1d26   :  { %v1370_v41 = vor.u32 1.1754944e-38, %v1369_v1  ;;  %vm1368_vm11 = vcmp.eq.f32.partialorder %v1367_v6, 8.507059e+37 }
0x1d2a   :  { %v2431_v60 = vpop.eup %2430 }
0x1d2b   :  { %v1359_v62 = vmul.f32 %v2431_v60, %v1357_v59  ;;  %vm1364_vm6 = vweird.f32 %v2431_v60  ;;  %v2433_v46 = vpop.eup %2432 }
0x1d2c   :  { %vm1365_vm10 = vmor %vm1363_vm7, %vm1364_vm6 }
0x1d2d   :  { %v1360_v63 = vsub.f32 1.0, %v1359_v62 }
0x1d2f   :  { %v1361_v5 = vmul.f32 %v2431_v60, %v1360_v63 }
0x1d31   :  { %v1362_v40 = vadd.f32 %v2431_v60, %v1361_v5 }
0x1d33   :  { %v1366_v11 = vsel %vm1365_vm10, %v2431_v60, %v1362_v40 }
0x1d34   :  { %v1371_v42 = vsel %vm1368_vm11, %v1370_v41, %v1366_v11 }
0x1d35   :  { %v1373_v12 = vsel %vm2834_vm4, %v2433_v46, %v1371_v42 }
0x1d36   :  { %1379 = vrot.lane.b32.xlu2 %v1373_v12, %s2707_s21  ;;  %v1377_v17 = vmul.f32 %v1375_v16, %v1373_v12 }
0x1d3e   :  { %323 = vrot.lane.b32.xlu2 %v2852_v2, %s2708_s2 }
0x1d46   :  { %1173 = vrot.lane.b32.xlu2 %v3035_v34, %s2707_s21 }
0x1d90   :  { %v1380_v13 = vpop.permute.xlu2 %1379 }
0x1d91   :  { %v1382_v14 = vmul.f32 %v1380_v13, %v1373_v12 }
0x1d93   :  { %1384 = vrot.lane.b32.xlu0 %v1382_v14, %s2708_s2 }
0x1d98   :  { %v324_v15 = vpop.permute.xlu2 %323 }
0x1d99   :  { %327 = vst.msk [vmem:[#allocation2] sm:$0xc] %vm326_vm12, %v324_v15 }
0x1d9b   :  { %399 = vrot.lane.b32.xlu0 %v2863_v36, %s2708_s2  ;;  %v1408_v36 = vld [vmem:[#allocation8 + $0x38] sm:$0xff] }
0x1d9c   :  { %1428 = vmatpush.msra.mxu0 %v1408_v36 }
0x1da0   :  { %v1174_v26 = vpop.permute.xlu2 %1173 }
0x1da3   :  { %1248 = vrot.lane.b32.xlu0 %v3046_v4, %s2707_s21  ;;  %v1407_v4 = vld [vmem:[#allocation8 + $0x30] sm:$0xff] }
0x1da4   :  { %1429 = vmatpush.msra.mxu0 %v1407_v4 }
0x1da6   :  { %1430 = vmatpush.msra.mxu0 %v1406_v21 }
0x1da8   :  { %1431 = vmatpush.msra.mxu0 %v1405_v22 }
0x1daa   :  { %1432 = vmatpush.msra.mxu0 %v1404_v28 }
0x1dac   :  { %1433 = vmatpush.msra.mxu0 %v1403_v30 }
0x1dae   :  { %1434 = vmatpush.msra.mxu0 %v1402_v32 }
0x1db0   :  { %1435 = vmatpush.msra.mxu0 %v1401_v38 }
0x1e05   :  { %v1385_v2 = vpop.permute.xlu0 %1384 }
0x1e06   :  { %v1387_v18 = vadd.f32 %v1385_v2, %v1377_v17 }
0x1e08   :  { %2434 = vtanh.f32 %v1387_v18 }
0x1e0d   :  { %v400_v34 = vpop.permute.xlu0 %399 }
0x1e0e   :  { %v2435_v19 = vpop.eup %2434  ;;  %403 = vst.msk [vmem:[#allocation2] sm:$0x30] %vm402_vm13, %v400_v34 }
0x1e0f   :  { %1390 = vrot.lane.b32.xlu1 %v2435_v19, %s2707_s21 }
0x1e15   :  { %v1249_v20 = vpop.permute.xlu0 %1248 }
0x1e16   :  { %1251 = vst.msk [vmem:[#allocation2] sm:$0x30] %vm952_vm0, %v1249_v20 }
0x1e17   :  { %475 = vrot.lane.b32.xlu1 %v2874_v0, %s2708_s2 }
0x1e1f   :  { %1323 = vrot.lane.b32.xlu1 %v1321_v10, %s2707_s21 }
0x1e81   :  { %v1391_v8 = vpop.permute.xlu1 %1390 }
0x1e82   :  { %v1393_v23 = vmul.f32 %v1391_v8, %v1373_v12 }
0x1e84   :  { %1395 = vrot.lane.b32.xlu2 %v1393_v23, %s2707_s21 }
0x1e89   :  { %v476_v25 = vpop.permute.xlu1 %475 }
0x1e8a   :  { %479 = vst.msk [vmem:[#allocation2] sm:$0xc0] %vm478_vm8, %v476_v25 }
0x1e8b   :  { %1176 = vst.msk [vmem:[#allocation2] sm:$0xc0] %vm876_vm14, %v1174_v26 }
0x1e91   :  { %v1324_v0 = vpop.permute.xlu1 %1323 }
0x1e92   :  { %1326 = vst.msk [vmem:[#allocation2] sm:$0xc] %vm1028_vm15, %v1324_v0 }
0x1ede   :  { %v1396_v7 = vpop.permute.xlu2 %1395 }
0x1edf   :  { %1398 = vst.msk [vmem:[#allocation2] sm:$0x3] %vm1101_vm1, %v1396_v7 }
0x1ee6   :  { %v1399_v44 = vld [vmem:[#allocation2] sm:$0xff] }
0x1ee7   :  { %2271 = vmatmul.msk.f32.vlgmr.msra.gmra.mxu0 %vm1413_vm2, %v1399_v44 }
0x1f64   :  { %v1437_v48 = vpop.f32.mrf.mxu0 }
0x1f65   :  { %v3128_v51 = vadd.f32 %v3125_v45, %v1437_v48 }
0x1f67   :  { %v1467_v53 = vadd.f32 %v1464_v50, %v3128_v51 }
0x1f69   :  { %v2273_v10 = vmul.f32 -1.442695, %v1467_v53 }
0x1f6b   :  { %2436 = vpow2.f32 %v2273_v10 }
0x1f71   :  { %v2437_v52 = vpop.eup %2436 }
0x1f72   :  { %v1472_v54 = vadd.f32 1.0, %v2437_v52 }
0x1f74   :  { %2438 = vrcp.f32 %v1472_v54  ;;  %v1484_v43 = vand.u32 2147483648, %v1472_v54  ;;  %v1482_v60 = vand.u32 2147483647, %v1472_v54  ;;  %vm1478_vm5 = vweird.f32 %v1472_v54 }
0x1f75   :  { %2440 = vtanh.f32 %v1467_v53 }
0x1f76   :  { %v1485_v63 = vor.u32 1.1754944e-38, %v1484_v43  ;;  %vm1483_vm7 = vcmp.eq.f32.partialorder %v1482_v60, 8.507059e+37 }
0x1f7a   :  { %v2439_v55 = vpop.eup %2438 }
0x1f7b   :  { %v1474_v56 = vmul.f32 %v2439_v55, %v1472_v54  ;;  %vm1479_vm3 = vweird.f32 %v2439_v55  ;;  %v2441_v5 = vpop.eup %2440 }
0x1f7c   :  { %vm1480_vm6 = vmor %vm1478_vm5, %vm1479_vm3 }
0x1f7d   :  { %v1475_v57 = vsub.f32 1.0, %v1474_v56 }
0x1f7f   :  { %v1476_v59 = vmul.f32 %v2439_v55, %v1475_v57 }
0x1f81   :  { %v1477_v62 = vadd.f32 %v2439_v55, %v1476_v59 }
0x1f83   :  { %v1481_v1 = vsel %vm1480_vm6, %v2439_v55, %v1477_v62 }
0x1f84   :  { %v1486_v6 = vsel %vm1483_vm7, %v1485_v63, %v1481_v1 }
0x1f85   :  { %v1488_v40 = vsel %vm2834_vm4, %v2441_v5, %v1486_v6 }
0x1f86   :  { %1491 = vrot.lane.b32.xlu0 %v1488_v40, %s2707_s21  ;;  %v1489_v46 = vmul.f32 0.0, %v1488_v40 }
0x1ff8   :  { %v1492_v41 = vpop.permute.xlu0 %1491 }
0x1ff9   :  { %v1494_v11 = vmul.f32 %v1492_v41, %v1488_v40 }
0x1ffb   :  { %1496 = vrot.lane.b32.xlu1 %v1494_v11, %s2708_s2 }
0x206d   :  { %v1497_v42 = vpop.permute.xlu1 %1496 }
0x206e   :  { %v1499_v12 = vadd.f32 %v1497_v42, %v1489_v46 }
0x2070   :  { %2442 = vtanh.f32 %v1499_v12 }
0x2076   :  { %v2443_v13 = vpop.eup %2442 }
0x2077   :  { %1502 = vrot.lane.b32.xlu2 %v2443_v13, %s2707_s21 }
0x20d1   :  { %v1503_v14 = vpop.permute.xlu2 %1502 }
0x20d2   :  { %v1505_v15 = vmul.f32 %v1503_v14, %v1488_v40 }
0x20d4   :  { %1507 = vrot.lane.b32.xlu0 %v1505_v15, %s2708_s2 }
0x2146   :  { %v1508_v16 = vpop.permute.xlu0 %1507 }
0x2147   :  { %2274 = vmatmul.msk.f32.vlgmr.msra.gmra.mxu2 %vm186_vm9, %v1508_v16 }
0x2148   :  { %1945 = vmatpush.msra.mxu2 %v3083_v29 }
0x214a   :  { %1946 = vmatpush.msra.mxu2 %v3086_v31 }
0x214c   :  { %1947 = vmatpush.msra.mxu2 %v3088_v37  ;;  %v1557_v37 = vrot.slane %v1499_v12, 6  ;;  %v725_v12 = vrot.slane %v3005_v61, 2 }
0x214e   :  { %1948 = vmatpush.msra.mxu2 %v3098_v39  ;;  %v727_v13 = vadd.f32 %v725_v12, %v2884_v9 }
0x2150   :  { %v2252_v14 = vmul.f32 -1.442695, %v727_v13 }
0x21ca   :  { %v1528_v17 = vpop.f32.mrf.mxu2 }
0x21cb   :  { %v1532_v2 = vrot.slane %v1528_v17, 6 }
0x21cd   :  { %v1534_v18 = vadd.f32 %v1532_v2, %v3128_v51 }
0x21cf   :  { %v2275_v34 = vmul.f32 -1.442695, %v1534_v18 }
0x21d1   :  { %2444 = vpow2.f32 %v2275_v34 }
0x21d7   :  { %v2445_v19 = vpop.eup %2444 }
0x21d8   :  { %v1539_v20 = vadd.f32 1.0, %v2445_v19 }
0x21da   :  { %2446 = vrcp.f32 %v1539_v20  ;;  %v1551_v22 = vand.u32 2147483648, %v1539_v20  ;;  %v1549_v23 = vand.u32 2147483647, %v1539_v20  ;;  %vm1545_vm11 = vweird.f32 %v1539_v20 }
0x21db   :  { %2448 = vtanh.f32 %v1534_v18 }
0x21dc   :  { %v1552_v26 = vor.u32 1.1754944e-38, %v1551_v22  ;;  %vm1550_vm5 = vcmp.eq.f32.partialorder %v1549_v23, 8.507059e+37 }
0x21e0   :  { %v2447_v36 = vpop.eup %2446 }
0x21e1   :  { %v1541_v4 = vmul.f32 %v2447_v36, %v1539_v20  ;;  %vm1546_vm10 = vweird.f32 %v2447_v36  ;;  %v2449_v28 = vpop.eup %2448 }
0x21e2   :  { %vm1547_vm3 = vmor %vm1545_vm11, %vm1546_vm10 }
0x21e3   :  { %v1542_v21 = vsub.f32 1.0, %v1541_v4 }
0x21e5   :  { %v1543_v8 = vmul.f32 %v2447_v36, %v1542_v21 }
0x21e7   :  { %v1544_v25 = vadd.f32 %v2447_v36, %v1543_v8 }
0x21e9   :  { %v1548_v0 = vsel %vm1547_vm3, %v2447_v36, %v1544_v25 }
0x21ea   :  { %v1553_v29 = vsel %vm1550_vm5, %v1552_v26, %v1548_v0 }
0x21eb   :  { %v1555_v30 = vsel %vm2834_vm4, %v2449_v28, %v1553_v29 }
0x21ec   :  { %1561 = vrot.lane.b32.xlu1 %v1555_v30, %s2707_s21  ;;  %v1559_v38 = vmul.f32 %v1557_v37, %v1555_v30 }
0x225e   :  { %v1562_v31 = vpop.permute.xlu1 %1561 }
0x225f   :  { %v1564_v32 = vmul.f32 %v1562_v31, %v1555_v30 }
0x2261   :  { %1566 = vrot.lane.b32.xlu2 %v1564_v32, %s2708_s2 }
0x22bb   :  { %v1567_v39 = vpop.permute.xlu2 %1566 }
0x22bc   :  { %v3147_v7 = vadd.f32 %v1567_v39, %v1559_v38 }
0x22be   :  { %2450 = vtanh.f32 %v3147_v7  ;;  %v1628_v25 = vrot.slane %v3147_v7, 6 }
0x22c4   :  { %v2451_v44 = vpop.eup %2450 }
0x22c5   :  { %1572 = vrot.lane.b32.xlu0 %v2451_v44, %s2707_s21 }
0x2337   :  { %v1573_v48 = vpop.permute.xlu0 %1572 }
0x2338   :  { %v1575_v50 = vmul.f32 %v1573_v48, %v1555_v30 }
0x233a   :  { %v1577_v53 = vrot.slane %v1575_v50, 2 }
0x233c   :  { %1578 = vrot.lane.b32.xlu1 %v1577_v53, %s2708_s2 }
0x23ae   :  { %v1579_v10 = vpop.permute.xlu1 %1578 }
0x23af   :  { %2276 = vmatmul.msk.f32.vlgmr.msrb.gmra.mxu3 %vm186_vm9, %v1579_v10 }
0x2432   :  { %v1599_v52 = vpop.f32.mrf.mxu3 }
0x2433   :  { %v1603_v54 = vrot.slane %v1599_v52, 4 }
0x2435   :  { %v1605_v55 = vadd.f32 %v1603_v54, %v3128_v51 }
0x2437   :  { %v2277_v56 = vmul.f32 -1.442695, %v1605_v55 }
0x2439   :  { %2452 = vpow2.f32 %v2277_v56 }
0x243f   :  { %v2453_v57 = vpop.eup %2452 }
0x2440   :  { %v1610_v43 = vadd.f32 1.0, %v2453_v57  ;;  %v750_v57 = vrot.slane %v2985_v47, 6 }
0x2442   :  { %2454 = vrcp.f32 %v1610_v43  ;;  %v1622_v63 = vand.u32 2147483648, %v1610_v43  ;;  %v1620_v5 = vand.u32 2147483647, %v1610_v43  ;;  %vm1616_vm7 = vweird.f32 %v1610_v43 }
0x2443   :  { %2456 = vtanh.f32 %v1605_v55 }
0x2444   :  { %v1623_v40 = vor.u32 1.1754944e-38, %v1622_v63  ;;  %vm1621_vm11 = vcmp.eq.f32.partialorder %v1620_v5, 8.507059e+37  ;;  %2458 = vpow2.f32 %v2252_v14 }
0x2448   :  { %v2455_v59 = vpop.eup %2454 }
0x2449   :  { %v1612_v60 = vmul.f32 %v2455_v59, %v1610_v43  ;;  %vm1617_vm6 = vweird.f32 %v2455_v59  ;;  %v2457_v11 = vpop.eup %2456 }
0x244a   :  { %vm1618_vm10 = vmor %vm1616_vm7, %vm1617_vm6  ;;  %v2459_v15 = vpop.eup %2458 }
0x244b   :  { %v1613_v62 = vsub.f32 1.0, %v1612_v60  ;;  %v732_v16 = vadd.f32 1.0, %v2459_v15 }
0x244d   :  { %v1614_v1 = vmul.f32 %v2455_v59, %v1613_v62  ;;  %2460 = vrcp.f32 %v732_v16  ;;  %v744_v4 = vand.u32 2147483648, %v732_v16  ;;  %vm738_vm5 = vweird.f32 %v732_v16 }
0x244e   :  { %v742_v21 = vand.u32 2147483647, %v732_v16  ;;  %2462 = vtanh.f32 %v727_v13 }
0x244f   :  { %v1615_v6 = vadd.f32 %v2455_v59, %v1614_v1  ;;  %v745_v61 = vor.u32 1.1754944e-38, %v744_v4  ;;  %v2000_v4 = vld [vmem:[#allocation8 + $0x48] sm:$0xff] }
0x2450   :  { %vm743_vm7 = vcmp.eq.f32.partialorder %v742_v21, 8.507059e+37  ;;  %v1999_v21 = vld [vmem:[#allocation8 + $0x40] sm:$0xff] }
0x2451   :  { %v1619_v41 = vsel %vm1618_vm10, %v2455_v59, %v1615_v6 }
0x2452   :  { %v1624_v46 = vsel %vm1621_vm11, %v1623_v40, %v1619_v41 }
0x2453   :  { %v1626_v42 = vsel %vm2834_vm4, %v2457_v11, %v1624_v46  ;;  %v2461_v17 = vpop.eup %2460 }
0x2454   :  { %1632 = vrot.lane.b32.xlu2 %v1626_v42, %s2707_s21  ;;  %v734_v2 = vmul.f32 %v2461_v17, %v732_v16  ;;  %vm739_vm3 = vweird.f32 %v2461_v17  ;;  %v2463_v8 = vpop.eup %2462  ;;  %v1630_v26 = vmul.f32 %v1628_v25, %v1626_v42 }
0x2455   :  { %vm740_vm6 = vmor %vm738_vm5, %vm739_vm3 }
0x2456   :  { %v735_v18 = vsub.f32 1.0, %v734_v2 }
0x2458   :  { %v736_v34 = vmul.f32 %v2461_v17, %v735_v18  ;;  %v2005_v18 = vld [vmem:[#allocation8 + $0x70] sm:$0xff] }
0x245a   :  { %v737_v20 = vadd.f32 %v2461_v17, %v736_v34  ;;  %v2004_v34 = vld [vmem:[#allocation8 + $0x68] sm:$0xff] }
0x245c   :  { %v741_v9 = vsel %vm740_vm6, %v2461_v17, %v737_v20  ;;  %v2002_v20 = vld [vmem:[#allocation8 + $0x58] sm:$0xff] }
0x245d   :  { %v746_v22 = vsel %vm743_vm7, %v745_v61, %v741_v9 }
0x245e   :  { %v3162_v23 = vsel %vm2834_vm4, %v2463_v8, %v746_v22 }
0x245f   :  { %v752_v62 = vmul.f32 %v750_v57, %v3162_v23 }
0x24ae   :  { %v1633_v19 = vpop.permute.xlu2 %1632 }
0x24af   :  { %v1635_v36 = vmul.f32 %v1633_v19, %v1626_v42  ;;  %v2003_v19 = vld [vmem:[#allocation8 + $0x60] sm:$0xff] }
0x24b1   :  { %1637 = vrot.lane.b32.xlu0 %v1635_v36, %s2708_s2  ;;  %v2001_v36 = vld [vmem:[#allocation8 + $0x50] sm:$0xff] }
0x24b9   :  { %754 = vrot.lane.b32.xlu0 %v3162_v23, %s2707_s21 }
0x2523   :  { %v1638_v0 = vpop.permute.xlu0 %1637 }
0x2524   :  { %v1640_v28 = vadd.f32 %v1638_v0, %v1630_v26 }
0x2526   :  { %2464 = vtanh.f32 %v1640_v28 }
0x252b   :  { %v755_v37 = vpop.permute.xlu0 %754 }
0x252c   :  { %v2465_v29 = vpop.eup %2464  ;;  %v757_v38 = vmul.f32 %v755_v37, %v3162_v23 }
0x252d   :  { %1643 = vrot.lane.b32.xlu1 %v2465_v29, %s2707_s21 }
0x259f   :  { %v1644_v30 = vpop.permute.xlu1 %1643 }
0x25a0   :  { %v1646_v31 = vmul.f32 %v1644_v30, %v1626_v42 }
0x25a2   :  { %v1648_v32 = vrot.slane %v1646_v31, 4 }
0x25a4   :  { %1649 = vrot.lane.b32.xlu2 %v1648_v32, %s2708_s2 }
0x25ac   :  { %759 = vrot.lane.b32.xlu2 %v757_v38, %s2708_s2 }
0x25fe   :  { %v1650_v39 = vpop.permute.xlu2 %1649 }
0x25ff   :  { %2278 = vmatmul.msk.f32.vlgmr.msra.gmra.mxu1 %vm186_vm9, %v1650_v39 }
0x2606   :  { %v760_v60 = vpop.permute.xlu2 %759 }
0x2607   :  { %v762_v1 = vadd.f32 %v760_v60, %v752_v62 }
0x267c   :  { %v1670_v7 = vpop.f32.mrf.mxu1 }
0x267d   :  { %v1674_v44 = vrot.slane %v1670_v7, 2 }
0x267f   :  { %v1676_v48 = vadd.f32 %v1674_v44, %v3128_v51 }
0x2681   :  { %v2279_v50 = vmul.f32 -1.442695, %v1676_v48 }
0x2683   :  { %2466 = vpow2.f32 %v2279_v50 }
0x2689   :  { %v2467_v53 = vpop.eup %2466 }
0x268a   :  { %v1681_v10 = vadd.f32 1.0, %v2467_v53 }
0x268c   :  { %2468 = vrcp.f32 %v1681_v10  ;;  %v1693_v56 = vand.u32 2147483648, %v1681_v10  ;;  %v1691_v59 = vand.u32 2147483647, %v1681_v10  ;;  %vm1687_vm11 = vweird.f32 %v1681_v10 }
0x268d   :  { %2470 = vtanh.f32 %v1676_v48 }
0x268e   :  { %v1694_v51 = vor.u32 1.1754944e-38, %v1693_v56  ;;  %vm1692_vm5 = vcmp.eq.f32.partialorder %v1691_v59, 8.507059e+37  ;;  %2472 = vtanh.f32 %v762_v1 }
0x2692   :  { %v2469_v52 = vpop.eup %2468 }
0x2693   :  { %v1683_v54 = vmul.f32 %v2469_v52, %v1681_v10  ;;  %vm1688_vm10 = vweird.f32 %v2469_v52  ;;  %v2471_v6 = vpop.eup %2470 }
0x2694   :  { %vm1689_vm3 = vmor %vm1687_vm11, %vm1688_vm10  ;;  %v2473_v47 = vpop.eup %2472 }
0x2695   :  { %v1684_v55 = vsub.f32 1.0, %v1683_v54 }
0x2697   :  { %v1685_v43 = vmul.f32 %v2469_v52, %v1684_v55 }
0x2699   :  { %v1686_v63 = vadd.f32 %v2469_v52, %v1685_v43 }
0x269b   :  { %v1690_v5 = vsel %vm1689_vm3, %v2469_v52, %v1686_v63 }
0x269c   :  { %v1695_v40 = vsel %vm1692_vm5, %v1694_v51, %v1690_v5 }
0x269d   :  { %v1697_v41 = vsel %vm2834_vm4, %v2471_v6, %v1695_v40 }
0x269e   :  { %1703 = vrot.lane.b32.xlu1 %v1697_v41, %s2707_s21 }
0x26a6   :  { %765 = vrot.lane.b32.xlu1 %v2473_v47, %s2707_s21 }
0x26ae   :  { %695 = vrot.lane.b32.xlu1 %v2991_v35, %s2708_s2  ;;  %v1699_v35 = vrot.slane %v1640_v28, 6 }
0x26b6   :  { %949 = vrot.lane.b32.xlu1 %v2995_v58, %s2707_s21  ;;  %v1701_v58 = vmul.f32 %v1699_v35, %v1697_v41 }
0x2710   :  { %v1704_v11 = vpop.permute.xlu1 %1703 }
0x2711   :  { %v1706_v46 = vmul.f32 %v1704_v11, %v1697_v41 }
0x2713   :  { %1708 = vrot.lane.b32.xlu0 %v1706_v46, %s2708_s2 }
0x2718   :  { %v766_v42 = vpop.permute.xlu1 %765 }
0x271b   :  { %620 = vrot.lane.b32.xlu0 %v2960_v33, %s2708_s2 }
0x2720   :  { %v696_v12 = vpop.permute.xlu1 %695 }
0x2721   :  { %698 = vst.msk [vmem:[#allocation2 + $0x8] sm:$0x30] %vm402_vm13, %v696_v12 }
0x2723   :  { %873 = vrot.lane.b32.xlu0 %v2964_v49, %s2707_s21  ;;  %v768_v49 = vmul.f32 %v766_v42, %v3162_v23 }
0x2728   :  { %v950_v13 = vpop.permute.xlu1 %949 }
0x2729   :  { %953 = vst.msk [vmem:[#allocation2 + $0x8] sm:$0x30] %vm952_vm0, %v950_v13 }
0x272b   :  { %1098 = vrot.lane.b32.xlu0 %v3024_v3, %s2707_s21  ;;  %v2006_v3 = vld [vmem:[#allocation8 + $0x78] sm:$0xff] }
0x272c   :  { %2023 = vmatpush.msrb.mxu0 %v2006_v3 }
0x272e   :  { %2024 = vmatpush.msrb.mxu0 %v2005_v18 }
0x2730   :  { %2025 = vmatpush.msrb.mxu0 %v2004_v34 }
0x2732   :  { %2026 = vmatpush.msrb.mxu0 %v2003_v19 }
0x2734   :  { %2027 = vmatpush.msrb.mxu0 %v2002_v20 }
0x2736   :  { %2028 = vmatpush.msrb.mxu0 %v2001_v36 }
0x2738   :  { %2029 = vmatpush.msrb.mxu0 %v2000_v4 }
0x273a   :  { %2030 = vmatpush.msrb.mxu0 %v1999_v21 }
0x2785   :  { %v1709_v14 = vpop.permute.xlu0 %1708 }
0x2786   :  { %v3192_v15 = vadd.f32 %v1709_v14, %v1701_v58 }
0x2788   :  { %2474 = vtanh.f32 %v3192_v15  ;;  %v1767_v43 = vrot.slane %v3192_v15, 6 }
0x278d   :  { %v621_v33 = vpop.permute.xlu0 %620 }
0x278e   :  { %v2475_v16 = vpop.eup %2474  ;;  %623 = vst.msk [vmem:[#allocation2 + $0x8] sm:$0xc] %vm326_vm12, %v621_v33 }
0x278f   :  { %1714 = vrot.lane.b32.xlu2 %v2475_v16, %s2707_s21 }
0x2795   :  { %v874_v17 = vpop.permute.xlu0 %873 }
0x2797   :  { %770 = vrot.lane.b32.xlu2 %v768_v49, %s2708_s2 }
0x279d   :  { %v1099_v2 = vpop.permute.xlu0 %1098 }
0x279e   :  { %1102 = vst.msk [vmem:[#allocation2 + $0x8] sm:$0x3] %vm1101_vm1, %v1099_v2 }
0x279f   :  { %1025 = vrot.lane.b32.xlu2 %v3013_v27, %s2707_s21 }
0x27e9   :  { %v1715_v9 = vpop.permute.xlu2 %1714 }
0x27ea   :  { %v1717_v61 = vmul.f32 %v1715_v9, %v1697_v41 }
0x27ec   :  { %v1719_v22 = vrot.slane %v1717_v61, 6 }
0x27ee   :  { %1720 = vrot.lane.b32.xlu1 %v1719_v22, %s2708_s2 }
0x27f1   :  { %v771_v27 = vpop.permute.xlu2 %770 }
0x27f2   :  { %773 = vst.msk [vmem:[#allocation2 + $0x8] sm:$0xc0] %vm478_vm8, %v771_v27 }
0x27f3   :  { %877 = vst.msk [vmem:[#allocation2 + $0x8] sm:$0xc0] %vm876_vm14, %v874_v17 }
0x27f9   :  { %v1026_v8 = vpop.permute.xlu2 %1025 }
0x27fa   :  { %1029 = vst.msk [vmem:[#allocation2 + $0x8] sm:$0xc] %vm1028_vm15, %v1026_v8 }
0x2801   :  { %v1400_v23 = vld [vmem:[#allocation2 + $0x8] sm:$0xff] }
0x2802   :  { %2272 = vmatmul.msk.f32.gmra.mxu0 %vm1413_vm2, %v1400_v23  ;;  %v2012_v25 = vrot.slane %v1400_v23, 6 }
0x280a   :  { %2289 = vmatmul.msk.f32.vlgmr.msrb.gmra.mxu0 %vm1413_vm2, %v2012_v25 }
0x2860   :  { %v1721_v26 = vpop.permute.xlu1 %1720 }
0x2861   :  { %2280 = vmatmul.msk.f32.vlgmr.msrb.gmra.mxu2 %vm186_vm9, %v1721_v26 }
0x287f   :  { %v1440_v0 = vpop.f32.mrf.mxu0 }
0x2880   :  { %v3210_v28 = vadd.f32 %v3125_v45, %v1440_v0 }
0x28e4   :  { %v1741_v29 = vpop.f32.mrf.mxu2 }
0x28e5   :  { %v1744_v30 = vadd.f32 %v1741_v29, %v3210_v28 }
0x28e7   :  { %v2281_v31 = vmul.f32 -1.442695, %v1744_v30 }
0x28e9   :  { %2476 = vpow2.f32 %v2281_v31 }
0x28ef   :  { %v2477_v32 = vpop.eup %2476 }
0x28f0   :  { %v1749_v37 = vadd.f32 1.0, %v2477_v32 }
0x28f2   :  { %2478 = vrcp.f32 %v1749_v37  ;;  %v1761_v44 = vand.u32 2147483648, %v1749_v37  ;;  %v1759_v50 = vand.u32 2147483647, %v1749_v37  ;;  %vm1755_vm13 = vweird.f32 %v1749_v37 }
0x28f3   :  { %2480 = vtanh.f32 %v1744_v30 }
0x28f4   :  { %v1762_v45 = vor.u32 1.1754944e-38, %v1761_v44  ;;  %vm1760_vm8 = vcmp.eq.f32.partialorder %v1759_v50, 8.507059e+37 }
0x28f8   :  { %v2479_v38 = vpop.eup %2478 }
0x28f9   :  { %v1751_v39 = vmul.f32 %v2479_v38, %v1749_v37  ;;  %vm1756_vm12 = vweird.f32 %v2479_v38  ;;  %v2481_v52 = vpop.eup %2480 }
0x28fa   :  { %vm1757_vm0 = vmor %vm1755_vm13, %vm1756_vm12 }
0x28fb   :  { %v1752_v7 = vsub.f32 1.0, %v1751_v39 }
0x28fd   :  { %v1753_v48 = vmul.f32 %v2479_v38, %v1752_v7 }
0x28ff   :  { %v1754_v53 = vadd.f32 %v2479_v38, %v1753_v48 }
0x2901   :  { %v1758_v10 = vsel %vm1757_vm0, %v2479_v38, %v1754_v53 }
0x2902   :  { %v1763_v54 = vsel %vm1760_vm8, %v1762_v45, %v1758_v10 }
0x2903   :  { %v1765_v55 = vsel %vm2834_vm4, %v2481_v52, %v1763_v54  ;;  %v2312_v52 = vld [vmem:[%s3289_s6 + $0x1] ss:$0 sm:$0xff]  ;;  %v2032_v54 = vpop.f32.mrf.mxu0  ;;  %s2709_s6 = smov 96  }
0x2904   :  { %1771 = vrot.lane.b32.xlu2 %v1765_v55, %s2707_s21  ;;  %v1769_v59 = vmul.f32 %v1767_v43, %v1765_v55 }
0x295e   :  { %v1772_v56 = vpop.permute.xlu2 %1771 }
0x295f   :  { %v1774_v57 = vmul.f32 %v1772_v56, %v1765_v55 }
0x2961   :  { %1776 = vrot.lane.b32.xlu0 %v1774_v57, %s2708_s2 }
0x29d3   :  { %v1777_v60 = vpop.permute.xlu0 %1776 }
0x29d4   :  { %v1779_v62 = vadd.f32 %v1777_v60, %v1769_v59 }
0x29d6   :  { %2482 = vtanh.f32 %v1779_v62  ;;  %v1837_v34 = vrot.slane %v1779_v62, 6 }
0x29dc   :  { %v2483_v63 = vpop.eup %2482 }
0x29dd   :  { %1782 = vrot.lane.b32.xlu1 %v2483_v63, %s2707_s21 }
0x2a4f   :  { %v1783_v51 = vpop.permute.xlu1 %1782 }
0x2a50   :  { %v1785_v1 = vmul.f32 %v1783_v51, %v1765_v55  ;;  %v2033_v55 = vadd.f32 %v2312_v52, %v2032_v54  ;;  %v2068_v52 = vld [vmem:[#allocation11 + $0x8] sm:$0xff]  ;;  %v2067_v54 = vld [vmem:[#allocation11] sm:$0xff] }
0x2a52   :  { %1787 = vrot.lane.b32.xlu2 %v1785_v1, %s2708_s2  ;;  %v2290_v56 = vmul.f32 -1.442695, %v2033_v55 }
0x2aac   :  { %v1788_v5 = vpop.permute.xlu2 %1787 }
0x2aad   :  { %2282 = vmatmul.msk.f32.vlgmr.msra.gmra.mxu3 %vm186_vm9, %v1788_v5 }
0x2b30   :  { %v1808_v6 = vpop.f32.mrf.mxu3 }
0x2b31   :  { %v1812_v40 = vrot.slane %v1808_v6, 6 }
0x2b33   :  { %v1814_v41 = vadd.f32 %v1812_v40, %v3210_v28 }
0x2b35   :  { %v2283_v47 = vmul.f32 -1.442695, %v1814_v41 }
0x2b37   :  { %2484 = vpow2.f32 %v2283_v47 }
0x2b3d   :  { %v2485_v11 = vpop.eup %2484 }
0x2b3e   :  { %v1819_v46 = vadd.f32 1.0, %v2485_v11 }
0x2b40   :  { %2486 = vrcp.f32 %v1819_v46  ;;  %v1831_v35 = vand.u32 2147483648, %v1819_v46  ;;  %v1829_v14 = vand.u32 2147483647, %v1819_v46  ;;  %vm1825_vm15 = vweird.f32 %v1819_v46 }
0x2b41   :  { %2488 = vtanh.f32 %v1814_v41 }
0x2b42   :  { %v1832_v33 = vor.u32 1.1754944e-38, %v1831_v35  ;;  %vm1830_vm2 = vcmp.eq.f32.partialorder %v1829_v14, 8.507059e+37 }
0x2b46   :  { %v2487_v42 = vpop.eup %2486 }
0x2b47   :  { %v1821_v12 = vmul.f32 %v2487_v42, %v1819_v46  ;;  %vm1826_vm14 = vweird.f32 %v2487_v42  ;;  %v2489_v49 = vpop.eup %2488 }
0x2b48   :  { %vm1827_vm1 = vmor %vm1825_vm15, %vm1826_vm14 }
0x2b49   :  { %v1822_v13 = vsub.f32 1.0, %v1821_v12 }
0x2b4b   :  { %v1823_v58 = vmul.f32 %v2487_v42, %v1822_v13 }
0x2b4d   :  { %v1824_v15 = vadd.f32 %v2487_v42, %v1823_v58 }
0x2b4f   :  { %v1828_v16 = vsel %vm1827_vm1, %v2487_v42, %v1824_v15 }
0x2b50   :  { %v1833_v17 = vsel %vm1830_vm2, %v1832_v33, %v1828_v16  ;;  %vm2214_vm2 = vcmask 25600  }
0x2b51   :  { %v1835_v2 = vsel %vm2834_vm4, %v2489_v49, %v1833_v17 }
0x2b52   :  { %1841 = vrot.lane.b32.xlu0 %v1835_v2, %s2707_s21  ;;  %v1839_v19 = vmul.f32 %v1837_v34, %v1835_v2 }
0x2bc4   :  { %v1842_v3 = vpop.permute.xlu0 %1841 }
0x2bc5   :  { %v1844_v18 = vmul.f32 %v1842_v3, %v1835_v2 }
0x2bc7   :  { %1846 = vrot.lane.b32.xlu1 %v1844_v18, %s2708_s2 }
0x2c39   :  { %v1847_v20 = vpop.permute.xlu1 %1846 }
0x2c3a   :  { %v1849_v36 = vadd.f32 %v1847_v20, %v1839_v19 }
0x2c3c   :  { %2490 = vtanh.f32 %v1849_v36  ;;  %v1908_v62 = vrot.slane %v1849_v36, 6 }
0x2c42   :  { %v2491_v4 = vpop.eup %2490 }
0x2c43   :  { %1852 = vrot.lane.b32.xlu2 %v2491_v4, %s2707_s21 }
0x2c9d   :  { %v1853_v21 = vpop.permute.xlu2 %1852 }
0x2c9e   :  { %v1855_v9 = vmul.f32 %v1853_v21, %v1835_v2 }
0x2ca0   :  { %v1857_v61 = vrot.slane %v1855_v9, 2 }
0x2ca2   :  { %1858 = vrot.lane.b32.xlu0 %v1857_v61, %s2708_s2 }
0x2d14   :  { %v1859_v22 = vpop.permute.xlu0 %1858 }
0x2d15   :  { %2284 = vmatmul.msk.f32.vlgmr.msrb.gmra.mxu1 %vm186_vm9, %v1859_v22 }
0x2d92   :  { %v1879_v27 = vpop.f32.mrf.mxu1 }
0x2d93   :  { %v1883_v8 = vrot.slane %v1879_v27, 4 }
0x2d95   :  { %v1885_v23 = vadd.f32 %v1883_v8, %v3210_v28 }
0x2d97   :  { %v2285_v25 = vmul.f32 -1.442695, %v1885_v23 }
0x2d99   :  { %2492 = vpow2.f32 %v2285_v25 }
0x2d9f   :  { %v2493_v26 = vpop.eup %2492 }
0x2da0   :  { %v1890_v0 = vadd.f32 1.0, %v2493_v26 }
0x2da2   :  { %2494 = vrcp.f32 %v1890_v0  ;;  %v1902_v32 = vand.u32 2147483648, %v1890_v0  ;;  %v1900_v38 = vand.u32 2147483647, %v1890_v0  ;;  %vm1896_vm7 = vweird.f32 %v1890_v0 }
0x2da3   :  { %2496 = vtanh.f32 %v1885_v23 }
0x2da4   :  { %v1903_v7 = vor.u32 1.1754944e-38, %v1902_v32  ;;  %vm1901_vm11 = vcmp.eq.f32.partialorder %v1900_v38, 8.507059e+37  ;;  %2498 = vpow2.f32 %v2290_v56  ;;  %v2074_v32 = vld [vmem:[#allocation11 + $0x38] sm:$0xff]  ;;  %v2072_v38 = vld [vmem:[#allocation11 + $0x28] sm:$0xff] }
0x2da5   :  { %2092 = vmatpush.msrb.mxu3 %v2074_v32 }
0x2da8   :  { %v2495_v29 = vpop.eup %2494 }
0x2da9   :  { %v1892_v30 = vmul.f32 %v2495_v29, %v1890_v0  ;;  %vm1897_vm6 = vweird.f32 %v2495_v29  ;;  %v2497_v48 = vpop.eup %2496 }
0x2daa   :  { %vm1898_vm10 = vmor %vm1896_vm7, %vm1897_vm6  ;;  %v2499_v57 = vpop.eup %2498 }
0x2dab   :  { %v1893_v31 = vsub.f32 1.0, %v1892_v30  ;;  %v2039_v43 = vadd.f32 1.0, %v2499_v57 }
0x2dad   :  { %v1894_v37 = vmul.f32 %v2495_v29, %v1893_v31  ;;  %2500 = vrcp.f32 %v2039_v43  ;;  %v2051_v41 = vand.u32 2147483648, %v2039_v43  ;;  %vm2045_vm5 = vweird.f32 %v2039_v43 }
0x2dae   :  { %v2049_v11 = vand.u32 2147483647, %v2039_v43 }
0x2daf   :  { %v1895_v39 = vadd.f32 %v2495_v29, %v1894_v37  ;;  %v2052_v42 = vor.u32 1.1754944e-38, %v2051_v41  ;;  %v2073_v37 = vld [vmem:[#allocation11 + $0x30] sm:$0xff] }
0x2db0   :  { %vm2050_vm13 = vcmp.eq.f32.partialorder %v2049_v11, 8.507059e+37  ;;  %2093 = vmatpush.msrb.mxu3 %v2073_v37 }
0x2db1   :  { %v1899_v44 = vsel %vm1898_vm10, %v2495_v29, %v1895_v39 }
0x2db2   :  { %v1904_v50 = vsel %vm1901_vm11, %v1903_v7, %v1899_v44  ;;  %2094 = vmatpush.msrb.mxu3 %v2072_v38 }
0x2db3   :  { %v1906_v53 = vsel %vm2834_vm4, %v2497_v48, %v1904_v50  ;;  %v2501_v59 = vpop.eup %2500 }
0x2db4   :  { %1912 = vrot.lane.b32.xlu1 %v1906_v53, %s2707_s21  ;;  %v2041_v60 = vmul.f32 %v2501_v59, %v2039_v43  ;;  %v1910_v63 = vmul.f32 %v1908_v62, %v1906_v53  ;;  %vm2046_vm3 = vweird.f32 %v2501_v59  ;;  %2095 = vmatpush.msrb.mxu3 %v2071_v24  ;;  %v2135_v43 = vld [vmem:[#allocation12 + $0x18] sm:$0xff]  ;;  %v2133_v62 = vld [vmem:[#allocation12 + $0x8] sm:$0xff] }
0x2db5   :  { %vm2047_vm12 = vmor %vm2045_vm5, %vm2046_vm3  ;;  %2155 = vmatpush.msrb.mxu2 %v2135_v43 }
0x2db6   :  { %v2042_v51 = vsub.f32 1.0, %v2041_v60  ;;  %v2134_v60 = vld [vmem:[#allocation12 + $0x10] sm:$0xff] }
0x2db7   :  { %2156 = vmatpush.msrb.mxu2 %v2134_v60 }
0x2db8   :  { %v2043_v6 = vmul.f32 %v2501_v59, %v2042_v51  ;;  %v2167_v51 = vld [vmem:[%s3294_s11 + $0x18] sm:$0xff] }
0x2db9   :  { %2157 = vmatpush.msrb.mxu2 %v2133_v62  ;;  %2187 = vmatpush.msra.mxu3 %v2167_v51 }
0x2dba   :  { %v2044_v40 = vadd.f32 %v2501_v59, %v2043_v6 }
0x2dbc   :  { %v2048_v46 = vsel %vm2047_vm12, %v2501_v59, %v2044_v40 }
0x2dbd   :  { %v2053_v12 = vsel %vm2050_vm13, %v2052_v42, %v2048_v46  ;;  %v2165_v46 = vld [vmem:[%s3294_s11 + $0x8] sm:$0xff]  ;;  %v2164_v42 = vld [vmem:[%s3294_s11] sm:$0xff] }
0x2e26   :  { %v1913_v45 = vpop.permute.xlu1 %1912 }
0x2e27   :  { %v1915_v10 = vmul.f32 %v1913_v45, %v1906_v53  ;;  %v2070_v45 = vld [vmem:[#allocation11 + $0x18] sm:$0xff] }
0x2e28   :  { %2118 = vmatpush.msra.mxu1 %v2070_v45 }
0x2e29   :  { %1917 = vrot.lane.b32.xlu2 %v1915_v10, %s2708_s2  ;;  %v2069_v10 = vld [vmem:[#allocation11 + $0x10] sm:$0xff] }
0x2e2a   :  { %2119 = vmatpush.msra.mxu1 %v2069_v10 }
0x2e2c   :  { %2120 = vmatpush.msra.mxu1 %v2068_v52 }
0x2e2e   :  { %2121 = vmatpush.msra.mxu1 %v2067_v54 }
0x2e83   :  { %v1918_v1 = vpop.permute.xlu2 %1917 }
0x2e84   :  { %v3237_v5 = vadd.f32 %v1918_v1, %v1910_v63  ;;  %v2132_v63 = vld [vmem:[#allocation12] sm:$0xff] }
0x2e85   :  { %2158 = vmatpush.msrb.mxu2 %v2132_v63  ;;  %v2166_v1 = vld [vmem:[%s3294_s11 + $0x10] sm:$0xff] }
0x2e86   :  { %2502 = vtanh.f32 %v3237_v5  ;;  %v1979_v39 = vrot.slane %v3237_v5, 6  ;;  %2188 = vmatpush.msra.mxu3 %v2166_v1  ;;  %v2313_v5 = vld [vmem:[%s3291_s8] ss:$0 sm:$0xff] }
0x2e87   :  { %2504 = vtanh.f32 %v2033_v55 }
0x2e88   :  { %2189 = vmatpush.msra.mxu3 %v2165_v46 }
0x2e8a   :  { %2190 = vmatpush.msra.mxu3 %v2164_v42 }
0x2e8c   :  { %v2503_v47 = vpop.eup %2502 }
0x2e8d   :  { %1923 = vrot.lane.b32.xlu0 %v2503_v47, %s2707_s21  ;;  %v2505_v13 = vpop.eup %2504 }
0x2e8e   :  { %v2055_v35 = vsel %vm2834_vm4, %v2505_v13, %v2053_v12  ;;  %v2314_v12 = vld [vmem:[%s3293_s10] ss:$0 sm:$0xff]  ;;  %s2710_s10 = smov [#allocation14]  }
0x2e8f   :  { %s2221_s11 = sshll.u32 %s2710_s10, 4  ;;  %s2222_s11 = int_to_ptr.vmem [resolvable:$true] %s2221_s11 }
0x2e95   :  { %2057 = vrot.lane.b32.xlu0 %v2055_v35, %s2707_s21 }
0x2eff   :  { %v1924_v58 = vpop.permute.xlu0 %1923 }
0x2f00   :  { %v1926_v14 = vmul.f32 %v1924_v58, %v1906_v53 }
0x2f02   :  { %v1928_v15 = vrot.slane %v1926_v14, 4  ;;  %v2315_v14 = vld [vmem:[%s3295_s12] ss:$0 sm:$0xff]  ;;  %s2223_s12 = sshll.u32 %s3296_s13, 4  ;;  %s2224_s12 = int_to_ptr.hbm [resolvable:$true] %s2223_s12 }
0x2f04   :  { %1929 = vrot.lane.b32.xlu1 %v1928_v15, %s2708_s2 }
0x2f07   :  { %v2058_v9 = vpop.permute.xlu0 %2057 }
0x2f08   :  { %v2060_v27 = vmul.f32 %v2058_v9, %v2055_v35 }
0x2f76   :  { %v1930_v33 = vpop.permute.xlu1 %1929 }
0x2f77   :  { %2286 = vmatmul.msk.f32.vlgmr.msra.gmra.mxu2 %vm186_vm9, %v1930_v33 }
0x2ffa   :  { %v1950_v16 = vpop.f32.mrf.mxu2 }
0x2ffb   :  { %v1954_v49 = vrot.slane %v1950_v16, 2 }
0x2ffd   :  { %v1956_v17 = vadd.f32 %v1954_v49, %v3210_v28 }
0x2fff   :  { %v2287_v2 = vmul.f32 -1.442695, %v1956_v17 }
0x3001   :  { %2506 = vpow2.f32 %v2287_v2 }
0x3007   :  { %v2507_v3 = vpop.eup %2506 }
0x3008   :  { %v1961_v18 = vadd.f32 1.0, %v2507_v3 }
0x300a   :  { %2508 = vrcp.f32 %v1961_v18  ;;  %v1973_v36 = vand.u32 2147483648, %v1961_v18  ;;  %v1971_v21 = vand.u32 2147483647, %v1961_v18  ;;  %vm1967_vm8 = vweird.f32 %v1961_v18 }
0x300b   :  { %2510 = vtanh.f32 %v1956_v17 }
0x300c   :  { %v1974_v22 = vor.u32 1.1754944e-38, %v1973_v36  ;;  %vm1972_vm15 = vcmp.eq.f32.partialorder %v1971_v21, 8.507059e+37  ;;  %2512 = vtanh.f32 %v2060_v27 }
0x3010   :  { %v2509_v34 = vpop.eup %2508 }
0x3011   :  { %v1963_v19 = vmul.f32 %v2509_v34, %v1961_v18  ;;  %vm1968_vm0 = vweird.f32 %v2509_v34  ;;  %v2511_v8 = vpop.eup %2510 }
0x3012   :  { %vm1969_vm14 = vmor %vm1967_vm8, %vm1968_vm0  ;;  %v2513_v26 = vpop.eup %2512 }
0x3013   :  { %v1964_v20 = vsub.f32 1.0, %v1963_v19 }
0x3015   :  { %v1965_v4 = vmul.f32 %v2509_v34, %v1964_v20 }
0x3017   :  { %v1966_v61 = vadd.f32 %v2509_v34, %v1965_v4 }
0x3019   :  { %v1970_v28 = vsel %vm1969_vm14, %v2509_v34, %v1966_v61 }
0x301a   :  { %v1975_v23 = vsel %vm1972_vm15, %v1974_v22, %v1970_v28 }
0x301b   :  { %v1977_v25 = vsel %vm2834_vm4, %v2511_v8, %v1975_v23 }
0x301c   :  { %1983 = vrot.lane.b32.xlu2 %v1977_v25, %s2707_s21  ;;  %v1981_v7 = vmul.f32 %v1979_v39, %v1977_v25 }
0x3024   :  { %2063 = vrot.lane.b32.xlu2 %v2513_v26, %s2709_s6 }
0x3076   :  { %v1984_v0 = vpop.permute.xlu2 %1983 }
0x3077   :  { %v1986_v29 = vmul.f32 %v1984_v0, %v1977_v25 }
0x3079   :  { %1988 = vrot.lane.b32.xlu1 %v1986_v29, %s2708_s2 }
0x307e   :  { %v2064_v30 = vpop.permute.xlu2 %2063 }
0x307f   :  { %v2066_v31 = vmul.f32 %v2064_v30, %v2055_v35 }
0x3081   :  { %2076 = vrot.lane.b32.xlu1 %v2066_v31, %s2708_s2 }
0x30eb   :  { %v1989_v44 = vpop.permute.xlu1 %1988 }
0x30ec   :  { %v1991_v48 = vadd.f32 %v1989_v44, %v1981_v7 }
0x30ee   :  { %2514 = vtanh.f32 %v1991_v48 }
0x30f3   :  { %v2077_v50 = vpop.permute.xlu1 %2076 }
0x30f4   :  { %v2515_v53 = vpop.eup %2514  ;;  %2291 = vmatmul.msk.f32.vlgmr.msrb.gmra.mxu3 %vm186_vm9, %v2077_v50 }
0x30f5   :  { %1994 = vrot.lane.b32.xlu0 %v2515_v53, %s2707_s21 }
0x3167   :  { %v1995_v55 = vpop.permute.xlu0 %1994 }
0x3168   :  { %v1997_v56 = vmul.f32 %v1995_v55, %v1977_v25 }
0x316a   :  { %v2101_v57 = vrot.slane %v1997_v56, 6 }
0x316c   :  { %2102 = vrot.lane.b32.xlu2 %v2101_v57, %s2708_s2 }
0x3177   :  { %v2097_v6 = vpop.f32.mrf.mxu3 }
0x31c6   :  { %v2103_v59 = vpop.permute.xlu2 %2102 }
0x31c7   :  { %2292 = vmatmul.msk.f32.vlgmr.msra.gmra.mxu1 %vm186_vm9, %v2103_v59 }
0x3244   :  { %v2123_v40 = vpop.f32.mrf.mxu1 }
0x3245   :  { %v2124_v41 = vadd.f32 %v2123_v40, %v2097_v6 }
0x3247   :  { %v2130_v47 = vadd.f32 %v2313_v5, %v2124_v41 }
0x3249   :  { %v2131_v11 = vmax.f32 %v2130_v47, 0.0 }
0x324b   :  { %2293 = vmatmul.msk.f32.vlgmr.msrb.gmra.mxu2 %vm186_vm9, %v2131_v11 }
0x32ce   :  { %v2160_v13 = vpop.f32.mrf.mxu2 }
0x32cf   :  { %v2161_v35 = vadd.f32 %v2314_v12, %v2160_v13 }
0x32d1   :  { %v2163_v58 = vmax.f32 %v2161_v35, 0.0 }
0x32d3   :  { %2294 = vmatmul.msk.f32.vlgmr.msra.gmra.mxu3 %vm186_vm9, %v2163_v58 }
0x3356   :  { %v2192_v15 = vpop.f32.mrf.mxu3 }
0x3357   :  { %v2193_v33 = vadd.f32 %v2315_v14, %v2192_v15 }
0x3359   :  { %v2295_v16 = vmul.f32 -1.442695, %v2193_v33 }
0x335b   :  { %2516 = vpow2.f32 %v2295_v16 }
0x3361   :  { %v2517_v49 = vpop.eup %2516 }
0x3362   :  { %v2198_v17 = vadd.f32 1.0, %v2517_v49 }
0x3364   :  { %2518 = vrcp.f32 %v2198_v17  ;;  %v2210_v34 = vand.u32 2147483648, %v2198_v17  ;;  %v2208_v20 = vand.u32 2147483647, %v2198_v17  ;;  %vm2204_vm9 = vweird.f32 %v2198_v17 }
0x3366   :  { %v2211_v4 = vor.u32 1.1754944e-38, %v2210_v34  ;;  %vm2209_vm6 = vcmp.eq.f32.partialorder %v2208_v20, 8.507059e+37 }
0x336a   :  { %v2519_v2 = vpop.eup %2518 }
0x336b   :  { %v2200_v3 = vmul.f32 %v2519_v2, %v2198_v17  ;;  %vm2205_vm4 = vweird.f32 %v2519_v2 }
0x336c   :  { %vm2206_vm1 = vmor %vm2204_vm9, %vm2205_vm4 }
0x336d   :  { %v2201_v18 = vsub.f32 1.0, %v2200_v3 }
0x336f   :  { %v2202_v19 = vmul.f32 %v2519_v2, %v2201_v18 }
0x3371   :  { %v2203_v36 = vadd.f32 %v2519_v2, %v2202_v19 }
0x3373   :  { %v2207_v21 = vsel %vm2206_vm1, %v2519_v2, %v2203_v36 }
0x3374   :  { %v2212_v9 = vsel %vm2209_vm6, %v2211_v4, %v2207_v21 }
0x3375   :  { %2215 = vst.msk [vmem:[#allocation14] sm:$0x3] %vm2214_vm2, %v2212_v9 }
0x3376   :  { %2226 = dma.vmem_to_hbm [thread:$0]  %s2222_s11, 32, %s2224_s12, [#allocation5]  }
0x3377   :  { %2696 = dma.done.wait [#allocation5], 32  }
0x3378   :  { %2697 = vsyncadd [#allocation5], 4294967264 }
0x3379   :  { %2231 = vsyncpa [#allocation4], 1 }
0x337a   :  { %2232 = vsyncpa [#allocation7], 1 }
0x337b   :  { %2233 = vsyncpa [#allocation10], 1 }
0x337c   :  { %2234 = vsyncpa [#allocation13], 1 }
0x337d   :  { %2235 = vsyncpa [#allocation5], 1 }

</bundles_post_ra>
